<compile_context>
chip_gen: v7x
topology: tpu7x:2x2x1
jax: 0.10.0
libtpu: 0.0.40
codegen_flags: <defaults>
</compile_context>

<pallas_src>
import functools

import jax
import jax.numpy as jnp
from jax import lax
from jax.experimental import pallas as pl
from jax.experimental.pallas import tpu as pltpu

LANE = 128
SUBLANE = 8


def _round_up(n, m):
    return ((n + m - 1) // m) * m


# ------------------------------ Fused kernel ---------------------------------

def fused_gru_kernel(num_layers, T, Hp, x_ref, *rest):
    """Fused stacked GRU + FC head; everything VMEM-resident.

    rest layout:
      per layer l: wih (I_l, 3Hp), whh (Hp, 3Hp),
                   bih_merged (1, 3Hp)  [= b_ih + (b_hr, b_hz, 0)],
                   bhn (1, Hp)          [= b_hn only]
      then:        w1 (Hp, Fp), b1 (1, Fp), w2 (Fp, Cp), b2 (1, Cp)
      then:        out_ref (Bp, Cp)
      scratch:     gi_s (T, Bp, 3Hp), seq_s (T, Bp, Hp)
    Gate blocks [r, z, n] sit at lane-aligned offsets 0, Hp, 2*Hp.
    """
    n_w = 4 * num_layers
    layer_refs = rest[:n_w]
    w1_ref, b1_ref, w2_ref, b2_ref = rest[n_w:n_w + 4]
    out_ref = rest[n_w + 4]
    gi_s, seq_s = rest[n_w + 5:]

    Bp = seq_s.shape[1]

    h_last = None
    for l in range(num_layers):
        wih_ref, whh_ref, bih_ref, bhn_ref = layer_refs[4 * l:4 * l + 4]

        # -- Hoisted input projection for ALL timesteps: one well-shaped matmul
        #    (b_hr / b_hz already folded into bih in the wrapper).
        if l == 0:
            xin = x_ref[...].astype(jnp.float32)          # (T, Bp, I0)
        else:
            xin = seq_s[...]                              # (T, Bp, Hp)
        in_dim = xin.shape[-1]
        gi = jnp.dot(xin.reshape(T * Bp, in_dim), wih_ref[...],
                     preferred_element_type=jnp.float32) + bih_ref[...]
        gi_s[...] = gi.reshape(T, Bp, 3 * Hp)

        # -- Sequential recurrence: one matmul + gate math per step; hidden
        #    state stays in the fori_loop carry (vregs), never touches VMEM.
        whh = whh_ref[...]
        bhn = bhn_ref[...]
        write_seq = l < num_layers - 1   # last layer only needs h_last

        def step(t, h_prev, write_seq=write_seq, whh=whh, bhn=bhn):
            gi_t = gi_s[t]                                 # (Bp, 3Hp)
            gh = jnp.dot(h_prev, whh, preferred_element_type=jnp.float32)
            # lane-aligned gate slices (128-column boundaries)
            i_r = gi_t[:, 0:Hp]
            i_z = gi_t[:, Hp:2 * Hp]
            i_n = gi_t[:, 2 * Hp:3 * Hp]
            h_r = gh[:, 0:Hp]
            h_z = gh[:, Hp:2 * Hp]
            h_n = gh[:, 2 * Hp:3 * Hp] + bhn
            r = jax.nn.sigmoid(i_r + h_r)
            z = jax.nn.sigmoid(i_z + h_z)
            n = jnp.tanh(i_n + r * h_n)
            h_new = n + z * (h_prev - n)                   # == (1-z)*n + z*h
            if write_seq:
                seq_s[t] = h_new                           # VMEM only, never HBM
            return h_new

        h_last = lax.fori_loop(0, T, step,
                               jnp.zeros((Bp, Hp), jnp.float32), unroll=True)

    # ------------------------------- FC head ---------------------------------
    h_last = jnp.maximum(h_last, 0.0)                      # relu(output[:, -1, :])
    y1 = jnp.dot(h_last, w1_ref[...],
                 preferred_element_type=jnp.float32) + b1_ref[...]
    y1 = jnp.maximum(y1, 0.0)
    y2 = jnp.dot(y1, w2_ref[...],
                 preferred_element_type=jnp.float32) + b2_ref[...]
    out_ref[...] = y2.astype(out_ref.dtype)                # lane-dense full store


# ------------------------------ Python wrapper --------------------------------

@jax.jit
def gru_model_forward(x_bti, gru_params, w_fc1, b_fc1, w_fc, b_fc):
    """x_bti: (B, T, input_size), batch_first like the PyTorch module."""
    B, T, I0 = x_bti.shape
    H = gru_params[0][1].shape[1]          # w_hh: (3H, H)
    num_layers = len(gru_params)
    F = w_fc1.shape[0]
    C = w_fc.shape[0]

    Hp = _round_up(H, LANE)                # hidden padded to full lanes
    Fp = _round_up(F, LANE)
    Cp = _round_up(C, LANE)                # logits padded -> unmasked stores
    Bp = _round_up(B, SUBLANE)             # batch padded to full sublanes

    # Time-major, batch padded with zero rows (sliced off at the end).
    x_tbi = jnp.transpose(x_bti, (1, 0, 2)).astype(jnp.float32)
    x_tbi = jnp.pad(x_tbi, ((0, 0), (0, Bp - B), (0, 0)))

    def pad_gates_w(w, in_pad):
        # PyTorch layout (3H, in) -> transposed, lane-aligned (in_pad, 3*Hp);
        # gate g lives at columns [g*Hp, g*Hp + H); padding stays zero, which
        # keeps the padded hidden columns exactly zero through the recurrence.
        in_dim = w.shape[1]
        out = jnp.zeros((in_pad, 3 * Hp), jnp.float32)
        for g in range(3):
            out = out.at[:in_dim, g * Hp:g * Hp + H].set(w[g * H:(g + 1) * H, :].T)
        return out

    def pad_gates_b(b):
        out = jnp.zeros((1, 3 * Hp), jnp.float32)
        for g in range(3):
            out = out.at[0, g * Hp:g * Hp + H].set(b[g * H:(g + 1) * H])
        return out

    flat_params = []
    for layer, (w_ih, w_hh, b_ih, b_hh) in enumerate(gru_params):
        in_pad = I0 if layer == 0 else Hp
        # Fold b_hr / b_hz into the hoisted input-projection bias; only the
        # n-gate recurrent bias stays inside the timestep loop.
        b_ih_merged = jnp.concatenate([b_ih[:2 * H] + b_hh[:2 * H], b_ih[2 * H:]])
        bhn = jnp.zeros((1, Hp), jnp.float32).at[0, :H].set(b_hh[2 * H:])
        flat_params += [pad_gates_w(w_ih, in_pad), pad_gates_w(w_hh, Hp),
                        pad_gates_b(b_ih_merged), bhn]

    # FC head weights, transposed + zero-padded to lane-dense shapes.
    w1 = jnp.zeros((Hp, Fp), jnp.float32).at[:H, :F].set(w_fc1.T)
    b1 = jnp.zeros((1, Fp), jnp.float32).at[0, :F].set(b_fc1)
    w2 = jnp.zeros((Fp, Cp), jnp.float32).at[:F, :C].set(w_fc.T)
    b2 = jnp.zeros((1, Cp), jnp.float32).at[0, :C].set(b_fc)
    flat_params += [w1, b1, w2, b2]

    kernel = functools.partial(fused_gru_kernel, num_layers, T, Hp)
    vmem_spec = pl.BlockSpec(memory_space=pltpu.MemorySpace.VMEM)

    out_padded = pl.pallas_call(
        kernel,
        out_shape=jax.ShapeDtypeStruct((Bp, Cp), jnp.float32),
        in_specs=[vmem_spec] * (1 + len(flat_params)),
        out_specs=vmem_spec,
        scratch_shapes=[
            pltpu.VMEM((T, Bp, 3 * Hp), jnp.float32),   # hoisted gi, all timesteps
            pltpu.VMEM((T, Bp, Hp), jnp.float32),       # per-layer output sequence
        ],
    )(x_tbi, *flat_params)

    return out_padded[:B, :C]


# ----------------------------- Pure-JAX reference ------------------------------

def gru_model_ref(x_bti, gru_params, w_fc1, b_fc1, w_fc, b_fc):
    B, T, _ = x_bti.shape
    inp = x_bti
    for (w_ih, w_hh, b_ih, b_hh) in gru_params:
        H = w_hh.shape[1]
        h = jnp.zeros((B, H), jnp.float32)
        outs = []
        for t in range(T):
            x_t = inp[:, t, :]
            gi = x_t @ w_ih.T + b_ih
            gh = h @ w_hh.T + b_hh
            i_r, i_z, i_n = jnp.split(gi, 3, axis=-1)
            h_r, h_z, h_n = jnp.split(gh, 3, axis=-1)
            r = jax.nn.sigmoid(i_r + h_r)
            z = jax.nn.sigmoid(i_z + h_z)
            n = jnp.tanh(i_n + r * h_n)
            h = (1.0 - z) * n + z * h
            outs.append(h)
        inp = jnp.stack(outs, axis=1)
    out = jnp.maximum(inp[:, -1, :], 0.0)
    out = jnp.maximum(out @ w_fc1.T + b_fc1, 0.0)
    return out @ w_fc.T + b_fc


# ------------------------------------ main -------------------------------------

if __name__ == "__main__":
    batch = 2
    seq_length = 8
    input_size = 16
    hidden_size = 32
    num_layers = 2
    num_classes = 5
    fc1_size = 128

    key = jax.random.PRNGKey(0)

    def uniform(key, shape, bound):
        return jax.random.uniform(key, shape, jnp.float32, -bound, bound)

    # GRU parameters (PyTorch nn.GRU layout: weight_ih (3H, in), weight_hh (3H, H)).
    gru_params = []
    bound_h = 1.0 / (hidden_size ** 0.5)
    for layer in range(num_layers):
        in_sz = input_size if layer == 0 else hidden_size
        key, k1, k2, k3, k4 = jax.random.split(key, 5)
        w_ih = uniform(k1, (3 * hidden_size, in_sz), bound_h)
        w_hh = uniform(k2, (3 * hidden_size, hidden_size), bound_h)
        b_ih = uniform(k3, (3 * hidden_size,), bound_h)
        b_hh = uniform(k4, (3 * hidden_size,), bound_h)
        gru_params.append((w_ih, w_hh, b_ih, b_hh))

    key, k1, k2, k3, k4, kx = jax.random.split(key, 6)
    w_fc1 = uniform(k1, (fc1_size, hidden_size), 1.0 / (hidden_size ** 0.5))
    b_fc1 = uniform(k2, (fc1_size,), 1.0 / (hidden_size ** 0.5))
    w_fc = uniform(k3, (num_classes, fc1_size), 1.0 / (fc1_size ** 0.5))
    b_fc = uniform(k4, (num_classes,), 1.0 / (fc1_size ** 0.5))

    x = jax.random.normal(kx, (batch, seq_length, input_size), jnp.float32)

    out = gru_model_forward(x, gru_params, w_fc1, b_fc1, w_fc, b_fc)
    out = jax.block_until_ready(out)

    ref = gru_model_ref(x, gru_params, w_fc1, b_fc1, w_fc, b_fc)
    assert out.shape == (batch, num_classes), out.shape
    assert jnp.allclose(out, ref, atol=1e-4, rtol=1e-4), (out, ref)

    print("KERNEL_OK")
</pallas_src>

<mosaic_0001>
module attributes {stable_mosaic.version = 11 : i64} {
  func.func @fused_gru_kernel(%arg0: memref<8x8x16xf32, #tpu.memory_space<vmem>>, %arg1: memref<16x384xf32, #tpu.memory_space<vmem>>, %arg2: memref<128x384xf32, #tpu.memory_space<vmem>>, %arg3: memref<1x384xf32, #tpu.memory_space<vmem>>, %arg4: memref<1x128xf32, #tpu.memory_space<vmem>>, %arg5: memref<128x384xf32, #tpu.memory_space<vmem>>, %arg6: memref<128x384xf32, #tpu.memory_space<vmem>>, %arg7: memref<1x384xf32, #tpu.memory_space<vmem>>, %arg8: memref<1x128xf32, #tpu.memory_space<vmem>>, %arg9: memref<128x128xf32, #tpu.memory_space<vmem>>, %arg10: memref<1x128xf32, #tpu.memory_space<vmem>>, %arg11: memref<128x128xf32, #tpu.memory_space<vmem>>, %arg12: memref<1x128xf32, #tpu.memory_space<vmem>>, %arg13: memref<8x128xf32, #tpu.memory_space<vmem>>, %arg14: memref<8x8x384xf32, #tpu.memory_space<vmem>>, %arg15: memref<8x8x128xf32, #tpu.memory_space<vmem>>) attributes {dimension_semantics = [], scalar_prefetch = 0 : i64, scratch_operands = 2 : i64, tpu.core_type = #tpu.core_type<tc>} {
    %c0 = arith.constant 0 : index
    %c0_0 = arith.constant 0 : index
    %c0_1 = arith.constant 0 : index
    %0 = vector.load %arg0[%c0, %c0_0, %c0_1] : memref<8x8x16xf32, #tpu.memory_space<vmem>>, vector<8x8x16xf32>
    %1 = vector.shape_cast %0 : vector<8x8x16xf32> to vector<64x16xf32>
    %c0_2 = arith.constant 0 : index
    %c0_3 = arith.constant 0 : index
    %2 = vector.load %arg1[%c0_2, %c0_3] : memref<16x384xf32, #tpu.memory_space<vmem>>, vector<16x384xf32>
    %cst = arith.constant dense<0.000000e+00> : vector<64x384xf32>
    %3 = tpu.matmul %1, %2, %cst {dimension_numbers = #tpu.dot_dimension_numbers<[1], [0], [0], [1], [0, 0, 1, 1], [], []>} : vector<64x16xf32>, vector<16x384xf32>, vector<64x384xf32> -> vector<64x384xf32>
    %c0_4 = arith.constant 0 : index
    %c0_5 = arith.constant 0 : index
    %4 = vector.load %arg3[%c0_4, %c0_5] : memref<1x384xf32, #tpu.memory_space<vmem>>, vector<1x384xf32>
    %5 = vector.broadcast %4 : vector<1x384xf32> to vector<64x384xf32>
    %6 = arith.addf %3, %5 : vector<64x384xf32>
    %7 = vector.shape_cast %6 : vector<64x384xf32> to vector<8x8x384xf32>
    %c0_6 = arith.constant 0 : index
    %c0_7 = arith.constant 0 : index
    %c0_8 = arith.constant 0 : index
    %8 = vector.load %arg14[%c0_6, %c0_7, %c0_8] : memref<8x8x384xf32, #tpu.memory_space<vmem>>, vector<8x8x384xf32>
    tpu.vector_store %arg14[%c0_6, %c0_7, %c0_8], %7 {strides = array<i32>} : memref<8x8x384xf32, #tpu.memory_space<vmem>>, vector<8x8x384xf32>,
    %c0_9 = arith.constant 0 : index
    %c0_10 = arith.constant 0 : index
    %9 = vector.load %arg2[%c0_9, %c0_10] : memref<128x384xf32, #tpu.memory_space<vmem>>, vector<128x384xf32>
    %c0_11 = arith.constant 0 : index
    %c0_12 = arith.constant 0 : index
    %10 = vector.load %arg4[%c0_11, %c0_12] : memref<1x128xf32, #tpu.memory_space<vmem>>, vector<1x128xf32>
    %cst_13 = arith.constant 0.000000e+00 : f32
    %11 = vector.broadcast %cst_13 : f32 to vector<8x128xf32>
    %c0_i32 = arith.constant 0 : i32
    %12 = arith.index_cast %c0_i32 : i32 to index
    %c0_14 = arith.constant 0 : index
    %c0_15 = arith.constant 0 : index
    %13 = vector.load %arg14[%12, %c0_14, %c0_15] : memref<8x8x384xf32, #tpu.memory_space<vmem>>, vector<1x8x384xf32>
    %14 = vector.shape_cast %13 : vector<1x8x384xf32> to vector<8x384xf32>
    %cst_16 = arith.constant dense<0.000000e+00> : vector<8x384xf32>
    %15 = tpu.matmul %11, %9, %cst_16 {dimension_numbers = #tpu.dot_dimension_numbers<[1], [0], [0], [1], [0, 0, 1, 1], [], []>} : vector<8x128xf32>, vector<128x384xf32>, vector<8x384xf32> -> vector<8x384xf32>
    %16 = vector.extract_strided_slice %14 {offsets = [0, 0], sizes = [8, 128], strides = [1, 1]} : vector<8x384xf32> to vector<8x128xf32>
    %17 = vector.extract_strided_slice %14 {offsets = [0, 128], sizes = [8, 128], strides = [1, 1]} : vector<8x384xf32> to vector<8x128xf32>
    %18 = vector.extract_strided_slice %14 {offsets = [0, 256], sizes = [8, 128], strides = [1, 1]} : vector<8x384xf32> to vector<8x128xf32>
    %19 = vector.extract_strided_slice %15 {offsets = [0, 0], sizes = [8, 128], strides = [1, 1]} : vector<8x384xf32> to vector<8x128xf32>
    %20 = vector.extract_strided_slice %15 {offsets = [0, 128], sizes = [8, 128], strides = [1, 1]} : vector<8x384xf32> to vector<8x128xf32>
    %21 = vector.extract_strided_slice %15 {offsets = [0, 256], sizes = [8, 128], strides = [1, 1]} : vector<8x384xf32> to vector<8x128xf32>
    %22 = vector.broadcast %10 : vector<1x128xf32> to vector<8x128xf32>
    %23 = arith.addf %21, %22 : vector<8x128xf32>
    %24 = arith.addf %16, %19 : vector<8x128xf32>
    %25 = arith.negf %24 : vector<8x128xf32>
    %26 = math.exp %25 : vector<8x128xf32>
    %cst_17 = arith.constant 1.000000e+00 : f32
    %27 = vector.broadcast %cst_17 : f32 to vector<8x128xf32>
    %28 = arith.addf %27, %26 : vector<8x128xf32>
    %29 = arith.divf %27, %28 : vector<8x128xf32>
    %30 = arith.addf %17, %20 : vector<8x128xf32>
    %31 = arith.negf %30 : vector<8x128xf32>
    %32 = math.exp %31 : vector<8x128xf32>
    %cst_18 = arith.constant 1.000000e+00 : f32
    %33 = vector.broadcast %cst_18 : f32 to vector<8x128xf32>
    %34 = arith.addf %33, %32 : vector<8x128xf32>
    %35 = arith.divf %33, %34 : vector<8x128xf32>
    %36 = arith.mulf %29, %23 : vector<8x128xf32>
    %37 = arith.addf %18, %36 : vector<8x128xf32>
    %38 = math.tanh %37 : vector<8x128xf32>
    %39 = arith.subf %11, %38 : vector<8x128xf32>
    %40 = arith.mulf %35, %39 : vector<8x128xf32>
    %41 = arith.addf %38, %40 : vector<8x128xf32>
    %42 = arith.index_cast %c0_i32 : i32 to index
    %c0_19 = arith.constant 0 : index
    %c0_20 = arith.constant 0 : index
    %43 = vector.load %arg15[%42, %c0_19, %c0_20] : memref<8x8x128xf32, #tpu.memory_space<vmem>>, vector<1x8x128xf32>
    %44 = vector.shape_cast %43 : vector<1x8x128xf32> to vector<8x128xf32>
    %45 = vector.shape_cast %41 : vector<8x128xf32> to vector<1x8x128xf32>
    tpu.vector_store %arg15[%42, %c0_19, %c0_20], %45 {strides = array<i32>} : memref<8x8x128xf32, #tpu.memory_space<vmem>>, vector<1x8x128xf32>,
    %c1_i32 = arith.constant 1 : i32
    %46 = arith.index_cast %c1_i32 : i32 to index
    %c0_21 = arith.constant 0 : index
    %c0_22 = arith.constant 0 : index
    %47 = vector.load %arg14[%46, %c0_21, %c0_22] : memref<8x8x384xf32, #tpu.memory_space<vmem>>, vector<1x8x384xf32>
    %48 = vector.shape_cast %47 : vector<1x8x384xf32> to vector<8x384xf32>
    %cst_23 = arith.constant dense<0.000000e+00> : vector<8x384xf32>
    %49 = tpu.matmul %41, %9, %cst_23 {dimension_numbers = #tpu.dot_dimension_numbers<[1], [0], [0], [1], [0, 0, 1, 1], [], []>} : vector<8x128xf32>, vector<128x384xf32>, vector<8x384xf32> -> vector<8x384xf32>
    %50 = vector.extract_strided_slice %48 {offsets = [0, 0], sizes = [8, 128], strides = [1, 1]} : vector<8x384xf32> to vector<8x128xf32>
    %51 = vector.extract_strided_slice %48 {offsets = [0, 128], sizes = [8, 128], strides = [1, 1]} : vector<8x384xf32> to vector<8x128xf32>
    %52 = vector.extract_strided_slice %48 {offsets = [0, 256], sizes = [8, 128], strides = [1, 1]} : vector<8x384xf32> to vector<8x128xf32>
    %53 = vector.extract_strided_slice %49 {offsets = [0, 0], sizes = [8, 128], strides = [1, 1]} : vector<8x384xf32> to vector<8x128xf32>
    %54 = vector.extract_strided_slice %49 {offsets = [0, 128], sizes = [8, 128], strides = [1, 1]} : vector<8x384xf32> to vector<8x128xf32>
    %55 = vector.extract_strided_slice %49 {offsets = [0, 256], sizes = [8, 128], strides = [1, 1]} : vector<8x384xf32> to vector<8x128xf32>
    %56 = vector.broadcast %10 : vector<1x128xf32> to vector<8x128xf32>
    %57 = arith.addf %55, %56 : vector<8x128xf32>
    %58 = arith.addf %50, %53 : vector<8x128xf32>
    %59 = arith.negf %58 : vector<8x128xf32>
    %60 = math.exp %59 : vector<8x128xf32>
    %cst_24 = arith.constant 1.000000e+00 : f32
    %61 = vector.broadcast %cst_24 : f32 to vector<8x128xf32>
    %62 = arith.addf %61, %60 : vector<8x128xf32>
    %63 = arith.divf %61, %62 : vector<8x128xf32>
    %64 = arith.addf %51, %54 : vector<8x128xf32>
    %65 = arith.negf %64 : vector<8x128xf32>
    %66 = math.exp %65 : vector<8x128xf32>
    %cst_25 = arith.constant 1.000000e+00 : f32
    %67 = vector.broadcast %cst_25 : f32 to vector<8x128xf32>
    %68 = arith.addf %67, %66 : vector<8x128xf32>
    %69 = arith.divf %67, %68 : vector<8x128xf32>
    %70 = arith.mulf %63, %57 : vector<8x128xf32>
    %71 = arith.addf %52, %70 : vector<8x128xf32>
    %72 = math.tanh %71 : vector<8x128xf32>
    %73 = arith.subf %41, %72 : vector<8x128xf32>
    %74 = arith.mulf %69, %73 : vector<8x128xf32>
    %75 = arith.addf %72, %74 : vector<8x128xf32>
    %76 = arith.index_cast %c1_i32 : i32 to index
    %c0_26 = arith.constant 0 : index
    %c0_27 = arith.constant 0 : index
    %77 = vector.load %arg15[%76, %c0_26, %c0_27] : memref<8x8x128xf32, #tpu.memory_space<vmem>>, vector<1x8x128xf32>
    %78 = vector.shape_cast %77 : vector<1x8x128xf32> to vector<8x128xf32>
    %79 = vector.shape_cast %75 : vector<8x128xf32> to vector<1x8x128xf32>
    tpu.vector_store %arg15[%76, %c0_26, %c0_27], %79 {strides = array<i32>} : memref<8x8x128xf32, #tpu.memory_space<vmem>>, vector<1x8x128xf32>,
    %c2_i32 = arith.constant 2 : i32
    %80 = arith.index_cast %c2_i32 : i32 to index
    %c0_28 = arith.constant 0 : index
    %c0_29 = arith.constant 0 : index
    %81 = vector.load %arg14[%80, %c0_28, %c0_29] : memref<8x8x384xf32, #tpu.memory_space<vmem>>, vector<1x8x384xf32>
    %82 = vector.shape_cast %81 : vector<1x8x384xf32> to vector<8x384xf32>
    %cst_30 = arith.constant dense<0.000000e+00> : vector<8x384xf32>
    %83 = tpu.matmul %75, %9, %cst_30 {dimension_numbers = #tpu.dot_dimension_numbers<[1], [0], [0], [1], [0, 0, 1, 1], [], []>} : vector<8x128xf32>, vector<128x384xf32>, vector<8x384xf32> -> vector<8x384xf32>
    %84 = vector.extract_strided_slice %82 {offsets = [0, 0], sizes = [8, 128], strides = [1, 1]} : vector<8x384xf32> to vector<8x128xf32>
    %85 = vector.extract_strided_slice %82 {offsets = [0, 128], sizes = [8, 128], strides = [1, 1]} : vector<8x384xf32> to vector<8x128xf32>
    %86 = vector.extract_strided_slice %82 {offsets = [0, 256], sizes = [8, 128], strides = [1, 1]} : vector<8x384xf32> to vector<8x128xf32>
    %87 = vector.extract_strided_slice %83 {offsets = [0, 0], sizes = [8, 128], strides = [1, 1]} : vector<8x384xf32> to vector<8x128xf32>
    %88 = vector.extract_strided_slice %83 {offsets = [0, 128], sizes = [8, 128], strides = [1, 1]} : vector<8x384xf32> to vector<8x128xf32>
    %89 = vector.extract_strided_slice %83 {offsets = [0, 256], sizes = [8, 128], strides = [1, 1]} : vector<8x384xf32> to vector<8x128xf32>
    %90 = vector.broadcast %10 : vector<1x128xf32> to vector<8x128xf32>
    %91 = arith.addf %89, %90 : vector<8x128xf32>
    %92 = arith.addf %84, %87 : vector<8x128xf32>
    %93 = arith.negf %92 : vector<8x128xf32>
    %94 = math.exp %93 : vector<8x128xf32>
    %cst_31 = arith.constant 1.000000e+00 : f32
    %95 = vector.broadcast %cst_31 : f32 to vector<8x128xf32>
    %96 = arith.addf %95, %94 : vector<8x128xf32>
    %97 = arith.divf %95, %96 : vector<8x128xf32>
    %98 = arith.addf %85, %88 : vector<8x128xf32>
    %99 = arith.negf %98 : vector<8x128xf32>
    %100 = math.exp %99 : vector<8x128xf32>
    %cst_32 = arith.constant 1.000000e+00 : f32
    %101 = vector.broadcast %cst_32 : f32 to vector<8x128xf32>
    %102 = arith.addf %101, %100 : vector<8x128xf32>
    %103 = arith.divf %101, %102 : vector<8x128xf32>
    %104 = arith.mulf %97, %91 : vector<8x128xf32>
    %105 = arith.addf %86, %104 : vector<8x128xf32>
    %106 = math.tanh %105 : vector<8x128xf32>
    %107 = arith.subf %75, %106 : vector<8x128xf32>
    %108 = arith.mulf %103, %107 : vector<8x128xf32>
    %109 = arith.addf %106, %108 : vector<8x128xf32>
    %110 = arith.index_cast %c2_i32 : i32 to index
    %c0_33 = arith.constant 0 : index
    %c0_34 = arith.constant 0 : index
    %111 = vector.load %arg15[%110, %c0_33, %c0_34] : memref<8x8x128xf32, #tpu.memory_space<vmem>>, vector<1x8x128xf32>
    %112 = vector.shape_cast %111 : vector<1x8x128xf32> to vector<8x128xf32>
    %113 = vector.shape_cast %109 : vector<8x128xf32> to vector<1x8x128xf32>
    tpu.vector_store %arg15[%110, %c0_33, %c0_34], %113 {strides = array<i32>} : memref<8x8x128xf32, #tpu.memory_space<vmem>>, vector<1x8x128xf32>,
    %c3_i32 = arith.constant 3 : i32
    %114 = arith.index_cast %c3_i32 : i32 to index
    %c0_35 = arith.constant 0 : index
    %c0_36 = arith.constant 0 : index
    %115 = vector.load %arg14[%114, %c0_35, %c0_36] : memref<8x8x384xf32, #tpu.memory_space<vmem>>, vector<1x8x384xf32>
    %116 = vector.shape_cast %115 : vector<1x8x384xf32> to vector<8x384xf32>
    %cst_37 = arith.constant dense<0.000000e+00> : vector<8x384xf32>
    %117 = tpu.matmul %109, %9, %cst_37 {dimension_numbers = #tpu.dot_dimension_numbers<[1], [0], [0], [1], [0, 0, 1, 1], [], []>} : vector<8x128xf32>, vector<128x384xf32>, vector<8x384xf32> -> vector<8x384xf32>
    %118 = vector.extract_strided_slice %116 {offsets = [0, 0], sizes = [8, 128], strides = [1, 1]} : vector<8x384xf32> to vector<8x128xf32>
    %119 = vector.extract_strided_slice %116 {offsets = [0, 128], sizes = [8, 128], strides = [1, 1]} : vector<8x384xf32> to vector<8x128xf32>
    %120 = vector.extract_strided_slice %116 {offsets = [0, 256], sizes = [8, 128], strides = [1, 1]} : vector<8x384xf32> to vector<8x128xf32>
    %121 = vector.extract_strided_slice %117 {offsets = [0, 0], sizes = [8, 128], strides = [1, 1]} : vector<8x384xf32> to vector<8x128xf32>
    %122 = vector.extract_strided_slice %117 {offsets = [0, 128], sizes = [8, 128], strides = [1, 1]} : vector<8x384xf32> to vector<8x128xf32>
    %123 = vector.extract_strided_slice %117 {offsets = [0, 256], sizes = [8, 128], strides = [1, 1]} : vector<8x384xf32> to vector<8x128xf32>
    %124 = vector.broadcast %10 : vector<1x128xf32> to vector<8x128xf32>
    %125 = arith.addf %123, %124 : vector<8x128xf32>
    %126 = arith.addf %118, %121 : vector<8x128xf32>
    %127 = arith.negf %126 : vector<8x128xf32>
    %128 = math.exp %127 : vector<8x128xf32>
    %cst_38 = arith.constant 1.000000e+00 : f32
    %129 = vector.broadcast %cst_38 : f32 to vector<8x128xf32>
    %130 = arith.addf %129, %128 : vector<8x128xf32>
    %131 = arith.divf %129, %130 : vector<8x128xf32>
    %132 = arith.addf %119, %122 : vector<8x128xf32>
    %133 = arith.negf %132 : vector<8x128xf32>
    %134 = math.exp %133 : vector<8x128xf32>
    %cst_39 = arith.constant 1.000000e+00 : f32
    %135 = vector.broadcast %cst_39 : f32 to vector<8x128xf32>
    %136 = arith.addf %135, %134 : vector<8x128xf32>
    %137 = arith.divf %135, %136 : vector<8x128xf32>
    %138 = arith.mulf %131, %125 : vector<8x128xf32>
    %139 = arith.addf %120, %138 : vector<8x128xf32>
    %140 = math.tanh %139 : vector<8x128xf32>
    %141 = arith.subf %109, %140 : vector<8x128xf32>
    %142 = arith.mulf %137, %141 : vector<8x128xf32>
    %143 = arith.addf %140, %142 : vector<8x128xf32>
    %144 = arith.index_cast %c3_i32 : i32 to index
    %c0_40 = arith.constant 0 : index
    %c0_41 = arith.constant 0 : index
    %145 = vector.load %arg15[%144, %c0_40, %c0_41] : memref<8x8x128xf32, #tpu.memory_space<vmem>>, vector<1x8x128xf32>
    %146 = vector.shape_cast %145 : vector<1x8x128xf32> to vector<8x128xf32>
    %147 = vector.shape_cast %143 : vector<8x128xf32> to vector<1x8x128xf32>
    tpu.vector_store %arg15[%144, %c0_40, %c0_41], %147 {strides = array<i32>} : memref<8x8x128xf32, #tpu.memory_space<vmem>>, vector<1x8x128xf32>,
    %c4_i32 = arith.constant 4 : i32
    %148 = arith.index_cast %c4_i32 : i32 to index
    %c0_42 = arith.constant 0 : index
    %c0_43 = arith.constant 0 : index
    %149 = vector.load %arg14[%148, %c0_42, %c0_43] : memref<8x8x384xf32, #tpu.memory_space<vmem>>, vector<1x8x384xf32>
    %150 = vector.shape_cast %149 : vector<1x8x384xf32> to vector<8x384xf32>
    %cst_44 = arith.constant dense<0.000000e+00> : vector<8x384xf32>
    %151 = tpu.matmul %143, %9, %cst_44 {dimension_numbers = #tpu.dot_dimension_numbers<[1], [0], [0], [1], [0, 0, 1, 1], [], []>} : vector<8x128xf32>, vector<128x384xf32>, vector<8x384xf32> -> vector<8x384xf32>
    %152 = vector.extract_strided_slice %150 {offsets = [0, 0], sizes = [8, 128], strides = [1, 1]} : vector<8x384xf32> to vector<8x128xf32>
    %153 = vector.extract_strided_slice %150 {offsets = [0, 128], sizes = [8, 128], strides = [1, 1]} : vector<8x384xf32> to vector<8x128xf32>
    %154 = vector.extract_strided_slice %150 {offsets = [0, 256], sizes = [8, 128], strides = [1, 1]} : vector<8x384xf32> to vector<8x128xf32>
    %155 = vector.extract_strided_slice %151 {offsets = [0, 0], sizes = [8, 128], strides = [1, 1]} : vector<8x384xf32> to vector<8x128xf32>
    %156 = vector.extract_strided_slice %151 {offsets = [0, 128], sizes = [8, 128], strides = [1, 1]} : vector<8x384xf32> to vector<8x128xf32>
    %157 = vector.extract_strided_slice %151 {offsets = [0, 256], sizes = [8, 128], strides = [1, 1]} : vector<8x384xf32> to vector<8x128xf32>
    %158 = vector.broadcast %10 : vector<1x128xf32> to vector<8x128xf32>
    %159 = arith.addf %157, %158 : vector<8x128xf32>
    %160 = arith.addf %152, %155 : vector<8x128xf32>
    %161 = arith.negf %160 : vector<8x128xf32>
    %162 = math.exp %161 : vector<8x128xf32>
    %cst_45 = arith.constant 1.000000e+00 : f32
    %163 = vector.broadcast %cst_45 : f32 to vector<8x128xf32>
    %164 = arith.addf %163, %162 : vector<8x128xf32>
    %165 = arith.divf %163, %164 : vector<8x128xf32>
    %166 = arith.addf %153, %156 : vector<8x128xf32>
    %167 = arith.negf %166 : vector<8x128xf32>
    %168 = math.exp %167 : vector<8x128xf32>
    %cst_46 = arith.constant 1.000000e+00 : f32
    %169 = vector.broadcast %cst_46 : f32 to vector<8x128xf32>
    %170 = arith.addf %169, %168 : vector<8x128xf32>
    %171 = arith.divf %169, %170 : vector<8x128xf32>
    %172 = arith.mulf %165, %159 : vector<8x128xf32>
    %173 = arith.addf %154, %172 : vector<8x128xf32>
    %174 = math.tanh %173 : vector<8x128xf32>
    %175 = arith.subf %143, %174 : vector<8x128xf32>
    %176 = arith.mulf %171, %175 : vector<8x128xf32>
    %177 = arith.addf %174, %176 : vector<8x128xf32>
    %178 = arith.index_cast %c4_i32 : i32 to index
    %c0_47 = arith.constant 0 : index
    %c0_48 = arith.constant 0 : index
    %179 = vector.load %arg15[%178, %c0_47, %c0_48] : memref<8x8x128xf32, #tpu.memory_space<vmem>>, vector<1x8x128xf32>
    %180 = vector.shape_cast %179 : vector<1x8x128xf32> to vector<8x128xf32>
    %181 = vector.shape_cast %177 : vector<8x128xf32> to vector<1x8x128xf32>
    tpu.vector_store %arg15[%178, %c0_47, %c0_48], %181 {strides = array<i32>} : memref<8x8x128xf32, #tpu.memory_space<vmem>>, vector<1x8x128xf32>,
    %c5_i32 = arith.constant 5 : i32
    %182 = arith.index_cast %c5_i32 : i32 to index
    %c0_49 = arith.constant 0 : index
    %c0_50 = arith.constant 0 : index
    %183 = vector.load %arg14[%182, %c0_49, %c0_50] : memref<8x8x384xf32, #tpu.memory_space<vmem>>, vector<1x8x384xf32>
    %184 = vector.shape_cast %183 : vector<1x8x384xf32> to vector<8x384xf32>
    %cst_51 = arith.constant dense<0.000000e+00> : vector<8x384xf32>
    %185 = tpu.matmul %177, %9, %cst_51 {dimension_numbers = #tpu.dot_dimension_numbers<[1], [0], [0], [1], [0, 0, 1, 1], [], []>} : vector<8x128xf32>, vector<128x384xf32>, vector<8x384xf32> -> vector<8x384xf32>
    %186 = vector.extract_strided_slice %184 {offsets = [0, 0], sizes = [8, 128], strides = [1, 1]} : vector<8x384xf32> to vector<8x128xf32>
    %187 = vector.extract_strided_slice %184 {offsets = [0, 128], sizes = [8, 128], strides = [1, 1]} : vector<8x384xf32> to vector<8x128xf32>
    %188 = vector.extract_strided_slice %184 {offsets = [0, 256], sizes = [8, 128], strides = [1, 1]} : vector<8x384xf32> to vector<8x128xf32>
    %189 = vector.extract_strided_slice %185 {offsets = [0, 0], sizes = [8, 128], strides = [1, 1]} : vector<8x384xf32> to vector<8x128xf32>
    %190 = vector.extract_strided_slice %185 {offsets = [0, 128], sizes = [8, 128], strides = [1, 1]} : vector<8x384xf32> to vector<8x128xf32>
    %191 = vector.extract_strided_slice %185 {offsets = [0, 256], sizes = [8, 128], strides = [1, 1]} : vector<8x384xf32> to vector<8x128xf32>
    %192 = vector.broadcast %10 : vector<1x128xf32> to vector<8x128xf32>
    %193 = arith.addf %191, %192 : vector<8x128xf32>
    %194 = arith.addf %186, %189 : vector<8x128xf32>
    %195 = arith.negf %194 : vector<8x128xf32>
    %196 = math.exp %195 : vector<8x128xf32>
    %cst_52 = arith.constant 1.000000e+00 : f32
    %197 = vector.broadcast %cst_52 : f32 to vector<8x128xf32>
    %198 = arith.addf %197, %196 : vector<8x128xf32>
    %199 = arith.divf %197, %198 : vector<8x128xf32>
    %200 = arith.addf %187, %190 : vector<8x128xf32>
    %201 = arith.negf %200 : vector<8x128xf32>
    %202 = math.exp %201 : vector<8x128xf32>
    %cst_53 = arith.constant 1.000000e+00 : f32
    %203 = vector.broadcast %cst_53 : f32 to vector<8x128xf32>
    %204 = arith.addf %203, %202 : vector<8x128xf32>
    %205 = arith.divf %203, %204 : vector<8x128xf32>
    %206 = arith.mulf %199, %193 : vector<8x128xf32>
    %207 = arith.addf %188, %206 : vector<8x128xf32>
    %208 = math.tanh %207 : vector<8x128xf32>
    %209 = arith.subf %177, %208 : vector<8x128xf32>
    %210 = arith.mulf %205, %209 : vector<8x128xf32>
    %211 = arith.addf %208, %210 : vector<8x128xf32>
    %212 = arith.index_cast %c5_i32 : i32 to index
    %c0_54 = arith.constant 0 : index
    %c0_55 = arith.constant 0 : index
    %213 = vector.load %arg15[%212, %c0_54, %c0_55] : memref<8x8x128xf32, #tpu.memory_space<vmem>>, vector<1x8x128xf32>
    %214 = vector.shape_cast %213 : vector<1x8x128xf32> to vector<8x128xf32>
    %215 = vector.shape_cast %211 : vector<8x128xf32> to vector<1x8x128xf32>
    tpu.vector_store %arg15[%212, %c0_54, %c0_55], %215 {strides = array<i32>} : memref<8x8x128xf32, #tpu.memory_space<vmem>>, vector<1x8x128xf32>,
    %c6_i32 = arith.constant 6 : i32
    %216 = arith.index_cast %c6_i32 : i32 to index
    %c0_56 = arith.constant 0 : index
    %c0_57 = arith.constant 0 : index
    %217 = vector.load %arg14[%216, %c0_56, %c0_57] : memref<8x8x384xf32, #tpu.memory_space<vmem>>, vector<1x8x384xf32>
    %218 = vector.shape_cast %217 : vector<1x8x384xf32> to vector<8x384xf32>
    %cst_58 = arith.constant dense<0.000000e+00> : vector<8x384xf32>
    %219 = tpu.matmul %211, %9, %cst_58 {dimension_numbers = #tpu.dot_dimension_numbers<[1], [0], [0], [1], [0, 0, 1, 1], [], []>} : vector<8x128xf32>, vector<128x384xf32>, vector<8x384xf32> -> vector<8x384xf32>
    %220 = vector.extract_strided_slice %218 {offsets = [0, 0], sizes = [8, 128], strides = [1, 1]} : vector<8x384xf32> to vector<8x128xf32>
    %221 = vector.extract_strided_slice %218 {offsets = [0, 128], sizes = [8, 128], strides = [1, 1]} : vector<8x384xf32> to vector<8x128xf32>
    %222 = vector.extract_strided_slice %218 {offsets = [0, 256], sizes = [8, 128], strides = [1, 1]} : vector<8x384xf32> to vector<8x128xf32>
    %223 = vector.extract_strided_slice %219 {offsets = [0, 0], sizes = [8, 128], strides = [1, 1]} : vector<8x384xf32> to vector<8x128xf32>
    %224 = vector.extract_strided_slice %219 {offsets = [0, 128], sizes = [8, 128], strides = [1, 1]} : vector<8x384xf32> to vector<8x128xf32>
    %225 = vector.extract_strided_slice %219 {offsets = [0, 256], sizes = [8, 128], strides = [1, 1]} : vector<8x384xf32> to vector<8x128xf32>
    %226 = vector.broadcast %10 : vector<1x128xf32> to vector<8x128xf32>
    %227 = arith.addf %225, %226 : vector<8x128xf32>
    %228 = arith.addf %220, %223 : vector<8x128xf32>
    %229 = arith.negf %228 : vector<8x128xf32>
    %230 = math.exp %229 : vector<8x128xf32>
    %cst_59 = arith.constant 1.000000e+00 : f32
    %231 = vector.broadcast %cst_59 : f32 to vector<8x128xf32>
    %232 = arith.addf %231, %230 : vector<8x128xf32>
    %233 = arith.divf %231, %232 : vector<8x128xf32>
    %234 = arith.addf %221, %224 : vector<8x128xf32>
    %235 = arith.negf %234 : vector<8x128xf32>
    %236 = math.exp %235 : vector<8x128xf32>
    %cst_60 = arith.constant 1.000000e+00 : f32
    %237 = vector.broadcast %cst_60 : f32 to vector<8x128xf32>
    %238 = arith.addf %237, %236 : vector<8x128xf32>
    %239 = arith.divf %237, %238 : vector<8x128xf32>
    %240 = arith.mulf %233, %227 : vector<8x128xf32>
    %241 = arith.addf %222, %240 : vector<8x128xf32>
    %242 = math.tanh %241 : vector<8x128xf32>
    %243 = arith.subf %211, %242 : vector<8x128xf32>
    %244 = arith.mulf %239, %243 : vector<8x128xf32>
    %245 = arith.addf %242, %244 : vector<8x128xf32>
    %246 = arith.index_cast %c6_i32 : i32 to index
    %c0_61 = arith.constant 0 : index
    %c0_62 = arith.constant 0 : index
    %247 = vector.load %arg15[%246, %c0_61, %c0_62] : memref<8x8x128xf32, #tpu.memory_space<vmem>>, vector<1x8x128xf32>
    %248 = vector.shape_cast %247 : vector<1x8x128xf32> to vector<8x128xf32>
    %249 = vector.shape_cast %245 : vector<8x128xf32> to vector<1x8x128xf32>
    tpu.vector_store %arg15[%246, %c0_61, %c0_62], %249 {strides = array<i32>} : memref<8x8x128xf32, #tpu.memory_space<vmem>>, vector<1x8x128xf32>,
    %c7_i32 = arith.constant 7 : i32
    %250 = arith.index_cast %c7_i32 : i32 to index
    %c0_63 = arith.constant 0 : index
    %c0_64 = arith.constant 0 : index
    %251 = vector.load %arg14[%250, %c0_63, %c0_64] : memref<8x8x384xf32, #tpu.memory_space<vmem>>, vector<1x8x384xf32>
    %252 = vector.shape_cast %251 : vector<1x8x384xf32> to vector<8x384xf32>
    %cst_65 = arith.constant dense<0.000000e+00> : vector<8x384xf32>
    %253 = tpu.matmul %245, %9, %cst_65 {dimension_numbers = #tpu.dot_dimension_numbers<[1], [0], [0], [1], [0, 0, 1, 1], [], []>} : vector<8x128xf32>, vector<128x384xf32>, vector<8x384xf32> -> vector<8x384xf32>
    %254 = vector.extract_strided_slice %252 {offsets = [0, 0], sizes = [8, 128], strides = [1, 1]} : vector<8x384xf32> to vector<8x128xf32>
    %255 = vector.extract_strided_slice %252 {offsets = [0, 128], sizes = [8, 128], strides = [1, 1]} : vector<8x384xf32> to vector<8x128xf32>
    %256 = vector.extract_strided_slice %252 {offsets = [0, 256], sizes = [8, 128], strides = [1, 1]} : vector<8x384xf32> to vector<8x128xf32>
    %257 = vector.extract_strided_slice %253 {offsets = [0, 0], sizes = [8, 128], strides = [1, 1]} : vector<8x384xf32> to vector<8x128xf32>
    %258 = vector.extract_strided_slice %253 {offsets = [0, 128], sizes = [8, 128], strides = [1, 1]} : vector<8x384xf32> to vector<8x128xf32>
    %259 = vector.extract_strided_slice %253 {offsets = [0, 256], sizes = [8, 128], strides = [1, 1]} : vector<8x384xf32> to vector<8x128xf32>
    %260 = vector.broadcast %10 : vector<1x128xf32> to vector<8x128xf32>
    %261 = arith.addf %259, %260 : vector<8x128xf32>
    %262 = arith.addf %254, %257 : vector<8x128xf32>
    %263 = arith.negf %262 : vector<8x128xf32>
    %264 = math.exp %263 : vector<8x128xf32>
    %cst_66 = arith.constant 1.000000e+00 : f32
    %265 = vector.broadcast %cst_66 : f32 to vector<8x128xf32>
    %266 = arith.addf %265, %264 : vector<8x128xf32>
    %267 = arith.divf %265, %266 : vector<8x128xf32>
    %268 = arith.addf %255, %258 : vector<8x128xf32>
    %269 = arith.negf %268 : vector<8x128xf32>
    %270 = math.exp %269 : vector<8x128xf32>
    %cst_67 = arith.constant 1.000000e+00 : f32
    %271 = vector.broadcast %cst_67 : f32 to vector<8x128xf32>
    %272 = arith.addf %271, %270 : vector<8x128xf32>
    %273 = arith.divf %271, %272 : vector<8x128xf32>
    %274 = arith.mulf %267, %261 : vector<8x128xf32>
    %275 = arith.addf %256, %274 : vector<8x128xf32>
    %276 = math.tanh %275 : vector<8x128xf32>
    %277 = arith.subf %245, %276 : vector<8x128xf32>
    %278 = arith.mulf %273, %277 : vector<8x128xf32>
    %279 = arith.addf %276, %278 : vector<8x128xf32>
    %280 = arith.index_cast %c7_i32 : i32 to index
    %c0_68 = arith.constant 0 : index
    %c0_69 = arith.constant 0 : index
    %281 = vector.load %arg15[%280, %c0_68, %c0_69] : memref<8x8x128xf32, #tpu.memory_space<vmem>>, vector<1x8x128xf32>
    %282 = vector.shape_cast %281 : vector<1x8x128xf32> to vector<8x128xf32>
    %283 = vector.shape_cast %279 : vector<8x128xf32> to vector<1x8x128xf32>
    tpu.vector_store %arg15[%280, %c0_68, %c0_69], %283 {strides = array<i32>} : memref<8x8x128xf32, #tpu.memory_space<vmem>>, vector<1x8x128xf32>,
    %c8_i32 = arith.constant 8 : i32
    %c0_70 = arith.constant 0 : index
    %c0_71 = arith.constant 0 : index
    %c0_72 = arith.constant 0 : index
    %284 = vector.load %arg15[%c0_70, %c0_71, %c0_72] : memref<8x8x128xf32, #tpu.memory_space<vmem>>, vector<8x8x128xf32>
    %285 = vector.shape_cast %284 : vector<8x8x128xf32> to vector<64x128xf32>
    %c0_73 = arith.constant 0 : index
    %c0_74 = arith.constant 0 : index
    %286 = vector.load %arg5[%c0_73, %c0_74] : memref<128x384xf32, #tpu.memory_space<vmem>>, vector<128x384xf32>
    %cst_75 = arith.constant dense<0.000000e+00> : vector<64x384xf32>
    %287 = tpu.matmul %285, %286, %cst_75 {dimension_numbers = #tpu.dot_dimension_numbers<[1], [0], [0], [1], [0, 0, 1, 1], [], []>} : vector<64x128xf32>, vector<128x384xf32>, vector<64x384xf32> -> vector<64x384xf32>
    %c0_76 = arith.constant 0 : index
    %c0_77 = arith.constant 0 : index
    %288 = vector.load %arg7[%c0_76, %c0_77] : memref<1x384xf32, #tpu.memory_space<vmem>>, vector<1x384xf32>
    %289 = vector.broadcast %288 : vector<1x384xf32> to vector<64x384xf32>
    %290 = arith.addf %287, %289 : vector<64x384xf32>
    %291 = vector.shape_cast %290 : vector<64x384xf32> to vector<8x8x384xf32>
    %c0_78 = arith.constant 0 : index
    %c0_79 = arith.constant 0 : index
    %c0_80 = arith.constant 0 : index
    %292 = vector.load %arg14[%c0_78, %c0_79, %c0_80] : memref<8x8x384xf32, #tpu.memory_space<vmem>>, vector<8x8x384xf32>
    tpu.vector_store %arg14[%c0_78, %c0_79, %c0_80], %291 {strides = array<i32>} : memref<8x8x384xf32, #tpu.memory_space<vmem>>, vector<8x8x384xf32>,
    %c0_81 = arith.constant 0 : index
    %c0_82 = arith.constant 0 : index
    %293 = vector.load %arg6[%c0_81, %c0_82] : memref<128x384xf32, #tpu.memory_space<vmem>>, vector<128x384xf32>
    %c0_83 = arith.constant 0 : index
    %c0_84 = arith.constant 0 : index
    %294 = vector.load %arg8[%c0_83, %c0_84] : memref<1x128xf32, #tpu.memory_space<vmem>>, vector<1x128xf32>
    %cst_85 = arith.constant 0.000000e+00 : f32
    %295 = vector.broadcast %cst_85 : f32 to vector<8x128xf32>
    %c0_i32_86 = arith.constant 0 : i32
    %296 = arith.index_cast %c0_i32_86 : i32 to index
    %c0_87 = arith.constant 0 : index
    %c0_88 = arith.constant 0 : index
    %297 = vector.load %arg14[%296, %c0_87, %c0_88] : memref<8x8x384xf32, #tpu.memory_space<vmem>>, vector<1x8x384xf32>
    %298 = vector.shape_cast %297 : vector<1x8x384xf32> to vector<8x384xf32>
    %cst_89 = arith.constant dense<0.000000e+00> : vector<8x384xf32>
    %299 = tpu.matmul %295, %293, %cst_89 {dimension_numbers = #tpu.dot_dimension_numbers<[1], [0], [0], [1], [0, 0, 1, 1], [], []>} : vector<8x128xf32>, vector<128x384xf32>, vector<8x384xf32> -> vector<8x384xf32>
    %300 = vector.extract_strided_slice %298 {offsets = [0, 0], sizes = [8, 128], strides = [1, 1]} : vector<8x384xf32> to vector<8x128xf32>
    %301 = vector.extract_strided_slice %298 {offsets = [0, 128], sizes = [8, 128], strides = [1, 1]} : vector<8x384xf32> to vector<8x128xf32>
    %302 = vector.extract_strided_slice %298 {offsets = [0, 256], sizes = [8, 128], strides = [1, 1]} : vector<8x384xf32> to vector<8x128xf32>
    %303 = vector.extract_strided_slice %299 {offsets = [0, 0], sizes = [8, 128], strides = [1, 1]} : vector<8x384xf32> to vector<8x128xf32>
    %304 = vector.extract_strided_slice %299 {offsets = [0, 128], sizes = [8, 128], strides = [1, 1]} : vector<8x384xf32> to vector<8x128xf32>
    %305 = vector.extract_strided_slice %299 {offsets = [0, 256], sizes = [8, 128], strides = [1, 1]} : vector<8x384xf32> to vector<8x128xf32>
    %306 = vector.broadcast %294 : vector<1x128xf32> to vector<8x128xf32>
    %307 = arith.addf %305, %306 : vector<8x128xf32>
    %308 = arith.addf %300, %303 : vector<8x128xf32>
    %309 = arith.negf %308 : vector<8x128xf32>
    %310 = math.exp %309 : vector<8x128xf32>
    %cst_90 = arith.constant 1.000000e+00 : f32
    %311 = vector.broadcast %cst_90 : f32 to vector<8x128xf32>
    %312 = arith.addf %311, %310 : vector<8x128xf32>
    %313 = arith.divf %311, %312 : vector<8x128xf32>
    %314 = arith.addf %301, %304 : vector<8x128xf32>
    %315 = arith.negf %314 : vector<8x128xf32>
    %316 = math.exp %315 : vector<8x128xf32>
    %cst_91 = arith.constant 1.000000e+00 : f32
    %317 = vector.broadcast %cst_91 : f32 to vector<8x128xf32>
    %318 = arith.addf %317, %316 : vector<8x128xf32>
    %319 = arith.divf %317, %318 : vector<8x128xf32>
    %320 = arith.mulf %313, %307 : vector<8x128xf32>
    %321 = arith.addf %302, %320 : vector<8x128xf32>
    %322 = math.tanh %321 : vector<8x128xf32>
    %323 = arith.subf %295, %322 : vector<8x128xf32>
    %324 = arith.mulf %319, %323 : vector<8x128xf32>
    %325 = arith.addf %322, %324 : vector<8x128xf32>
    %c1_i32_92 = arith.constant 1 : i32
    %326 = arith.index_cast %c1_i32_92 : i32 to index
    %c0_93 = arith.constant 0 : index
    %c0_94 = arith.constant 0 : index
    %327 = vector.load %arg14[%326, %c0_93, %c0_94] : memref<8x8x384xf32, #tpu.memory_space<vmem>>, vector<1x8x384xf32>
    %328 = vector.shape_cast %327 : vector<1x8x384xf32> to vector<8x384xf32>
    %cst_95 = arith.constant dense<0.000000e+00> : vector<8x384xf32>
    %329 = tpu.matmul %325, %293, %cst_95 {dimension_numbers = #tpu.dot_dimension_numbers<[1], [0], [0], [1], [0, 0, 1, 1], [], []>} : vector<8x128xf32>, vector<128x384xf32>, vector<8x384xf32> -> vector<8x384xf32>
    %330 = vector.extract_strided_slice %328 {offsets = [0, 0], sizes = [8, 128], strides = [1, 1]} : vector<8x384xf32> to vector<8x128xf32>
    %331 = vector.extract_strided_slice %328 {offsets = [0, 128], sizes = [8, 128], strides = [1, 1]} : vector<8x384xf32> to vector<8x128xf32>
    %332 = vector.extract_strided_slice %328 {offsets = [0, 256], sizes = [8, 128], strides = [1, 1]} : vector<8x384xf32> to vector<8x128xf32>
    %333 = vector.extract_strided_slice %329 {offsets = [0, 0], sizes = [8, 128], strides = [1, 1]} : vector<8x384xf32> to vector<8x128xf32>
    %334 = vector.extract_strided_slice %329 {offsets = [0, 128], sizes = [8, 128], strides = [1, 1]} : vector<8x384xf32> to vector<8x128xf32>
    %335 = vector.extract_strided_slice %329 {offsets = [0, 256], sizes = [8, 128], strides = [1, 1]} : vector<8x384xf32> to vector<8x128xf32>
    %336 = vector.broadcast %294 : vector<1x128xf32> to vector<8x128xf32>
    %337 = arith.addf %335, %336 : vector<8x128xf32>
    %338 = arith.addf %330, %333 : vector<8x128xf32>
    %339 = arith.negf %338 : vector<8x128xf32>
    %340 = math.exp %339 : vector<8x128xf32>
    %cst_96 = arith.constant 1.000000e+00 : f32
    %341 = vector.broadcast %cst_96 : f32 to vector<8x128xf32>
    %342 = arith.addf %341, %340 : vector<8x128xf32>
    %343 = arith.divf %341, %342 : vector<8x128xf32>
    %344 = arith.addf %331, %334 : vector<8x128xf32>
    %345 = arith.negf %344 : vector<8x128xf32>
    %346 = math.exp %345 : vector<8x128xf32>
    %cst_97 = arith.constant 1.000000e+00 : f32
    %347 = vector.broadcast %cst_97 : f32 to vector<8x128xf32>
    %348 = arith.addf %347, %346 : vector<8x128xf32>
    %349 = arith.divf %347, %348 : vector<8x128xf32>
    %350 = arith.mulf %343, %337 : vector<8x128xf32>
    %351 = arith.addf %332, %350 : vector<8x128xf32>
    %352 = math.tanh %351 : vector<8x128xf32>
    %353 = arith.subf %325, %352 : vector<8x128xf32>
    %354 = arith.mulf %349, %353 : vector<8x128xf32>
    %355 = arith.addf %352, %354 : vector<8x128xf32>
    %c2_i32_98 = arith.constant 2 : i32
    %356 = arith.index_cast %c2_i32_98 : i32 to index
    %c0_99 = arith.constant 0 : index
    %c0_100 = arith.constant 0 : index
    %357 = vector.load %arg14[%356, %c0_99, %c0_100] : memref<8x8x384xf32, #tpu.memory_space<vmem>>, vector<1x8x384xf32>
    %358 = vector.shape_cast %357 : vector<1x8x384xf32> to vector<8x384xf32>
    %cst_101 = arith.constant dense<0.000000e+00> : vector<8x384xf32>
    %359 = tpu.matmul %355, %293, %cst_101 {dimension_numbers = #tpu.dot_dimension_numbers<[1], [0], [0], [1], [0, 0, 1, 1], [], []>} : vector<8x128xf32>, vector<128x384xf32>, vector<8x384xf32> -> vector<8x384xf32>
    %360 = vector.extract_strided_slice %358 {offsets = [0, 0], sizes = [8, 128], strides = [1, 1]} : vector<8x384xf32> to vector<8x128xf32>
    %361 = vector.extract_strided_slice %358 {offsets = [0, 128], sizes = [8, 128], strides = [1, 1]} : vector<8x384xf32> to vector<8x128xf32>
    %362 = vector.extract_strided_slice %358 {offsets = [0, 256], sizes = [8, 128], strides = [1, 1]} : vector<8x384xf32> to vector<8x128xf32>
    %363 = vector.extract_strided_slice %359 {offsets = [0, 0], sizes = [8, 128], strides = [1, 1]} : vector<8x384xf32> to vector<8x128xf32>
    %364 = vector.extract_strided_slice %359 {offsets = [0, 128], sizes = [8, 128], strides = [1, 1]} : vector<8x384xf32> to vector<8x128xf32>
    %365 = vector.extract_strided_slice %359 {offsets = [0, 256], sizes = [8, 128], strides = [1, 1]} : vector<8x384xf32> to vector<8x128xf32>
    %366 = vector.broadcast %294 : vector<1x128xf32> to vector<8x128xf32>
    %367 = arith.addf %365, %366 : vector<8x128xf32>
    %368 = arith.addf %360, %363 : vector<8x128xf32>
    %369 = arith.negf %368 : vector<8x128xf32>
    %370 = math.exp %369 : vector<8x128xf32>
    %cst_102 = arith.constant 1.000000e+00 : f32
    %371 = vector.broadcast %cst_102 : f32 to vector<8x128xf32>
    %372 = arith.addf %371, %370 : vector<8x128xf32>
    %373 = arith.divf %371, %372 : vector<8x128xf32>
    %374 = arith.addf %361, %364 : vector<8x128xf32>
    %375 = arith.negf %374 : vector<8x128xf32>
    %376 = math.exp %375 : vector<8x128xf32>
    %cst_103 = arith.constant 1.000000e+00 : f32
    %377 = vector.broadcast %cst_103 : f32 to vector<8x128xf32>
    %378 = arith.addf %377, %376 : vector<8x128xf32>
    %379 = arith.divf %377, %378 : vector<8x128xf32>
    %380 = arith.mulf %373, %367 : vector<8x128xf32>
    %381 = arith.addf %362, %380 : vector<8x128xf32>
    %382 = math.tanh %381 : vector<8x128xf32>
    %383 = arith.subf %355, %382 : vector<8x128xf32>
    %384 = arith.mulf %379, %383 : vector<8x128xf32>
    %385 = arith.addf %382, %384 : vector<8x128xf32>
    %c3_i32_104 = arith.constant 3 : i32
    %386 = arith.index_cast %c3_i32_104 : i32 to index
    %c0_105 = arith.constant 0 : index
    %c0_106 = arith.constant 0 : index
    %387 = vector.load %arg14[%386, %c0_105, %c0_106] : memref<8x8x384xf32, #tpu.memory_space<vmem>>, vector<1x8x384xf32>
    %388 = vector.shape_cast %387 : vector<1x8x384xf32> to vector<8x384xf32>
    %cst_107 = arith.constant dense<0.000000e+00> : vector<8x384xf32>
    %389 = tpu.matmul %385, %293, %cst_107 {dimension_numbers = #tpu.dot_dimension_numbers<[1], [0], [0], [1], [0, 0, 1, 1], [], []>} : vector<8x128xf32>, vector<128x384xf32>, vector<8x384xf32> -> vector<8x384xf32>
    %390 = vector.extract_strided_slice %388 {offsets = [0, 0], sizes = [8, 128], strides = [1, 1]} : vector<8x384xf32> to vector<8x128xf32>
    %391 = vector.extract_strided_slice %388 {offsets = [0, 128], sizes = [8, 128], strides = [1, 1]} : vector<8x384xf32> to vector<8x128xf32>
    %392 = vector.extract_strided_slice %388 {offsets = [0, 256], sizes = [8, 128], strides = [1, 1]} : vector<8x384xf32> to vector<8x128xf32>
    %393 = vector.extract_strided_slice %389 {offsets = [0, 0], sizes = [8, 128], strides = [1, 1]} : vector<8x384xf32> to vector<8x128xf32>
    %394 = vector.extract_strided_slice %389 {offsets = [0, 128], sizes = [8, 128], strides = [1, 1]} : vector<8x384xf32> to vector<8x128xf32>
    %395 = vector.extract_strided_slice %389 {offsets = [0, 256], sizes = [8, 128], strides = [1, 1]} : vector<8x384xf32> to vector<8x128xf32>
    %396 = vector.broadcast %294 : vector<1x128xf32> to vector<8x128xf32>
    %397 = arith.addf %395, %396 : vector<8x128xf32>
    %398 = arith.addf %390, %393 : vector<8x128xf32>
    %399 = arith.negf %398 : vector<8x128xf32>
    %400 = math.exp %399 : vector<8x128xf32>
    %cst_108 = arith.constant 1.000000e+00 : f32
    %401 = vector.broadcast %cst_108 : f32 to vector<8x128xf32>
    %402 = arith.addf %401, %400 : vector<8x128xf32>
    %403 = arith.divf %401, %402 : vector<8x128xf32>
    %404 = arith.addf %391, %394 : vector<8x128xf32>
    %405 = arith.negf %404 : vector<8x128xf32>
    %406 = math.exp %405 : vector<8x128xf32>
    %cst_109 = arith.constant 1.000000e+00 : f32
    %407 = vector.broadcast %cst_109 : f32 to vector<8x128xf32>
    %408 = arith.addf %407, %406 : vector<8x128xf32>
    %409 = arith.divf %407, %408 : vector<8x128xf32>
    %410 = arith.mulf %403, %397 : vector<8x128xf32>
    %411 = arith.addf %392, %410 : vector<8x128xf32>
    %412 = math.tanh %411 : vector<8x128xf32>
    %413 = arith.subf %385, %412 : vector<8x128xf32>
    %414 = arith.mulf %409, %413 : vector<8x128xf32>
    %415 = arith.addf %412, %414 : vector<8x128xf32>
    %c4_i32_110 = arith.constant 4 : i32
    %416 = arith.index_cast %c4_i32_110 : i32 to index
    %c0_111 = arith.constant 0 : index
    %c0_112 = arith.constant 0 : index
    %417 = vector.load %arg14[%416, %c0_111, %c0_112] : memref<8x8x384xf32, #tpu.memory_space<vmem>>, vector<1x8x384xf32>
    %418 = vector.shape_cast %417 : vector<1x8x384xf32> to vector<8x384xf32>
    %cst_113 = arith.constant dense<0.000000e+00> : vector<8x384xf32>
    %419 = tpu.matmul %415, %293, %cst_113 {dimension_numbers = #tpu.dot_dimension_numbers<[1], [0], [0], [1], [0, 0, 1, 1], [], []>} : vector<8x128xf32>, vector<128x384xf32>, vector<8x384xf32> -> vector<8x384xf32>
    %420 = vector.extract_strided_slice %418 {offsets = [0, 0], sizes = [8, 128], strides = [1, 1]} : vector<8x384xf32> to vector<8x128xf32>
    %421 = vector.extract_strided_slice %418 {offsets = [0, 128], sizes = [8, 128], strides = [1, 1]} : vector<8x384xf32> to vector<8x128xf32>
    %422 = vector.extract_strided_slice %418 {offsets = [0, 256], sizes = [8, 128], strides = [1, 1]} : vector<8x384xf32> to vector<8x128xf32>
    %423 = vector.extract_strided_slice %419 {offsets = [0, 0], sizes = [8, 128], strides = [1, 1]} : vector<8x384xf32> to vector<8x128xf32>
    %424 = vector.extract_strided_slice %419 {offsets = [0, 128], sizes = [8, 128], strides = [1, 1]} : vector<8x384xf32> to vector<8x128xf32>
    %425 = vector.extract_strided_slice %419 {offsets = [0, 256], sizes = [8, 128], strides = [1, 1]} : vector<8x384xf32> to vector<8x128xf32>
    %426 = vector.broadcast %294 : vector<1x128xf32> to vector<8x128xf32>
    %427 = arith.addf %425, %426 : vector<8x128xf32>
    %428 = arith.addf %420, %423 : vector<8x128xf32>
    %429 = arith.negf %428 : vector<8x128xf32>
    %430 = math.exp %429 : vector<8x128xf32>
    %cst_114 = arith.constant 1.000000e+00 : f32
    %431 = vector.broadcast %cst_114 : f32 to vector<8x128xf32>
    %432 = arith.addf %431, %430 : vector<8x128xf32>
    %433 = arith.divf %431, %432 : vector<8x128xf32>
    %434 = arith.addf %421, %424 : vector<8x128xf32>
    %435 = arith.negf %434 : vector<8x128xf32>
    %436 = math.exp %435 : vector<8x128xf32>
    %cst_115 = arith.constant 1.000000e+00 : f32
    %437 = vector.broadcast %cst_115 : f32 to vector<8x128xf32>
    %438 = arith.addf %437, %436 : vector<8x128xf32>
    %439 = arith.divf %437, %438 : vector<8x128xf32>
    %440 = arith.mulf %433, %427 : vector<8x128xf32>
    %441 = arith.addf %422, %440 : vector<8x128xf32>
    %442 = math.tanh %441 : vector<8x128xf32>
    %443 = arith.subf %415, %442 : vector<8x128xf32>
    %444 = arith.mulf %439, %443 : vector<8x128xf32>
    %445 = arith.addf %442, %444 : vector<8x128xf32>
    %c5_i32_116 = arith.constant 5 : i32
    %446 = arith.index_cast %c5_i32_116 : i32 to index
    %c0_117 = arith.constant 0 : index
    %c0_118 = arith.constant 0 : index
    %447 = vector.load %arg14[%446, %c0_117, %c0_118] : memref<8x8x384xf32, #tpu.memory_space<vmem>>, vector<1x8x384xf32>
    %448 = vector.shape_cast %447 : vector<1x8x384xf32> to vector<8x384xf32>
    %cst_119 = arith.constant dense<0.000000e+00> : vector<8x384xf32>
    %449 = tpu.matmul %445, %293, %cst_119 {dimension_numbers = #tpu.dot_dimension_numbers<[1], [0], [0], [1], [0, 0, 1, 1], [], []>} : vector<8x128xf32>, vector<128x384xf32>, vector<8x384xf32> -> vector<8x384xf32>
    %450 = vector.extract_strided_slice %448 {offsets = [0, 0], sizes = [8, 128], strides = [1, 1]} : vector<8x384xf32> to vector<8x128xf32>
    %451 = vector.extract_strided_slice %448 {offsets = [0, 128], sizes = [8, 128], strides = [1, 1]} : vector<8x384xf32> to vector<8x128xf32>
    %452 = vector.extract_strided_slice %448 {offsets = [0, 256], sizes = [8, 128], strides = [1, 1]} : vector<8x384xf32> to vector<8x128xf32>
    %453 = vector.extract_strided_slice %449 {offsets = [0, 0], sizes = [8, 128], strides = [1, 1]} : vector<8x384xf32> to vector<8x128xf32>
    %454 = vector.extract_strided_slice %449 {offsets = [0, 128], sizes = [8, 128], strides = [1, 1]} : vector<8x384xf32> to vector<8x128xf32>
    %455 = vector.extract_strided_slice %449 {offsets = [0, 256], sizes = [8, 128], strides = [1, 1]} : vector<8x384xf32> to vector<8x128xf32>
    %456 = vector.broadcast %294 : vector<1x128xf32> to vector<8x128xf32>
    %457 = arith.addf %455, %456 : vector<8x128xf32>
    %458 = arith.addf %450, %453 : vector<8x128xf32>
    %459 = arith.negf %458 : vector<8x128xf32>
    %460 = math.exp %459 : vector<8x128xf32>
    %cst_120 = arith.constant 1.000000e+00 : f32
    %461 = vector.broadcast %cst_120 : f32 to vector<8x128xf32>
    %462 = arith.addf %461, %460 : vector<8x128xf32>
    %463 = arith.divf %461, %462 : vector<8x128xf32>
    %464 = arith.addf %451, %454 : vector<8x128xf32>
    %465 = arith.negf %464 : vector<8x128xf32>
    %466 = math.exp %465 : vector<8x128xf32>
    %cst_121 = arith.constant 1.000000e+00 : f32
    %467 = vector.broadcast %cst_121 : f32 to vector<8x128xf32>
    %468 = arith.addf %467, %466 : vector<8x128xf32>
    %469 = arith.divf %467, %468 : vector<8x128xf32>
    %470 = arith.mulf %463, %457 : vector<8x128xf32>
    %471 = arith.addf %452, %470 : vector<8x128xf32>
    %472 = math.tanh %471 : vector<8x128xf32>
    %473 = arith.subf %445, %472 : vector<8x128xf32>
    %474 = arith.mulf %469, %473 : vector<8x128xf32>
    %475 = arith.addf %472, %474 : vector<8x128xf32>
    %c6_i32_122 = arith.constant 6 : i32
    %476 = arith.index_cast %c6_i32_122 : i32 to index
    %c0_123 = arith.constant 0 : index
    %c0_124 = arith.constant 0 : index
    %477 = vector.load %arg14[%476, %c0_123, %c0_124] : memref<8x8x384xf32, #tpu.memory_space<vmem>>, vector<1x8x384xf32>
    %478 = vector.shape_cast %477 : vector<1x8x384xf32> to vector<8x384xf32>
    %cst_125 = arith.constant dense<0.000000e+00> : vector<8x384xf32>
    %479 = tpu.matmul %475, %293, %cst_125 {dimension_numbers = #tpu.dot_dimension_numbers<[1], [0], [0], [1], [0, 0, 1, 1], [], []>} : vector<8x128xf32>, vector<128x384xf32>, vector<8x384xf32> -> vector<8x384xf32>
    %480 = vector.extract_strided_slice %478 {offsets = [0, 0], sizes = [8, 128], strides = [1, 1]} : vector<8x384xf32> to vector<8x128xf32>
    %481 = vector.extract_strided_slice %478 {offsets = [0, 128], sizes = [8, 128], strides = [1, 1]} : vector<8x384xf32> to vector<8x128xf32>
    %482 = vector.extract_strided_slice %478 {offsets = [0, 256], sizes = [8, 128], strides = [1, 1]} : vector<8x384xf32> to vector<8x128xf32>
    %483 = vector.extract_strided_slice %479 {offsets = [0, 0], sizes = [8, 128], strides = [1, 1]} : vector<8x384xf32> to vector<8x128xf32>
    %484 = vector.extract_strided_slice %479 {offsets = [0, 128], sizes = [8, 128], strides = [1, 1]} : vector<8x384xf32> to vector<8x128xf32>
    %485 = vector.extract_strided_slice %479 {offsets = [0, 256], sizes = [8, 128], strides = [1, 1]} : vector<8x384xf32> to vector<8x128xf32>
    %486 = vector.broadcast %294 : vector<1x128xf32> to vector<8x128xf32>
    %487 = arith.addf %485, %486 : vector<8x128xf32>
    %488 = arith.addf %480, %483 : vector<8x128xf32>
    %489 = arith.negf %488 : vector<8x128xf32>
    %490 = math.exp %489 : vector<8x128xf32>
    %cst_126 = arith.constant 1.000000e+00 : f32
    %491 = vector.broadcast %cst_126 : f32 to vector<8x128xf32>
    %492 = arith.addf %491, %490 : vector<8x128xf32>
    %493 = arith.divf %491, %492 : vector<8x128xf32>
    %494 = arith.addf %481, %484 : vector<8x128xf32>
    %495 = arith.negf %494 : vector<8x128xf32>
    %496 = math.exp %495 : vector<8x128xf32>
    %cst_127 = arith.constant 1.000000e+00 : f32
    %497 = vector.broadcast %cst_127 : f32 to vector<8x128xf32>
    %498 = arith.addf %497, %496 : vector<8x128xf32>
    %499 = arith.divf %497, %498 : vector<8x128xf32>
    %500 = arith.mulf %493, %487 : vector<8x128xf32>
    %501 = arith.addf %482, %500 : vector<8x128xf32>
    %502 = math.tanh %501 : vector<8x128xf32>
    %503 = arith.subf %475, %502 : vector<8x128xf32>
    %504 = arith.mulf %499, %503 : vector<8x128xf32>
    %505 = arith.addf %502, %504 : vector<8x128xf32>
    %c7_i32_128 = arith.constant 7 : i32
    %506 = arith.index_cast %c7_i32_128 : i32 to index
    %c0_129 = arith.constant 0 : index
    %c0_130 = arith.constant 0 : index
    %507 = vector.load %arg14[%506, %c0_129, %c0_130] : memref<8x8x384xf32, #tpu.memory_space<vmem>>, vector<1x8x384xf32>
    %508 = vector.shape_cast %507 : vector<1x8x384xf32> to vector<8x384xf32>
    %cst_131 = arith.constant dense<0.000000e+00> : vector<8x384xf32>
    %509 = tpu.matmul %505, %293, %cst_131 {dimension_numbers = #tpu.dot_dimension_numbers<[1], [0], [0], [1], [0, 0, 1, 1], [], []>} : vector<8x128xf32>, vector<128x384xf32>, vector<8x384xf32> -> vector<8x384xf32>
    %510 = vector.extract_strided_slice %508 {offsets = [0, 0], sizes = [8, 128], strides = [1, 1]} : vector<8x384xf32> to vector<8x128xf32>
    %511 = vector.extract_strided_slice %508 {offsets = [0, 128], sizes = [8, 128], strides = [1, 1]} : vector<8x384xf32> to vector<8x128xf32>
    %512 = vector.extract_strided_slice %508 {offsets = [0, 256], sizes = [8, 128], strides = [1, 1]} : vector<8x384xf32> to vector<8x128xf32>
    %513 = vector.extract_strided_slice %509 {offsets = [0, 0], sizes = [8, 128], strides = [1, 1]} : vector<8x384xf32> to vector<8x128xf32>
    %514 = vector.extract_strided_slice %509 {offsets = [0, 128], sizes = [8, 128], strides = [1, 1]} : vector<8x384xf32> to vector<8x128xf32>
    %515 = vector.extract_strided_slice %509 {offsets = [0, 256], sizes = [8, 128], strides = [1, 1]} : vector<8x384xf32> to vector<8x128xf32>
    %516 = vector.broadcast %294 : vector<1x128xf32> to vector<8x128xf32>
    %517 = arith.addf %515, %516 : vector<8x128xf32>
    %518 = arith.addf %510, %513 : vector<8x128xf32>
    %519 = arith.negf %518 : vector<8x128xf32>
    %520 = math.exp %519 : vector<8x128xf32>
    %cst_132 = arith.constant 1.000000e+00 : f32
    %521 = vector.broadcast %cst_132 : f32 to vector<8x128xf32>
    %522 = arith.addf %521, %520 : vector<8x128xf32>
    %523 = arith.divf %521, %522 : vector<8x128xf32>
    %524 = arith.addf %511, %514 : vector<8x128xf32>
    %525 = arith.negf %524 : vector<8x128xf32>
    %526 = math.exp %525 : vector<8x128xf32>
    %cst_133 = arith.constant 1.000000e+00 : f32
    %527 = vector.broadcast %cst_133 : f32 to vector<8x128xf32>
    %528 = arith.addf %527, %526 : vector<8x128xf32>
    %529 = arith.divf %527, %528 : vector<8x128xf32>
    %530 = arith.mulf %523, %517 : vector<8x128xf32>
    %531 = arith.addf %512, %530 : vector<8x128xf32>
    %532 = math.tanh %531 : vector<8x128xf32>
    %533 = arith.subf %505, %532 : vector<8x128xf32>
    %534 = arith.mulf %529, %533 : vector<8x128xf32>
    %535 = arith.addf %532, %534 : vector<8x128xf32>
    %c8_i32_134 = arith.constant 8 : i32
    %cst_135 = arith.constant 0.000000e+00 : f32
    %536 = vector.broadcast %cst_135 : f32 to vector<8x128xf32>
    %537 = arith.maximumf %535, %536 : vector<8x128xf32>
    %c0_136 = arith.constant 0 : index
    %c0_137 = arith.constant 0 : index
    %538 = vector.load %arg9[%c0_136, %c0_137] : memref<128x128xf32, #tpu.memory_space<vmem>>, vector<128x128xf32>
    %cst_138 = arith.constant dense<0.000000e+00> : vector<8x128xf32>
    %539 = tpu.matmul %537, %538, %cst_138 {dimension_numbers = #tpu.dot_dimension_numbers<[1], [0], [0], [1], [0, 0, 1, 1], [], []>} : vector<8x128xf32>, vector<128x128xf32>, vector<8x128xf32> -> vector<8x128xf32>
    %c0_139 = arith.constant 0 : index
    %c0_140 = arith.constant 0 : index
    %540 = vector.load %arg10[%c0_139, %c0_140] : memref<1x128xf32, #tpu.memory_space<vmem>>, vector<1x128xf32>
    %541 = vector.broadcast %540 : vector<1x128xf32> to vector<8x128xf32>
    %542 = arith.addf %539, %541 : vector<8x128xf32>
    %cst_141 = arith.constant 0.000000e+00 : f32
    %543 = vector.broadcast %cst_141 : f32 to vector<8x128xf32>
    %544 = arith.maximumf %542, %543 : vector<8x128xf32>
    %c0_142 = arith.constant 0 : index
    %c0_143 = arith.constant 0 : index
    %545 = vector.load %arg11[%c0_142, %c0_143] : memref<128x128xf32, #tpu.memory_space<vmem>>, vector<128x128xf32>
    %cst_144 = arith.constant dense<0.000000e+00> : vector<8x128xf32>
    %546 = tpu.matmul %544, %545, %cst_144 {dimension_numbers = #tpu.dot_dimension_numbers<[1], [0], [0], [1], [0, 0, 1, 1], [], []>} : vector<8x128xf32>, vector<128x128xf32>, vector<8x128xf32> -> vector<8x128xf32>
    %c0_145 = arith.constant 0 : index
    %c0_146 = arith.constant 0 : index
    %547 = vector.load %arg12[%c0_145, %c0_146] : memref<1x128xf32, #tpu.memory_space<vmem>>, vector<1x128xf32>
    %548 = vector.broadcast %547 : vector<1x128xf32> to vector<8x128xf32>
    %549 = arith.addf %546, %548 : vector<8x128xf32>
    %c0_147 = arith.constant 0 : index
    %c0_148 = arith.constant 0 : index
    %550 = vector.load %arg13[%c0_147, %c0_148] : memref<8x128xf32, #tpu.memory_space<vmem>>, vector<8x128xf32>
    tpu.vector_store %arg13[%c0_147, %c0_148], %549 {strides = array<i32>} : memref<8x128xf32, #tpu.memory_space<vmem>>, vector<8x128xf32>,
    return
  }
}

</mosaic_0001>

<bundles_post_ra>
// kernel: gru_model_forward.1
= control target key start
LH: loop header
LB: loop body
LE: loop exit
PB: predicated region body
PF: predicated region fallthrough
CT: control target
= control target key end

     0   :  { %v5948_v3 = vmov 0.0   ;;  %vm75_vm0 = vcmask 130048   ;;  %v5949_v48 = vmov 0.0|0.0   ;;  %vm5950_vm1 = vmmov 0   ;;  %s7542_s1 = inlined_call_operand.vmem [shape: f32[16,384], index: 1, kind: input, shape index: {}]   ;;  %s7543_s0 = inlined_call_operand.vmem [shape: f32[8,8,16], index: 0, kind: input, shape index: {}]   ;;  %s7544_s2 = inlined_call_operand.vmem [shape: f32[128,384], index: 2, kind: input, shape index: {}]   ;;  %s7545_s3 = inlined_call_operand.vmem [shape: f32[1,384], index: 3, kind: input, shape index: {}]   ;;  %s7546_s4 = inlined_call_operand.vmem [shape: f32[1,128], index: 4, kind: input, shape index: {}]   ;;  %s7547_s5 = inlined_call_operand.vmem [shape: f32[128,384], index: 5, kind: input, shape index: {}]   ;;  %s7548_s6 = inlined_call_operand.vmem [shape: f32[128,384], index: 6, kind: input, shape index: {}]   ;;  %s7549_s7 = inlined_call_operand.vmem [shape: f32[1,384], index: 7, kind: input, shape index: {}]   ;;  %s7550_s8 = inlined_call_operand.vmem [shape: f32[1,128], index: 8, kind: input, shape index: {}]   ;;  %s7551_s9 = inlined_call_operand.vmem [shape: f32[128,128], index: 9, kind: input, shape index: {}]   ;;  %s7552_s11 = inlined_call_operand.vmem [shape: f32[128,128], index: 11, kind: input, shape index: {}]   ;;  %s7553_s10 = inlined_call_operand.vmem [shape: f32[1,128], index: 10, kind: input, shape index: {}]   ;;  %s7554_s12 = inlined_call_operand.vmem [shape: f32[1,128], index: 12, kind: input, shape index: {}]   ;;  %s7555_s13 = inlined_call_operand.vmem [shape: f32[8,128], index: 13, kind: output, shape index: {}]  }
   0x1   :  { %v53_v0 = vld [vmem:[%s7542_s1 + $0x8] sm:$0xff]  ;;  %v56_v1 = vld [vmem:[%s7542_s1 + $0x20] sm:$0xff]  ;;  %164 = vmatprep.mubr.f32.mxu0 %v5948_v3  ;;  %v55_v5 = vld [vmem:[%s7542_s1 + $0x18] sm:$0xff] }
   0x2   :  { %v52_v2 = vld [vmem:[%s7542_s1] sm:$0xff]  ;;  %v4704_v4 = vpack.c.bf16 %v56_v1, %v53_v0  ;;  %v343_v7 = vld [vmem:[%s7544_s2 + $0x8] sm:$0xff]  ;;  %v345_v11 = vld [vmem:[%s7544_s2 + $0x18] sm:$0xff] }
   0x3   :  { %v44_v6 = vld [vmem:[%s7543_s0] sm:$0xff]  ;;  %v4706_v8 = vpack.c.bf16 %v55_v5, %v52_v2  ;;  %v349_v13 = vld [vmem:[%s7544_s2 + $0x38] sm:$0xff]  ;;  %v352_v14 = vld [vmem:[%s7544_s2 + $0x50] sm:$0xff] }
   0x4   :  { %v346_v9 = vld [vmem:[%s7544_s2 + $0x20] sm:$0xff]  ;;  %4018 = vmatprep.mubr.msk.f32.mxu1 %vm75_vm0, %v44_v6  ;;  %4705 = vmatprep.subr.bf16.mxu0 %v4704_v4  ;;  %v6061_v16 = vpack.c.bf16 %v352_v14, %v349_v13  ;;  %v348_v17 = vld [vmem:[%s7544_s2 + $0x30] sm:$0xff]  ;;  %v351_v18 = vld [vmem:[%s7544_s2 + $0x48] sm:$0xff] }
   0x5   :  { %v342_v10 = vld [vmem:[%s7544_s2] sm:$0xff]  ;;  %v6050_v12 = vpack.c.bf16 %v346_v9, %v343_v7  ;;  %4707 = vmatpush1.bf16.msra.mxu0 %v4706_v8  ;;  %v355_v19 = vld [vmem:[%s7544_s2 + $0x68] sm:$0xff]  ;;  %v6081_v22 = vpack.c.bf16 %v351_v18, %v348_v17  ;;  %v357_v25 = vld [vmem:[%s7544_s2 + $0x78] sm:$0xff] }
   0x6   :  { %v6058_v15 = vpack.c.bf16 %v345_v11, %v342_v10  ;;  %v358_v20 = vld [vmem:[%s7544_s2 + $0x80] sm:$0xff]  ;;  %v45_v21 = vld [vmem:[%s7543_s0 + $0x8] sm:$0xff]  ;;  %v361_v26 = vld [vmem:[%s7544_s2 + $0x98] sm:$0xff] }
   0x7   :  { %4713 = vmatprep.subr.bf16.mxu0 %v6050_v12  ;;  %v6084_v23 = vpack.c.bf16 %v358_v20, %v355_v19  ;;  %v354_v24 = vld [vmem:[%s7544_s2 + $0x60] sm:$0xff]  ;;  %v364_v27 = vld [vmem:[%s7544_s2 + $0xb0] sm:$0xff]  ;;  %v57_v29 = vld [vmem:[%s7542_s1 + $0x28] sm:$0xff] }
   0x8   :  { %3622 = vmatmul.mubr.msk.f32.vlgmr.msra.gmra.mrb[0].mxu0 %vm75_vm0, %v44_v6  ;;  %v54_v28 = vld [vmem:[%s7542_s1 + $0x10] sm:$0xff]  ;;  %v6110_v31 = vpack.c.bf16 %v357_v25, %v354_v24  ;;  %v6113_v33 = vpack.c.bf16 %v364_v27, %v361_v26  ;;  %v363_v35 = vld [vmem:[%s7544_s2 + $0xa8] sm:$0xff]  ;;  %v370_v38 = vld [vmem:[%s7544_s2 + $0xe0] sm:$0xff] }
   0x9   :  { %4715 = vmatpush1.bf16.msra.mxu0 %v6058_v15  ;;  %170 = vmatprep.mubr.f32.mxu0 %v5948_v3  ;;  %v46_v30 = vld [vmem:[%s7543_s0 + $0x10] sm:$0xff]  ;;  %v4708_v32 = vpack.c.bf16 %v57_v29, %v54_v28  ;;  %v367_v37 = vld [vmem:[%s7544_s2 + $0xc8] sm:$0xff]  ;;  %v47_v41 = vld [vmem:[%s7543_s0 + $0x18] sm:$0xff] }
   0xa   :  { %4717 = vmatprep.subr.bf16.mxu0 %v6061_v16  ;;  %v360_v34 = vld [vmem:[%s7544_s2 + $0x90] sm:$0xff]  ;;  %v347_v39 = vld [vmem:[%s7544_s2 + $0x28] sm:$0xff]  ;;  %v350_v43 = vld [vmem:[%s7544_s2 + $0x40] sm:$0xff]  ;;  %v6150_v45 = vpack.c.bf16 %v370_v38, %v367_v37 }
   0xb   :  { %v344_v36 = vld [vmem:[%s7544_s2 + $0x10] sm:$0xff]  ;;  %4709 = vmatprep.subr.bf16.mxu1 %v4708_v32  ;;  %v6141_v42 = vpack.c.bf16 %v363_v35, %v360_v34  ;;  %v353_v44 = vld [vmem:[%s7544_s2 + $0x58] sm:$0xff]  ;;  %v366_v46 = vld [vmem:[%s7544_s2 + $0xc0] sm:$0xff]  ;;  %v60_v35 = vlaneseq }
   0xc   :  { %3623 = vmatmul.mubr.msk.f32.gmra.mrb[2].mxu0 %vm75_vm0, %v45_v21  ;;  %4711 = vmatpush3.bf16.msra.mxu1 %v4708_v32  ;;  %v6134_v40 = vpack.c.bf16 %v347_v39, %v344_v36  ;;  %v369_v47 = vld [vmem:[%s7544_s2 + $0xd8] sm:$0xff]  ;;  %v376_v50 = vld [vmem:[%s7544_s2 + $0x110] sm:$0xff]  ;;  %v6168_v51 = vpack.c.bf16 %v353_v44, %v350_v43  ;;  %v48_v52 = vld [vmem:[%s7543_s0 + $0x20] sm:$0xff] }
   0xd   :  { %4719 = vmatpush1.bf16.msra.mxu0 %v6081_v22  ;;  %176 = vmatprep.mubr.f32.mxu0 %v5948_v3  ;;  %v373_v49 = vld [vmem:[%s7544_s2 + $0xf8] sm:$0xff]  ;;  %v6175_v53 = vpack.c.bf16 %v369_v47, %v366_v46  ;;  %v356_v54 = vld [vmem:[%s7544_s2 + $0x70] sm:$0xff]  ;;  %v359_v55 = vld [vmem:[%s7544_s2 + $0x88] sm:$0xff]  ;;  %v6353_v36 = vshrl.u32 %v60_v35, 7 }
   0xe   :  { %4721 = vmatprep.subr.bf16.mxu0 %v6084_v23  ;;  %4744 = vmatprep.subr.bf16.mxu1 %v5949_v48  ;;  %v6184_v56 = vpack.c.bf16 %v376_v50, %v373_v49  ;;  %v372_v57 = vld [vmem:[%s7544_s2 + $0xf0] sm:$0xff]  ;;  %v375_v58 = vld [vmem:[%s7544_s2 + $0x108] sm:$0xff]  ;;  %v382_v60 = vld [vmem:[%s7544_s2 + $0x140] sm:$0xff]  ;;  %v6202_v61 = vpack.c.bf16 %v359_v55, %v356_v54 }
   0xf   :  { %4019 = vmatmul.mubr.msk.f32.vlgmr.msra.gmra.mrb[0].mxu1 %vm75_vm0, %v45_v21  ;;  %v379_v59 = vld [vmem:[%s7544_s2 + $0x128] sm:$0xff]  ;;  %v6209_v63 = vpack.c.bf16 %v375_v58, %v372_v57  ;;  %v362_v0 = vld [vmem:[%s7544_s2 + $0xa0] sm:$0xff]  ;;  %v365_v1 = vld [vmem:[%s7544_s2 + $0xb8] sm:$0xff]  ;;  %v70_v37 = vsub.s32 2, %v6353_v36 }
  0x10   :  { %3624 = vmatmul.mubr.msk.f32.gmra.mrb[4].mxu0 %vm75_vm0, %v46_v30  ;;  %4746 = vmatpush3.bf16.msra.mxu1 %v6134_v40  ;;  %v49_v62 = vld [vmem:[%s7543_s0 + $0x28] sm:$0xff]  ;;  %v6218_v2 = vpack.c.bf16 %v382_v60, %v379_v59  ;;  %v378_v4 = vld [vmem:[%s7544_s2 + $0x120] sm:$0xff]  ;;  %v381_v5 = vld [vmem:[%s7544_s2 + $0x138] sm:$0xff]  ;;  %v6236_v8 = vpack.c.bf16 %v365_v1, %v362_v0 }
  0x11   :  { %4723 = vmatpush1.bf16.msra.mxu0 %v6110_v31  ;;  %182 = vmatprep.mubr.f32.mxu0 %v5948_v3  ;;  %v385_v6 = vld [vmem:[%s7544_s2 + $0x158] sm:$0xff]  ;;  %v388_v7 = vld [vmem:[%s7544_s2 + $0x170] sm:$0xff]  ;;  %v6243_v10 = vpack.c.bf16 %v381_v5, %v378_v4  ;;  %v371_v13 = vld [vmem:[%s7544_s2 + $0xe8] sm:$0xff]  ;;  %v66_v5 = vsub.s32 1, %v6353_v36 }
  0x12   :  { %4725 = vmatprep.subr.bf16.mxu0 %v6113_v33  ;;  %4747 = vmatprep.subr.bf16.mxu1 %v5949_v48  ;;  %v50_v9 = vld [vmem:[%s7543_s0 + $0x30] sm:$0xff]  ;;  %v6252_v14 = vpack.c.bf16 %v388_v7, %v385_v6  ;;  %v387_v18 = vld [vmem:[%s7544_s2 + $0x168] sm:$0xff]  ;;  %v51_v20 = vld [vmem:[%s7543_s0 + $0x38] sm:$0xff] }
  0x13   :  { %4021 = vmatprep.mubr.msk.f32.mxu1 %vm75_vm0, %v46_v30  ;;  %v368_v11 = vld [vmem:[%s7544_s2 + $0xd0] sm:$0xff]  ;;  %v374_v24 = vld [vmem:[%s7544_s2 + $0x100] sm:$0xff]  ;;  %v377_v25 = vld [vmem:[%s7544_s2 + $0x118] sm:$0xff] }
  0x14   :  { %3625 = vmatmul.mubr.msk.f32.gmra.mrb[6].mxu0 %vm75_vm0, %v47_v41  ;;  %4749 = vmatpush3.bf16.msra.mxu1 %v6168_v51  ;;  %v384_v17 = vld [vmem:[%s7544_s2 + $0x150] sm:$0xff]  ;;  %v6264_v19 = vpack.c.bf16 %v371_v13, %v368_v11  ;;  %v6284_v26 = vpack.c.bf16 %v377_v25, %v374_v24  ;;  %v383_v28 = vld [vmem:[%s7544_s2 + $0x148] sm:$0xff]  ;;  %v386_v30 = vld [vmem:[%s7544_s2 + $0x160] sm:$0xff] }
  0x15   :  { %4727 = vmatpush1.bf16.msra.mxu0 %v6141_v42  ;;  %188 = vmatprep.mubr.f32.mxu0 %v5948_v3  ;;  %v6271_v21 = vpack.c.bf16 %v387_v18, %v384_v17  ;;  %v380_v27 = vld [vmem:[%s7544_s2 + $0x130] sm:$0xff]  ;;  %v389_v32 = vld [vmem:[%s7544_s2 + $0x178] sm:$0xff]  ;;  %v58_v38 = vld [vmem:[%s7545_s3] sm:$0x7] }
  0x16   :  { %4729 = vmatprep.subr.bf16.mxu0 %v6150_v45  ;;  %4750 = vmatprep.subr.bf16.mxu1 %v5949_v48  ;;  %v6300_v29 = vpack.c.bf16 %v383_v28, %v380_v27  ;;  %v6315_v34 = vpack.c.bf16 %v389_v32, %v386_v30  ;;  %v71_v39 = vrot.slane %v58_v38, %v70_v37  ;;  %v6390_v27 = vld [vmem:[%s7546_s4] ss:$0 sm:$0xff] }
  0x17   :  { %4022 = vmatmul.mubr.msk.f32.gmra.mrb[2].mxu1 %vm75_vm0, %v47_v41  ;;  %v6384_v11 = vrot.slane %v58_v38, %v66_v5 }
  0x18   :  { %3626 = vmatmul.mubr.msk.f32.gmra.mrb[8].mxu0 %vm75_vm0, %v48_v52  ;;  %4752 = vmatpush3.bf16.msra.mxu1 %v6202_v61 }
  0x19   :  { %4731 = vmatpush1.bf16.msra.mxu0 %v6175_v53  ;;  %194 = vmatprep.mubr.f32.mxu0 %v5948_v3 }
  0x1a   :  { %4733 = vmatprep.subr.bf16.mxu0 %v6184_v56  ;;  %4753 = vmatprep.subr.bf16.mxu1 %v5949_v48 }
  0x1b   :  { %4024 = vmatprep.mubr.msk.f32.mxu1 %vm75_vm0, %v48_v52  ;;  %v62_v52 = vsub.s32 0, %v6353_v36 }
  0x1c   :  { %3627 = vmatmul.mubr.msk.f32.gmra.mrb[10].mxu0 %vm75_vm0, %v49_v62  ;;  %4755 = vmatpush3.bf16.msra.mxu1 %v6236_v8 }
  0x1d   :  { %4735 = vmatpush1.bf16.msra.mxu0 %v6209_v63  ;;  %200 = vmatprep.mubr.f32.mxu0 %v5948_v3  ;;  %v6372_v58 = vrot.slane %v58_v38, %v62_v52 }
  0x1e   :  { %4737 = vmatprep.subr.bf16.mxu0 %v6218_v2  ;;  %4756 = vmatprep.subr.bf16.mxu1 %v5949_v48 }
  0x1f   :  { %4025 = vmatmul.mubr.msk.f32.gmra.mrb[4].mxu1 %vm75_vm0, %v49_v62 }
  0x20   :  { %3628 = vmatmul.mubr.msk.f32.gmra.mrb[12].mxu0 %vm75_vm0, %v50_v9  ;;  %4758 = vmatpush3.bf16.msra.mxu1 %v6264_v19 }
  0x21   :  { %4739 = vmatpush1.bf16.msra.mxu0 %v6243_v10  ;;  %206 = vmatprep.mubr.f32.mxu0 %v5948_v3 }
  0x22   :  { %4741 = vmatprep.subr.bf16.mxu0 %v6252_v14  ;;  %4759 = vmatprep.subr.bf16.mxu1 %v5949_v48 }
  0x23   :  { %4027 = vmatprep.mubr.msk.f32.mxu1 %vm75_vm0, %v50_v9 }
  0x24   :  { %3629 = vmatmul.mubr.msk.f32.gmra.mrb[14].mxu0 %vm75_vm0, %v51_v20  ;;  %4028 = vmatmul.mubr.msk.f32.gmra.mrb[6].mxu1 %vm75_vm0, %v51_v20 }
  0x25   :  { %4743 = vmatpush1.bf16.msra.mxu0 %v6271_v21  ;;  %458 = vmatprep.mubr.f32.mxu0 %v5948_v3 }
  0x26   :  { %4769 = vmatprep.subr.bf16.mxu0 %v6050_v12  ;;  %4761 = vmatpush3.bf16.msra.mxu1 %v6284_v26 }
  0x27   :  { %4762 = vmatprep.subr.bf16.mxu1 %v5949_v48  ;;  %4062 = vmatprep.mubr.msk.f32.mxu1 %vm5950_vm1, %v5948_v3 }
  0x28   :  { %459 = vmatmul.mubr.f32.vlgmr.msra.gmra.mrb[0].mxu0 %v5948_v3 }
  0x29   :  { %4771 = vmatpush1.bf16.msra.mxu0 %v6058_v15  ;;  %631 = vmatprep.mubr.f32.mxu0 %v5948_v3 }
  0x2a   :  { %4773 = vmatprep.subr.bf16.mxu0 %v6061_v16  ;;  %4764 = vmatpush3.bf16.msra.mxu1 %v6300_v29 }
  0x2b   :  { %4765 = vmatprep.subr.bf16.mxu1 %v5949_v48 }
  0x2d   :  { %4775 = vmatpush1.bf16.msra.mxu0 %v6081_v22 }
  0x2e   :  { %4777 = vmatprep.subr.bf16.mxu0 %v6084_v23  ;;  %4767 = vmatpush3.bf16.msra.mxu1 %v6315_v34 }
  0x2f   :  { %4800 = vmatprep.subr.bf16.mxu1 %v5949_v48 }
  0x31   :  { %4779 = vmatpush1.bf16.msra.mxu0 %v6110_v31  ;;  %4063 = vmatmul.mubr.f32.vlgmr.msra.gmra.mrb[8].mxu1 %v5948_v3 }
  0x32   :  { %4781 = vmatprep.subr.bf16.mxu0 %v6113_v33  ;;  %4802 = vmatpush3.bf16.msra.mxu1 %v6134_v40 }
  0x33   :  { %4097 = vmatprep.mubr.msk.f32.mxu1 %vm5950_vm1, %v5948_v3  ;;  %4803 = vmatprep.subr.bf16.mxu1 %v5949_v48 }
  0x35   :  { %4783 = vmatpush1.bf16.msra.mxu0 %v6141_v42 }
  0x36   :  { %4785 = vmatprep.subr.bf16.mxu0 %v6150_v45  ;;  %4805 = vmatpush3.bf16.msra.mxu1 %v6168_v51 }
  0x37   :  { %4806 = vmatprep.subr.bf16.mxu1 %v5949_v48 }
  0x39   :  { %4787 = vmatpush1.bf16.msra.mxu0 %v6175_v53 }
  0x3a   :  { %4789 = vmatprep.subr.bf16.mxu0 %v6184_v56  ;;  %4808 = vmatpush3.bf16.msra.mxu1 %v6202_v61 }
  0x3b   :  { %4809 = vmatprep.subr.bf16.mxu1 %v5949_v48 }
  0x3d   :  { %4791 = vmatpush1.bf16.msra.mxu0 %v6209_v63 }
  0x3e   :  { %4793 = vmatprep.subr.bf16.mxu0 %v6218_v2  ;;  %4811 = vmatpush3.bf16.msra.mxu1 %v6236_v8 }
  0x3f   :  { %4812 = vmatprep.subr.bf16.mxu1 %v5949_v48 }
  0x41   :  { %4795 = vmatpush1.bf16.msra.mxu0 %v6243_v10 }
  0x42   :  { %4797 = vmatprep.subr.bf16.mxu0 %v6252_v14  ;;  %4814 = vmatpush3.bf16.msra.mxu1 %v6264_v19 }
  0x43   :  { %4815 = vmatprep.subr.bf16.mxu1 %v5949_v48 }
  0x45   :  { %4799 = vmatpush1.bf16.msra.mxu0 %v6271_v21 }
  0x46   :  { %4825 = vmatprep.subr.bf16.mxu0 %v6050_v12  ;;  %4817 = vmatpush3.bf16.msra.mxu1 %v6284_v26 }
  0x47   :  { %4818 = vmatprep.subr.bf16.mxu1 %v5949_v48 }
  0x4a   :  { %4820 = vmatpush3.bf16.msra.mxu1 %v6300_v29 }
  0x4b   :  { %4821 = vmatprep.subr.bf16.mxu1 %v5949_v48 }
  0x4e   :  { %4823 = vmatpush3.bf16.msra.mxu1 %v6315_v34 }
  0x4f   :  { %4856 = vmatprep.subr.bf16.mxu1 %v5949_v48 }
  0xe2   :  { %v4020_v41 = vpop.f32.mrb[0].mxu1 }
  0xe3   :  { %v6361_v43 = vadd.f32 %v4020_v41, %v71_v39  ;;  %v279_v44 = vpop.f32.mrb[1].mxu1 }
  0xe4   :  { %v280_v35 = vadd.f32 %v279_v44, %v71_v39 }
  0xea   :  { %v4023_v46 = vpop.f32.mrb[2].mxu1 }
  0xeb   :  { %v6363_v47 = vadd.f32 %v4023_v46, %v71_v39  ;;  %v289_v49 = vpop.f32.mrb[3].mxu1 }
  0xec   :  { %v6365_v50 = vadd.f32 %v289_v49, %v71_v39 }
  0xf2   :  { %v4026_v54 = vpop.f32.mrb[4].mxu1 }
  0xf3   :  { %v6368_v55 = vadd.f32 %v4026_v54, %v71_v39  ;;  %v299_v57 = vpop.f32.mrb[5].mxu1 }
  0xf4   :  { %v6374_v59 = vadd.f32 %v299_v57, %v71_v39 }
  0xf7   :  { %v4029_v60 = vpop.f32.mrb[6].mxu1 }
  0xf8   :  { %v6376_v0 = vadd.f32 %v4029_v60, %v71_v39  ;;  %v309_v1 = vpop.f32.mrb[7].mxu1 }
  0xf9   :  { %v6380_v7 = vadd.f32 %v309_v1, %v71_v39 }
  0xfb   :  { %v460_v62 = vpop.f32.mrb[0].mxu0 }
  0xfc   :  { %v5720_v4 = vadd.f32 %v460_v62, %v6372_v58  ;;  %v462_v6 = vpop.f32.mrb[1].mxu0 }
  0xfd   :  { %v5721_v13 = vadd.f32 %v462_v6, %v6384_v11 }
  0xfe   :  { %v3639_v9 = vmul.f32 -1.442695, %v5720_v4 }
  0xff   :  { %v3640_v20 = vmul.f32 -1.442695, %v5721_v13 }
 0x100   :  { %5787 = vpow2.f32 %v3639_v9 }
 0x101   :  { %5789 = vpow2.f32 %v3640_v20 }
 0x104   :  { %v531_v17 = vpop.f32.mrb[8].mxu1 }
 0x105   :  { %v4064_v18 = vpop.f32.mrb[9].mxu1  ;;  %v541_v28 = vadd.f32 %v6390_v27, %v531_v17 }
 0x10a   :  { %v5788_v24 = vpop.eup %5787 }
 0x10b   :  { %v546_v25 = vadd.f32 1.0, %v5788_v24  ;;  %v5790_v30 = vpop.eup %5789 }
 0x10c   :  { %v553_v41 = vadd.f32 1.0, %v5790_v30 }
 0x10d   :  { %5791 = vrcp.f32 %v546_v25 }
 0x117   :  { %v5792_v32 = vpop.eup %5791 }
 0x118   :  { %v556_v38 = vmul.f32 %v5792_v32, %v541_v28 }
 0x11a   :  { %v557_v46 = vadd.f32 %v556_v38, %v280_v35 }
 0x11c   :  { %5793 = vtanh.f32 %v557_v46 }
 0x11d   :  { %5795 = vrcp.f32 %v553_v41 }
 0x126   :  { %v5794_v49 = vpop.eup %5793 }
 0x127   :  { %v559_v54 = vsub.f32 0.0, %v5794_v49  ;;  %v5796_v57 = vpop.eup %5795 }
 0x129   :  { %v560_v60 = vmul.f32 %v5796_v57, %v559_v54 }
 0x12b   :  { %v6393_v62 = vadd.f32 %v5794_v49, %v560_v60 }
 0x12d   :  { %632 = vmatmul.mubr.f32.vlgmr.msra.gmra.mrb[2].mxu0 %v6393_v62  ;;  %4098 = vmatmul.mubr.f32.vlgmr.msra.gmra.mrb[10].mxu1 %v6393_v62 }
 0x12e   :  { %4827 = vmatpush1.bf16.msra.mxu0 %v6058_v15  ;;  %4858 = vmatpush3.bf16.msra.mxu1 %v6134_v40 }
 0x12f   :  { %4829 = vmatprep.subr.bf16.mxu0 %v6061_v16  ;;  %4859 = vmatprep.subr.bf16.mxu1 %v5949_v48 }
 0x130   :  { %799 = vmatprep.mubr.f32.mxu0 %v5948_v3  ;;  %4132 = vmatprep.mubr.msk.f32.mxu1 %vm5950_vm1, %v5948_v3 }
 0x132   :  { %4831 = vmatpush1.bf16.msra.mxu0 %v6081_v22  ;;  %4861 = vmatpush3.bf16.msra.mxu1 %v6168_v51 }
 0x133   :  { %4833 = vmatprep.subr.bf16.mxu0 %v6084_v23  ;;  %4862 = vmatprep.subr.bf16.mxu1 %v5949_v48 }
 0x136   :  { %4835 = vmatpush1.bf16.msra.mxu0 %v6110_v31  ;;  %4864 = vmatpush3.bf16.msra.mxu1 %v6202_v61 }
 0x137   :  { %4837 = vmatprep.subr.bf16.mxu0 %v6113_v33  ;;  %4865 = vmatprep.subr.bf16.mxu1 %v5949_v48 }
 0x13a   :  { %4839 = vmatpush1.bf16.msra.mxu0 %v6141_v42  ;;  %4867 = vmatpush3.bf16.msra.mxu1 %v6236_v8 }
 0x13b   :  { %4841 = vmatprep.subr.bf16.mxu0 %v6150_v45  ;;  %4868 = vmatprep.subr.bf16.mxu1 %v5949_v48 }
 0x13e   :  { %4843 = vmatpush1.bf16.msra.mxu0 %v6175_v53  ;;  %4870 = vmatpush3.bf16.msra.mxu1 %v6264_v19 }
 0x13f   :  { %4845 = vmatprep.subr.bf16.mxu0 %v6184_v56  ;;  %4871 = vmatprep.subr.bf16.mxu1 %v5949_v48 }
 0x142   :  { %4847 = vmatpush1.bf16.msra.mxu0 %v6209_v63  ;;  %4873 = vmatpush3.bf16.msra.mxu1 %v6284_v26 }
 0x143   :  { %4849 = vmatprep.subr.bf16.mxu0 %v6218_v2  ;;  %4874 = vmatprep.subr.bf16.mxu1 %v5949_v48 }
 0x146   :  { %4851 = vmatpush1.bf16.msra.mxu0 %v6243_v10  ;;  %4876 = vmatpush3.bf16.msra.mxu1 %v6300_v29 }
 0x147   :  { %4853 = vmatprep.subr.bf16.mxu0 %v6252_v14  ;;  %4877 = vmatprep.subr.bf16.mxu1 %v5949_v48 }
 0x14a   :  { %4855 = vmatpush1.bf16.msra.mxu0 %v6271_v21  ;;  %4879 = vmatpush3.bf16.msra.mxu1 %v6315_v34 }
 0x14b   :  { %4881 = vmatprep.subr.bf16.mxu0 %v6050_v12  ;;  %4912 = vmatprep.subr.bf16.mxu1 %v5949_v48 }
 0x200   :  { %v633_v39 = vpop.f32.mrb[2].mxu0  ;;  %v704_v44 = vpop.f32.mrb[10].mxu1 }
 0x201   :  { %v5722_v1 = vadd.f32 %v633_v39, %v6372_v58  ;;  %v635_v4 = vpop.f32.mrb[3].mxu0  ;;  %v4099_v6 = vpop.f32.mrb[11].mxu1  ;;  %v708_v25 = vadd.f32 %v6390_v27, %v704_v44 }
 0x202   :  { %v5723_v13 = vadd.f32 %v635_v4, %v6384_v11 }
 0x203   :  { %v3641_v9 = vmul.f32 -1.442695, %v5722_v1 }
 0x204   :  { %v3642_v17 = vmul.f32 -1.442695, %v5723_v13 }
 0x205   :  { %5797 = vpow2.f32 %v3641_v9 }
 0x206   :  { %5799 = vpow2.f32 %v3642_v17 }
 0x20f   :  { %v5798_v18 = vpop.eup %5797 }
 0x210   :  { %v713_v20 = vadd.f32 1.0, %v5798_v18  ;;  %v5800_v24 = vpop.eup %5799 }
 0x211   :  { %v720_v35 = vadd.f32 1.0, %v5800_v24 }
 0x212   :  { %5801 = vrcp.f32 %v713_v20 }
 0x21c   :  { %v5802_v28 = vpop.eup %5801 }
 0x21d   :  { %v723_v30 = vmul.f32 %v5802_v28, %v708_v25 }
 0x21f   :  { %v724_v32 = vadd.f32 %v723_v30, %v6361_v43 }
 0x221   :  { %5803 = vtanh.f32 %v724_v32 }
 0x222   :  { %5805 = vrcp.f32 %v720_v35 }
 0x22b   :  { %v5804_v38 = vpop.eup %5803 }
 0x22c   :  { %v726_v41 = vsub.f32 %v6393_v62, %v5804_v38  ;;  %v5806_v46 = vpop.eup %5805 }
 0x22e   :  { %v727_v49 = vmul.f32 %v5806_v46, %v726_v41 }
 0x230   :  { %v6437_v54 = vadd.f32 %v5804_v38, %v727_v49 }
 0x232   :  { %800 = vmatmul.mubr.f32.vlgmr.msra.gmra.mrb[4].mxu0 %v6437_v54  ;;  %4133 = vmatmul.mubr.f32.vlgmr.msra.gmra.mrb[12].mxu1 %v6437_v54 }
 0x233   :  { %4883 = vmatpush1.bf16.msra.mxu0 %v6058_v15  ;;  %4914 = vmatpush3.bf16.msra.mxu1 %v6134_v40 }
 0x234   :  { %4885 = vmatprep.subr.bf16.mxu0 %v6061_v16  ;;  %4915 = vmatprep.subr.bf16.mxu1 %v5949_v48 }
 0x235   :  { %967 = vmatprep.mubr.f32.mxu0 %v5948_v3  ;;  %4167 = vmatprep.mubr.msk.f32.mxu1 %vm5950_vm1, %v5948_v3 }
 0x237   :  { %4887 = vmatpush1.bf16.msra.mxu0 %v6081_v22  ;;  %4917 = vmatpush3.bf16.msra.mxu1 %v6168_v51 }
 0x238   :  { %4889 = vmatprep.subr.bf16.mxu0 %v6084_v23  ;;  %4918 = vmatprep.subr.bf16.mxu1 %v5949_v48 }
 0x23b   :  { %4891 = vmatpush1.bf16.msra.mxu0 %v6110_v31  ;;  %4920 = vmatpush3.bf16.msra.mxu1 %v6202_v61 }
 0x23c   :  { %4893 = vmatprep.subr.bf16.mxu0 %v6113_v33  ;;  %4921 = vmatprep.subr.bf16.mxu1 %v5949_v48 }
 0x23f   :  { %4895 = vmatpush1.bf16.msra.mxu0 %v6141_v42  ;;  %4923 = vmatpush3.bf16.msra.mxu1 %v6236_v8 }
 0x240   :  { %4897 = vmatprep.subr.bf16.mxu0 %v6150_v45  ;;  %4924 = vmatprep.subr.bf16.mxu1 %v5949_v48 }
 0x243   :  { %4899 = vmatpush1.bf16.msra.mxu0 %v6175_v53  ;;  %4926 = vmatpush3.bf16.msra.mxu1 %v6264_v19 }
 0x244   :  { %4901 = vmatprep.subr.bf16.mxu0 %v6184_v56  ;;  %4927 = vmatprep.subr.bf16.mxu1 %v5949_v48 }
 0x247   :  { %4903 = vmatpush1.bf16.msra.mxu0 %v6209_v63  ;;  %4929 = vmatpush3.bf16.msra.mxu1 %v6284_v26 }
 0x248   :  { %4905 = vmatprep.subr.bf16.mxu0 %v6218_v2  ;;  %4930 = vmatprep.subr.bf16.mxu1 %v5949_v48 }
 0x24b   :  { %4907 = vmatpush1.bf16.msra.mxu0 %v6243_v10  ;;  %4932 = vmatpush3.bf16.msra.mxu1 %v6300_v29 }
 0x24c   :  { %4909 = vmatprep.subr.bf16.mxu0 %v6252_v14  ;;  %4933 = vmatprep.subr.bf16.mxu1 %v5949_v48 }
 0x24f   :  { %4911 = vmatpush1.bf16.msra.mxu0 %v6271_v21  ;;  %4935 = vmatpush3.bf16.msra.mxu1 %v6315_v34 }
 0x250   :  { %4937 = vmatprep.subr.bf16.mxu0 %v6050_v12  ;;  %4968 = vmatprep.subr.bf16.mxu1 %v5949_v48 }
 0x305   :  { %v801_v43 = vpop.f32.mrb[4].mxu0  ;;  %v872_v57 = vpop.f32.mrb[12].mxu1 }
 0x306   :  { %v5724_v60 = vadd.f32 %v801_v43, %v6372_v58  ;;  %v803_v39 = vpop.f32.mrb[5].mxu0  ;;  %v4134_v44 = vpop.f32.mrb[13].mxu1  ;;  %v876_v18 = vadd.f32 %v6390_v27, %v872_v57 }
 0x307   :  { %v5725_v4 = vadd.f32 %v803_v39, %v6384_v11 }
 0x308   :  { %v3643_v1 = vmul.f32 -1.442695, %v5724_v60 }
 0x309   :  { %v3644_v6 = vmul.f32 -1.442695, %v5725_v4 }
 0x30a   :  { %5807 = vpow2.f32 %v3643_v1 }
 0x30b   :  { %5809 = vpow2.f32 %v3644_v6 }
 0x314   :  { %v5808_v9 = vpop.eup %5807 }
 0x315   :  { %v881_v13 = vadd.f32 1.0, %v5808_v9  ;;  %v5810_v17 = vpop.eup %5809 }
 0x316   :  { %v888_v28 = vadd.f32 1.0, %v5810_v17 }
 0x317   :  { %5811 = vrcp.f32 %v881_v13 }
 0x321   :  { %v5812_v20 = vpop.eup %5811 }
 0x322   :  { %v891_v24 = vmul.f32 %v5812_v20, %v876_v18 }
 0x324   :  { %v892_v25 = vadd.f32 %v891_v24, %v6365_v50 }
 0x326   :  { %5813 = vtanh.f32 %v892_v25 }
 0x327   :  { %5815 = vrcp.f32 %v888_v28 }
 0x330   :  { %v5814_v30 = vpop.eup %5813 }
 0x331   :  { %v894_v32 = vsub.f32 %v6437_v54, %v5814_v30  ;;  %v5816_v35 = vpop.eup %5815 }
 0x333   :  { %v895_v38 = vmul.f32 %v5816_v35, %v894_v32 }
 0x335   :  { %v6481_v41 = vadd.f32 %v5814_v30, %v895_v38 }
 0x337   :  { %968 = vmatmul.mubr.f32.vlgmr.msra.gmra.mrb[6].mxu0 %v6481_v41  ;;  %4168 = vmatmul.mubr.f32.vlgmr.msra.gmra.mrb[14].mxu1 %v6481_v41 }
 0x338   :  { %4939 = vmatpush1.bf16.msra.mxu0 %v6058_v15  ;;  %4970 = vmatpush3.bf16.msra.mxu1 %v6134_v40 }
 0x339   :  { %4941 = vmatprep.subr.bf16.mxu0 %v6061_v16  ;;  %4971 = vmatprep.subr.bf16.mxu1 %v5949_v48 }
 0x33a   :  { %1135 = vmatprep.mubr.f32.mxu0 %v5948_v3  ;;  %4202 = vmatprep.mubr.msk.f32.mxu1 %vm5950_vm1, %v5948_v3 }
 0x33c   :  { %4943 = vmatpush1.bf16.msra.mxu0 %v6081_v22  ;;  %4973 = vmatpush3.bf16.msra.mxu1 %v6168_v51 }
 0x33d   :  { %4945 = vmatprep.subr.bf16.mxu0 %v6084_v23  ;;  %4974 = vmatprep.subr.bf16.mxu1 %v5949_v48 }
 0x340   :  { %4947 = vmatpush1.bf16.msra.mxu0 %v6110_v31  ;;  %4976 = vmatpush3.bf16.msra.mxu1 %v6202_v61 }
 0x341   :  { %4949 = vmatprep.subr.bf16.mxu0 %v6113_v33  ;;  %4977 = vmatprep.subr.bf16.mxu1 %v5949_v48 }
 0x344   :  { %4951 = vmatpush1.bf16.msra.mxu0 %v6141_v42  ;;  %4979 = vmatpush3.bf16.msra.mxu1 %v6236_v8 }
 0x345   :  { %4953 = vmatprep.subr.bf16.mxu0 %v6150_v45  ;;  %4980 = vmatprep.subr.bf16.mxu1 %v5949_v48 }
 0x348   :  { %4955 = vmatpush1.bf16.msra.mxu0 %v6175_v53  ;;  %4982 = vmatpush3.bf16.msra.mxu1 %v6264_v19 }
 0x349   :  { %4957 = vmatprep.subr.bf16.mxu0 %v6184_v56  ;;  %4983 = vmatprep.subr.bf16.mxu1 %v5949_v48 }
 0x34c   :  { %4959 = vmatpush1.bf16.msra.mxu0 %v6209_v63  ;;  %4985 = vmatpush3.bf16.msra.mxu1 %v6284_v26 }
 0x34d   :  { %4961 = vmatprep.subr.bf16.mxu0 %v6218_v2  ;;  %4986 = vmatprep.subr.bf16.mxu1 %v5949_v48 }
 0x350   :  { %4963 = vmatpush1.bf16.msra.mxu0 %v6243_v10  ;;  %4988 = vmatpush3.bf16.msra.mxu1 %v6300_v29 }
 0x351   :  { %4965 = vmatprep.subr.bf16.mxu0 %v6252_v14  ;;  %4989 = vmatprep.subr.bf16.mxu1 %v5949_v48 }
 0x354   :  { %4967 = vmatpush1.bf16.msra.mxu0 %v6271_v21  ;;  %4991 = vmatpush3.bf16.msra.mxu1 %v6315_v34 }
 0x355   :  { %4993 = vmatprep.subr.bf16.mxu0 %v6050_v12  ;;  %5024 = vmatprep.subr.bf16.mxu1 %v5949_v48 }
 0x40a   :  { %v969_v50 = vpop.f32.mrb[6].mxu0  ;;  %v1040_v46 = vpop.f32.mrb[14].mxu1 }
 0x40b   :  { %v5726_v49 = vadd.f32 %v969_v50, %v6372_v58  ;;  %v971_v43 = vpop.f32.mrb[7].mxu0  ;;  %v4169_v57 = vpop.f32.mrb[15].mxu1  ;;  %v1044_v9 = vadd.f32 %v6390_v27, %v1040_v46 }
 0x40c   :  { %v5727_v39 = vadd.f32 %v971_v43, %v6384_v11 }
 0x40d   :  { %v3645_v60 = vmul.f32 -1.442695, %v5726_v49 }
 0x40e   :  { %v3646_v44 = vmul.f32 -1.442695, %v5727_v39 }
 0x40f   :  { %5817 = vpow2.f32 %v3645_v60 }
 0x410   :  { %5819 = vpow2.f32 %v3646_v44 }
 0x419   :  { %v5818_v1 = vpop.eup %5817 }
 0x41a   :  { %v1049_v4 = vadd.f32 1.0, %v5818_v1  ;;  %v5820_v6 = vpop.eup %5819 }
 0x41b   :  { %v1056_v20 = vadd.f32 1.0, %v5820_v6 }
 0x41c   :  { %5821 = vrcp.f32 %v1049_v4 }
 0x426   :  { %v5822_v13 = vpop.eup %5821 }
 0x427   :  { %v1059_v17 = vmul.f32 %v5822_v13, %v1044_v9 }
 0x429   :  { %v1060_v18 = vadd.f32 %v1059_v17, %v6363_v47 }
 0x42b   :  { %5823 = vtanh.f32 %v1060_v18 }
 0x42c   :  { %5825 = vrcp.f32 %v1056_v20 }
 0x435   :  { %v5824_v24 = vpop.eup %5823 }
 0x436   :  { %v1062_v25 = vsub.f32 %v6481_v41, %v5824_v24  ;;  %v5826_v28 = vpop.eup %5825 }
 0x438   :  { %v1063_v30 = vmul.f32 %v5826_v28, %v1062_v25 }
 0x43a   :  { %v6525_v32 = vadd.f32 %v5824_v24, %v1063_v30 }
 0x43c   :  { %1136 = vmatmul.mubr.f32.vlgmr.msra.gmra.mrb[8].mxu0 %v6525_v32  ;;  %4203 = vmatmul.mubr.f32.vlgmr.msra.gmra.mrb[16].mxu1 %v6525_v32 }
 0x43d   :  { %4995 = vmatpush1.bf16.msra.mxu0 %v6058_v15  ;;  %5026 = vmatpush3.bf16.msra.mxu1 %v6134_v40 }
 0x43e   :  { %4997 = vmatprep.subr.bf16.mxu0 %v6061_v16  ;;  %5027 = vmatprep.subr.bf16.mxu1 %v5949_v48 }
 0x43f   :  { %1303 = vmatprep.mubr.f32.mxu0 %v5948_v3  ;;  %4237 = vmatprep.mubr.msk.f32.mxu1 %vm5950_vm1, %v5948_v3 }
 0x441   :  { %4999 = vmatpush1.bf16.msra.mxu0 %v6081_v22  ;;  %5029 = vmatpush3.bf16.msra.mxu1 %v6168_v51 }
 0x442   :  { %5001 = vmatprep.subr.bf16.mxu0 %v6084_v23  ;;  %5030 = vmatprep.subr.bf16.mxu1 %v5949_v48 }
 0x445   :  { %5003 = vmatpush1.bf16.msra.mxu0 %v6110_v31  ;;  %5032 = vmatpush3.bf16.msra.mxu1 %v6202_v61 }
 0x446   :  { %5005 = vmatprep.subr.bf16.mxu0 %v6113_v33  ;;  %5033 = vmatprep.subr.bf16.mxu1 %v5949_v48 }
 0x449   :  { %5007 = vmatpush1.bf16.msra.mxu0 %v6141_v42  ;;  %5035 = vmatpush3.bf16.msra.mxu1 %v6236_v8 }
 0x44a   :  { %5009 = vmatprep.subr.bf16.mxu0 %v6150_v45  ;;  %5036 = vmatprep.subr.bf16.mxu1 %v5949_v48 }
 0x44d   :  { %5011 = vmatpush1.bf16.msra.mxu0 %v6175_v53  ;;  %5038 = vmatpush3.bf16.msra.mxu1 %v6264_v19 }
 0x44e   :  { %5013 = vmatprep.subr.bf16.mxu0 %v6184_v56  ;;  %5039 = vmatprep.subr.bf16.mxu1 %v5949_v48 }
 0x451   :  { %5015 = vmatpush1.bf16.msra.mxu0 %v6209_v63  ;;  %5041 = vmatpush3.bf16.msra.mxu1 %v6284_v26 }
 0x452   :  { %5017 = vmatprep.subr.bf16.mxu0 %v6218_v2  ;;  %5042 = vmatprep.subr.bf16.mxu1 %v5949_v48 }
 0x455   :  { %5019 = vmatpush1.bf16.msra.mxu0 %v6243_v10  ;;  %5044 = vmatpush3.bf16.msra.mxu1 %v6300_v29 }
 0x456   :  { %5021 = vmatprep.subr.bf16.mxu0 %v6252_v14  ;;  %5045 = vmatprep.subr.bf16.mxu1 %v5949_v48 }
 0x459   :  { %5023 = vmatpush1.bf16.msra.mxu0 %v6271_v21  ;;  %5047 = vmatpush3.bf16.msra.mxu1 %v6315_v34 }
 0x45a   :  { %5049 = vmatprep.subr.bf16.mxu0 %v6050_v12  ;;  %5080 = vmatprep.subr.bf16.mxu1 %v5949_v48 }
 0x50f   :  { %v1137_v47 = vpop.f32.mrb[8].mxu0  ;;  %v1208_v35 = vpop.f32.mrb[16].mxu1 }
 0x510   :  { %v5728_v38 = vadd.f32 %v1137_v47, %v6372_v58  ;;  %v1139_v50 = vpop.f32.mrb[9].mxu0  ;;  %v4204_v46 = vpop.f32.mrb[17].mxu1  ;;  %v1212_v1 = vadd.f32 %v6390_v27, %v1208_v35 }
 0x511   :  { %v5729_v43 = vadd.f32 %v1139_v50, %v6384_v11 }
 0x512   :  { %v3647_v49 = vmul.f32 -1.442695, %v5728_v38 }
 0x513   :  { %v3648_v57 = vmul.f32 -1.442695, %v5729_v43 }
 0x514   :  { %5827 = vpow2.f32 %v3647_v49 }
 0x515   :  { %5829 = vpow2.f32 %v3648_v57 }
 0x51e   :  { %v5828_v60 = vpop.eup %5827 }
 0x51f   :  { %v1217_v39 = vadd.f32 1.0, %v5828_v60  ;;  %v5830_v44 = vpop.eup %5829 }
 0x520   :  { %v1224_v13 = vadd.f32 1.0, %v5830_v44 }
 0x521   :  { %5831 = vrcp.f32 %v1217_v39 }
 0x52b   :  { %v5832_v4 = vpop.eup %5831 }
 0x52c   :  { %v1227_v6 = vmul.f32 %v5832_v4, %v1212_v1 }
 0x52e   :  { %v1228_v9 = vadd.f32 %v1227_v6, %v6374_v59 }
 0x530   :  { %5833 = vtanh.f32 %v1228_v9 }
 0x531   :  { %5835 = vrcp.f32 %v1224_v13 }
 0x53a   :  { %v5834_v17 = vpop.eup %5833 }
 0x53b   :  { %v1230_v18 = vsub.f32 %v6525_v32, %v5834_v17  ;;  %v5836_v20 = vpop.eup %5835 }
 0x53d   :  { %v1231_v24 = vmul.f32 %v5836_v20, %v1230_v18  ;;  %v1747_v18 = vld [vmem:[%s7547_s5] sm:$0xff]  ;;  %v1750_v20 = vld [vmem:[%s7547_s5 + $0x18] sm:$0xff] }
 0x53f   :  { %v6569_v25 = vadd.f32 %v5834_v17, %v1231_v24 }
 0x541   :  { %1304 = vmatmul.mubr.f32.vlgmr.msra.gmra.mrb[10].mxu0 %v6569_v25  ;;  %4238 = vmatmul.mubr.f32.vlgmr.msra.gmra.mrb[18].mxu1 %v6569_v25 }
 0x542   :  { %5051 = vmatpush1.bf16.msra.mxu0 %v6058_v15  ;;  %5082 = vmatpush3.bf16.msra.mxu1 %v6134_v40 }
 0x543   :  { %5053 = vmatprep.subr.bf16.mxu0 %v6061_v16  ;;  %5083 = vmatprep.subr.bf16.mxu1 %v5949_v48 }
 0x544   :  { %1471 = vmatprep.mubr.f32.mxu0 %v5948_v3  ;;  %4272 = vmatprep.mubr.msk.f32.mxu1 %vm5950_vm1, %v5948_v3 }
 0x546   :  { %5055 = vmatpush1.bf16.msra.mxu0 %v6081_v22  ;;  %5085 = vmatpush3.bf16.msra.mxu1 %v6168_v51 }
 0x547   :  { %5057 = vmatprep.subr.bf16.mxu0 %v6084_v23  ;;  %5086 = vmatprep.subr.bf16.mxu1 %v5949_v48 }
 0x54a   :  { %5059 = vmatpush1.bf16.msra.mxu0 %v6110_v31  ;;  %5088 = vmatpush3.bf16.msra.mxu1 %v6202_v61 }
 0x54b   :  { %5061 = vmatprep.subr.bf16.mxu0 %v6113_v33  ;;  %5089 = vmatprep.subr.bf16.mxu1 %v5949_v48 }
 0x54e   :  { %5063 = vmatpush1.bf16.msra.mxu0 %v6141_v42  ;;  %5091 = vmatpush3.bf16.msra.mxu1 %v6236_v8 }
 0x54f   :  { %5065 = vmatprep.subr.bf16.mxu0 %v6150_v45  ;;  %5092 = vmatprep.subr.bf16.mxu1 %v5949_v48 }
 0x552   :  { %5067 = vmatpush1.bf16.msra.mxu0 %v6175_v53  ;;  %5094 = vmatpush3.bf16.msra.mxu1 %v6264_v19 }
 0x553   :  { %5069 = vmatprep.subr.bf16.mxu0 %v6184_v56  ;;  %5095 = vmatprep.subr.bf16.mxu1 %v5949_v48 }
 0x556   :  { %5071 = vmatpush1.bf16.msra.mxu0 %v6209_v63  ;;  %5097 = vmatpush3.bf16.msra.mxu1 %v6284_v26 }
 0x557   :  { %5073 = vmatprep.subr.bf16.mxu0 %v6218_v2  ;;  %5098 = vmatprep.subr.bf16.mxu1 %v5949_v48 }
 0x55a   :  { %5075 = vmatpush1.bf16.msra.mxu0 %v6243_v10  ;;  %5100 = vmatpush3.bf16.msra.mxu1 %v6300_v29 }
 0x55b   :  { %5077 = vmatprep.subr.bf16.mxu0 %v6252_v14  ;;  %5101 = vmatprep.subr.bf16.mxu1 %v5949_v48 }
 0x55e   :  { %5079 = vmatpush1.bf16.msra.mxu0 %v6271_v21  ;;  %5103 = vmatpush3.bf16.msra.mxu1 %v6315_v34 }
 0x55f   :  { %5105 = vmatprep.subr.bf16.mxu0 %v6050_v12  ;;  %5136 = vmatprep.subr.bf16.mxu1 %v5949_v48 }
 0x614   :  { %v1305_v59 = vpop.f32.mrb[10].mxu0  ;;  %v1376_v28 = vpop.f32.mrb[18].mxu1 }
 0x615   :  { %v5730_v30 = vadd.f32 %v1305_v59, %v6372_v58  ;;  %v1307_v47 = vpop.f32.mrb[11].mxu0  ;;  %v4239_v35 = vpop.f32.mrb[19].mxu1  ;;  %v1380_v12 = vadd.f32 %v6390_v27, %v1376_v28  ;;  %v1755_v28 = vld [vmem:[%s7547_s5 + $0x40] sm:$0xff] }
 0x616   :  { %v5731_v50 = vadd.f32 %v1307_v47, %v6384_v11  ;;  %v5162_v47 = vpack.c.bf16 %v1750_v20, %v1747_v18  ;;  %v1780_v18 = vld [vmem:[%s7547_s5 + $0x108] sm:$0xff] }
 0x617   :  { %v3649_v38 = vmul.f32 -1.442695, %v5730_v30  ;;  %v1758_v30 = vld [vmem:[%s7547_s5 + $0x58] sm:$0xff]  ;;  %v1784_v20 = vld [vmem:[%s7547_s5 + $0x128] sm:$0xff] }
 0x618   :  { %v3650_v46 = vmul.f32 -1.442695, %v5731_v50  ;;  %v1753_v50 = vld [vmem:[%s7547_s5 + $0x30] sm:$0xff] }
 0x619   :  { %5837 = vpow2.f32 %v3649_v38 }
 0x61a   :  { %5839 = vpow2.f32 %v3650_v46  ;;  %v1756_v46 = vld [vmem:[%s7547_s5 + $0x48] sm:$0xff] }
 0x623   :  { %v5838_v49 = vpop.eup %5837 }
 0x624   :  { %v1385_v43 = vadd.f32 1.0, %v5838_v49  ;;  %v5840_v57 = vpop.eup %5839  ;;  %v1760_v49 = vld [vmem:[%s7547_s5 + $0x68] sm:$0xff] }
 0x625   :  { %v1392_v1 = vadd.f32 1.0, %v5840_v57  ;;  %v1763_v57 = vld [vmem:[%s7547_s5 + $0x80] sm:$0xff] }
 0x626   :  { %5841 = vrcp.f32 %v1385_v43  ;;  %v5196_v43 = vpack.c.bf16 %v1758_v30, %v1755_v28 }
 0x630   :  { %v5842_v60 = vpop.eup %5841 }
 0x631   :  { %v1395_v39 = vmul.f32 %v5842_v60, %v1380_v12  ;;  %v1761_v12 = vld [vmem:[%s7547_s5 + $0x70] sm:$0xff]  ;;  %v1764_v60 = vld [vmem:[%s7547_s5 + $0x88] sm:$0xff] }
 0x633   :  { %v1396_v44 = vadd.f32 %v1395_v39, %v6368_v55  ;;  %v5166_v39 = vpack.c.bf16 %v1756_v46, %v1753_v50  ;;  %v1790_v50 = vld [vmem:[%s7547_s5 + $0x158] sm:$0xff]  ;;  %v1793_v46 = vld [vmem:[%s7547_s5 + $0x170] sm:$0xff] }
 0x635   :  { %5843 = vtanh.f32 %v1396_v44  ;;  %v5168_v44 = vpack.c.bf16 %v1763_v57, %v1760_v49  ;;  %v1791_v49 = vld [vmem:[%s7547_s5 + $0x160] sm:$0xff] }
 0x636   :  { %5845 = vrcp.f32 %v1392_v1  ;;  %v5200_v1 = vpack.c.bf16 %v1764_v60, %v1761_v12  ;;  %v5188_v12 = vpack.c.bf16 %v1793_v46, %v1790_v50  ;;  %v2097_v46 = vld [vmem:[%s7548_s6 + $0x158] sm:$0xff] }
 0x63f   :  { %v5844_v4 = vpop.eup %5843 }
 0x640   :  { %v1398_v6 = vsub.f32 %v6569_v25, %v5844_v4  ;;  %v5846_v9 = vpop.eup %5845 }
 0x642   :  { %v1399_v13 = vmul.f32 %v5846_v9, %v1398_v6  ;;  %v1762_v6 = vld [vmem:[%s7547_s5 + $0x78] sm:$0xff] }
 0x643   :  { %v1766_v9 = vld [vmem:[%s7547_s5 + $0x98] sm:$0xff] }
 0x644   :  { %v6613_v17 = vadd.f32 %v5844_v4, %v1399_v13  ;;  %v1759_v4 = vld [vmem:[%s7547_s5 + $0x60] sm:$0xff]  ;;  %v1769_v13 = vld [vmem:[%s7547_s5 + $0xb0] sm:$0xff] }
 0x646   :  { %1472 = vmatmul.mubr.f32.vlgmr.msra.gmra.mrb[12].mxu0 %v6613_v17  ;;  %4273 = vmatmul.mubr.f32.vlgmr.msra.gmra.mrb[20].mxu1 %v6613_v17 }
 0x647   :  { %5107 = vmatpush1.bf16.msra.mxu0 %v6058_v15  ;;  %5138 = vmatpush3.bf16.msra.mxu1 %v6134_v40  ;;  %v1748_v15 = vld [vmem:[%s7547_s5 + $0x8] sm:$0xff] }
 0x648   :  { %5109 = vmatprep.subr.bf16.mxu0 %v6061_v16  ;;  %5139 = vmatprep.subr.bf16.mxu1 %v5949_v48  ;;  %v1751_v16 = vld [vmem:[%s7547_s5 + $0x20] sm:$0xff] }
 0x649   :  { %1639 = vmatprep.mubr.f32.mxu0 %v5948_v3  ;;  %4307 = vmatprep.mubr.msk.f32.mxu1 %vm5950_vm1, %v5948_v3 }
 0x64b   :  { %5111 = vmatpush1.bf16.msra.mxu0 %v6081_v22  ;;  %5141 = vmatpush3.bf16.msra.mxu1 %v6168_v51  ;;  %v1749_v22 = vld [vmem:[%s7547_s5 + $0x10] sm:$0xff] }
 0x64c   :  { %5113 = vmatprep.subr.bf16.mxu0 %v6084_v23  ;;  %5142 = vmatprep.subr.bf16.mxu1 %v5949_v48  ;;  %v5160_v23 = vpack.c.bf16 %v1751_v16, %v1748_v15  ;;  %v1767_v15 = vld [vmem:[%s7547_s5 + $0xa0] sm:$0xff]  ;;  %v1770_v16 = vld [vmem:[%s7547_s5 + $0xb8] sm:$0xff] }
 0x64f   :  { %5115 = vmatpush1.bf16.msra.mxu0 %v6110_v31  ;;  %5144 = vmatpush3.bf16.msra.mxu1 %v6202_v61  ;;  %v1752_v31 = vld [vmem:[%s7547_s5 + $0x28] sm:$0xff] }
 0x650   :  { %5117 = vmatprep.subr.bf16.mxu0 %v6113_v33  ;;  %5145 = vmatprep.subr.bf16.mxu1 %v5949_v48  ;;  %v5192_v33 = vpack.c.bf16 %v1752_v31, %v1749_v22  ;;  %v5170_v22 = vpack.c.bf16 %v1762_v6, %v1759_v4  ;;  %v5204_v31 = vpack.c.bf16 %v1770_v16, %v1767_v15  ;;  %v2061_v4 = vld [vmem:[%s7548_s6 + $0x38] sm:$0xff]  ;;  %v2064_v6 = vld [vmem:[%s7548_s6 + $0x50] sm:$0xff]  ;;  %v2063_v15 = vld [vmem:[%s7548_s6 + $0x48] sm:$0xff] }
 0x653   :  { %5119 = vmatpush1.bf16.msra.mxu0 %v6141_v42  ;;  %5147 = vmatpush3.bf16.msra.mxu1 %v6236_v8 }
 0x654   :  { %5121 = vmatprep.subr.bf16.mxu0 %v6150_v45  ;;  %5148 = vmatprep.subr.bf16.mxu1 %v5949_v48 }
 0x657   :  { %5123 = vmatpush1.bf16.msra.mxu0 %v6175_v53  ;;  %5150 = vmatpush3.bf16.msra.mxu1 %v6264_v19 }
 0x658   :  { %5125 = vmatprep.subr.bf16.mxu0 %v6184_v56  ;;  %5151 = vmatprep.subr.bf16.mxu1 %v5949_v48 }
 0x65b   :  { %5127 = vmatpush1.bf16.msra.mxu0 %v6209_v63  ;;  %5153 = vmatpush3.bf16.msra.mxu1 %v6284_v26 }
 0x65c   :  { %5129 = vmatprep.subr.bf16.mxu0 %v6218_v2  ;;  %5154 = vmatprep.subr.bf16.mxu1 %v5949_v48 }
 0x65f   :  { %5131 = vmatpush1.bf16.msra.mxu0 %v6243_v10  ;;  %5156 = vmatpush3.bf16.msra.mxu1 %v6300_v29 }
 0x660   :  { %5133 = vmatprep.subr.bf16.mxu0 %v6252_v14  ;;  %5157 = vmatprep.subr.bf16.mxu1 %v5949_v48 }
 0x663   :  { %5135 = vmatpush1.bf16.msra.mxu0 %v6271_v21  ;;  %5159 = vmatpush3.bf16.msra.mxu1 %v6315_v34 }
 0x664   :  { %5161 = vmatprep.subr.bf16.mxu0 %v5160_v23  ;;  %5193 = vmatprep.subr.bf16.mxu1 %v5192_v33  ;;  %v5172_v23 = vpack.c.bf16 %v1769_v13, %v1766_v9  ;;  %v6850_v9 = vpack.c.bf16 %v2064_v6, %v2061_v4  ;;  %v2060_v13 = vld [vmem:[%s7548_s6 + $0x30] sm:$0xff]  ;;  %v2077_v4 = vld [vmem:[%s7548_s6 + $0xb8] sm:$0xff] }
 0x665   :  { %v6858_v16 = vpack.c.bf16 %v2063_v15, %v2060_v13  ;;  %v2080_v13 = vld [vmem:[%s7548_s6 + $0xd0] sm:$0xff]  ;;  %v2083_v15 = vld [vmem:[%s7548_s6 + $0xe8] sm:$0xff] }
 0x719   :  { %v1473_v40 = vpop.f32.mrb[12].mxu0  ;;  %v1544_v42 = vpop.f32.mrb[20].mxu1 }
 0x71a   :  { %v5732_v45 = vadd.f32 %v1473_v40, %v6372_v58  ;;  %v1475_v51 = vpop.f32.mrb[13].mxu0  ;;  %v4274_v53 = vpop.f32.mrb[21].mxu1  ;;  %v1548_v14 = vadd.f32 %v6390_v27, %v1544_v42  ;;  %v1754_v27 = vld [vmem:[%s7547_s5 + $0x38] sm:$0xff]  ;;  %v1768_v40 = vld [vmem:[%s7547_s5 + $0xa8] sm:$0xff] }
 0x71b   :  { %v5733_v61 = vadd.f32 %v1475_v51, %v6384_v11  ;;  %v1772_v42 = vld [vmem:[%s7547_s5 + $0xc8] sm:$0xff]  ;;  %v1773_v51 = vld [vmem:[%s7547_s5 + $0xd0] sm:$0xff] }
 0x71c   :  { %v3651_v56 = vmul.f32 -1.442695, %v5732_v45  ;;  %v1775_v45 = vld [vmem:[%s7547_s5 + $0xe0] sm:$0xff]  ;;  %v1776_v53 = vld [vmem:[%s7547_s5 + $0xe8] sm:$0xff] }
 0x71d   :  { %v3652_v63 = vmul.f32 -1.442695, %v5733_v61  ;;  %v5176_v61 = vpack.c.bf16 %v1775_v45, %v1772_v42  ;;  %v2073_v45 = vld [vmem:[%s7548_s6 + $0x98] sm:$0xff] }
 0x71e   :  { %5847 = vpow2.f32 %v3651_v56 }
 0x71f   :  { %5849 = vpow2.f32 %v3652_v63  ;;  %v5208_v63 = vpack.c.bf16 %v1776_v53, %v1773_v51  ;;  %v2076_v51 = vld [vmem:[%s7548_s6 + $0xb0] sm:$0xff] }
 0x720   :  { %v6886_v53 = vpack.c.bf16 %v2076_v51, %v2073_v45  ;;  %v2092_v45 = vld [vmem:[%s7548_s6 + $0x130] sm:$0xff]  ;;  %v2095_v51 = vld [vmem:[%s7548_s6 + $0x148] sm:$0xff] }
 0x728   :  { %v5848_v2 = vpop.eup %5847 }
 0x729   :  { %v1553_v8 = vadd.f32 1.0, %v5848_v2  ;;  %v5850_v10 = vpop.eup %5849  ;;  %v1771_v2 = vld [vmem:[%s7547_s5 + $0xc0] sm:$0xff] }
 0x72a   :  { %v1560_v29 = vadd.f32 1.0, %v5850_v10  ;;  %v1778_v10 = vld [vmem:[%s7547_s5 + $0xf8] sm:$0xff] }
 0x72b   :  { %5851 = vrcp.f32 %v1553_v8  ;;  %v1774_v8 = vld [vmem:[%s7547_s5 + $0xd8] sm:$0xff] }
 0x735   :  { %v5852_v19 = vpop.eup %5851 }
 0x736   :  { %v1563_v21 = vmul.f32 %v5852_v19, %v1548_v14  ;;  %v1781_v14 = vld [vmem:[%s7547_s5 + $0x110] sm:$0xff]  ;;  %v1779_v19 = vld [vmem:[%s7547_s5 + $0x100] sm:$0xff] }
 0x738   :  { %v1564_v26 = vadd.f32 %v1563_v21, %v6380_v7  ;;  %v1757_v7 = vld [vmem:[%s7547_s5 + $0x50] sm:$0xff]  ;;  %v1782_v21 = vld [vmem:[%s7547_s5 + $0x118] sm:$0xff] }
 0x739   :  { %v5164_v38 = vpack.c.bf16 %v1757_v7, %v1754_v27  ;;  %v1785_v27 = vld [vmem:[%s7547_s5 + $0x130] sm:$0xff]  ;;  %v1788_v7 = vld [vmem:[%s7547_s5 + $0x148] sm:$0xff] }
 0x73a   :  { %5853 = vtanh.f32 %v1564_v26  ;;  %v5178_v26 = vpack.c.bf16 %v1774_v8, %v1771_v2  ;;  %v5216_v30 = vpack.c.bf16 %v1788_v7, %v1785_v27  ;;  %v2079_v2 = vld [vmem:[%s7548_s6 + $0xc8] sm:$0xff]  ;;  %v2082_v8 = vld [vmem:[%s7548_s6 + $0xe0] sm:$0xff] }
 0x73b   :  { %5855 = vrcp.f32 %v1560_v29  ;;  %v5180_v29 = vpack.c.bf16 %v1781_v14, %v1778_v10  ;;  %v6904_v10 = vpack.c.bf16 %v2082_v8, %v2079_v2  ;;  %v2078_v14 = vld [vmem:[%s7548_s6 + $0xc0] sm:$0xff]  ;;  %v2101_v2 = vld [vmem:[%s7548_s6 + $0x178] sm:$0xff] }
 0x73c   :  { %v2094_v27 = vld [vmem:[%s7548_s6 + $0x140] sm:$0xff] }
 0x73d   :  { %v2090_v7 = vld [vmem:[%s7548_s6 + $0x120] sm:$0xff] }
 0x744   :  { %v5854_v34 = vpop.eup %5853 }
 0x745   :  { %v1566_v55 = vsub.f32 %v6613_v17, %v5854_v34  ;;  %v5856_v24 = vpop.eup %5855 }
 0x747   :  { %v1567_v59 = vmul.f32 %v5856_v24, %v1566_v55  ;;  %v1777_v55 = vld [vmem:[%s7547_s5 + $0xf0] sm:$0xff]  ;;  %v1787_v24 = vld [vmem:[%s7547_s5 + $0x140] sm:$0xff] }
 0x748   :  { %v5184_v28 = vpack.c.bf16 %v1787_v24, %v1784_v20  ;;  %v2091_v24 = vld [vmem:[%s7548_s6 + $0x128] sm:$0xff] }
 0x749   :  { %v6685_v35 = vadd.f32 %v5854_v34, %v1567_v59  ;;  %v5212_v34 = vpack.c.bf16 %v1782_v21, %v1779_v19  ;;  %v5182_v59 = vpack.c.bf16 %v1780_v18, %v1777_v55  ;;  %v2081_v19 = vld [vmem:[%s7548_s6 + $0xd8] sm:$0xff]  ;;  %v2084_v55 = vld [vmem:[%s7548_s6 + $0xf0] sm:$0xff]  ;;  %v2087_v18 = vld [vmem:[%s7548_s6 + $0x108] sm:$0xff] }
 0x74a   :  { %v6912_v21 = vpack.c.bf16 %v2081_v19, %v2078_v14  ;;  %v6930_v20 = vpack.c.bf16 %v2087_v18, %v2084_v55 }
 0x74b   :  { %1640 = vmatmul.mubr.f32.vlgmr.msra.gmra.mrb[14].mxu0 %v6685_v35  ;;  %4308 = vmatmul.mubr.f32.vlgmr.msra.gmra.mrb[22].mxu1 %v6685_v35 }
 0x74c   :  { %5163 = vmatpush1.bf16.msra.mxu0 %v5162_v47  ;;  %5195 = vmatpush3.bf16.msra.mxu1 %v5192_v33  ;;  %v1765_v33 = vld [vmem:[%s7547_s5 + $0x90] sm:$0xff]  ;;  %v1783_v47 = vld [vmem:[%s7547_s5 + $0x120] sm:$0xff] }
 0x74d   :  { %4342 = vmatprep.mubr.f32.mxu1 %v6393_v62  ;;  %5165 = vmatprep.subr.bf16.mxu0 %v5164_v38  ;;  %v5174_v56 = vpack.c.bf16 %v1768_v40, %v1765_v33  ;;  %v1786_v38 = vld [vmem:[%s7547_s5 + $0x138] sm:$0xff]  ;;  %v2066_v33 = vld [vmem:[%s7548_s6 + $0x60] sm:$0xff] }
 0x74e   :  { %5197 = vmatprep.subr.bf16.mxu1 %v5196_v43  ;;  %1876 = vmatprep.mubr.f32.mxu0 %v5948_v3  ;;  %v5186_v57 = vpack.c.bf16 %v1786_v38, %v1783_v47  ;;  %v2069_v40 = vld [vmem:[%s7548_s6 + $0x78] sm:$0xff]  ;;  %v2059_v47 = vld [vmem:[%s7548_s6 + $0x28] sm:$0xff] }
 0x74f   :  { %v6876_v42 = vpack.c.bf16 %v2069_v40, %v2066_v33  ;;  %v2089_v33 = vld [vmem:[%s7548_s6 + $0x118] sm:$0xff] }
 0x750   :  { %5167 = vmatpush1.bf16.msra.mxu0 %v5166_v39  ;;  %5199 = vmatpush3.bf16.msra.mxu1 %v5196_v43  ;;  %v1794_v43 = vld [vmem:[%s7547_s5 + $0x178] sm:$0xff]  ;;  %v1789_v39 = vld [vmem:[%s7547_s5 + $0x150] sm:$0xff] }
 0x751   :  { %5169 = vmatprep.subr.bf16.mxu0 %v5168_v44  ;;  %5201 = vmatprep.subr.bf16.mxu1 %v5200_v1  ;;  %v5220_v60 = vpack.c.bf16 %v1794_v43, %v1791_v49  ;;  %v1792_v44 = vld [vmem:[%s7547_s5 + $0x168] sm:$0xff]  ;;  %v2100_v49 = vld [vmem:[%s7548_s6 + $0x170] sm:$0xff] }
 0x752   :  { %v6968_v43 = vpack.c.bf16 %v2100_v49, %v2097_v46 }
 0x754   :  { %5171 = vmatpush1.bf16.msra.mxu0 %v5170_v22  ;;  %5203 = vmatpush3.bf16.msra.mxu1 %v5200_v1  ;;  %v5190_v1 = vpack.c.bf16 %v1792_v44, %v1789_v39  ;;  %v2067_v22 = vld [vmem:[%s7548_s6 + $0x68] sm:$0xff]  ;;  %v2062_v39 = vld [vmem:[%s7548_s6 + $0x40] sm:$0xff]  ;;  %v2065_v44 = vld [vmem:[%s7548_s6 + $0x58] sm:$0xff] }
 0x755   :  { %5173 = vmatprep.subr.bf16.mxu0 %v5172_v23  ;;  %5205 = vmatprep.subr.bf16.mxu1 %v5204_v31  ;;  %v2070_v23 = vld [vmem:[%s7548_s6 + $0x80] sm:$0xff] }
 0x758   :  { %5175 = vmatpush1.bf16.msra.mxu0 %v5174_v56  ;;  %5207 = vmatpush3.bf16.msra.mxu1 %v5204_v31  ;;  %v6868_v31 = vpack.c.bf16 %v2070_v23, %v2067_v22  ;;  %v2072_v56 = vld [vmem:[%s7548_s6 + $0x90] sm:$0xff]  ;;  %v7016_v22 = vpack.c.bf16 %v2083_v15, %v2080_v13  ;;  %v2086_v23 = vld [vmem:[%s7548_s6 + $0x100] sm:$0xff] }
 0x759   :  { %5177 = vmatprep.subr.bf16.mxu0 %v5176_v61  ;;  %5209 = vmatprep.subr.bf16.mxu1 %v5208_v63  ;;  %v2075_v61 = vld [vmem:[%s7548_s6 + $0xa8] sm:$0xff]  ;;  %v7026_v40 = vpack.c.bf16 %v2089_v33, %v2086_v23 }
 0x75c   :  { %5179 = vmatpush1.bf16.msra.mxu0 %v5178_v26  ;;  %5211 = vmatpush3.bf16.msra.mxu1 %v5208_v63  ;;  %v6894_v63 = vpack.c.bf16 %v2075_v61, %v2072_v56  ;;  %v2085_v26 = vld [vmem:[%s7548_s6 + $0xf8] sm:$0xff]  ;;  %v7036_v56 = vpack.c.bf16 %v2095_v51, %v2092_v45  ;;  %v2098_v61 = vld [vmem:[%s7548_s6 + $0x160] sm:$0xff] }
 0x75d   :  { %5181 = vmatprep.subr.bf16.mxu0 %v5180_v29  ;;  %5213 = vmatprep.subr.bf16.mxu1 %v5212_v34  ;;  %v2088_v29 = vld [vmem:[%s7548_s6 + $0x110] sm:$0xff]  ;;  %v7046_v8 = vpack.c.bf16 %v2101_v2, %v2098_v61 }
 0x760   :  { %5183 = vmatpush1.bf16.msra.mxu0 %v5182_v59  ;;  %5215 = vmatpush3.bf16.msra.mxu1 %v5212_v34  ;;  %v6922_v34 = vpack.c.bf16 %v2088_v29, %v2085_v26  ;;  %v6942_v59 = vpack.c.bf16 %v2094_v27, %v2091_v24 }
 0x761   :  { %5185 = vmatprep.subr.bf16.mxu0 %v5184_v28  ;;  %5217 = vmatprep.subr.bf16.mxu1 %v5216_v30  ;;  %v2093_v28 = vld [vmem:[%s7548_s6 + $0x138] sm:$0xff] }
 0x762   :  { %v6954_v38 = vpack.c.bf16 %v2093_v28, %v2090_v7 }
 0x764   :  { %5187 = vmatpush1.bf16.msra.mxu0 %v5186_v57  ;;  %5219 = vmatpush3.bf16.msra.mxu1 %v5216_v30  ;;  %v2056_v30 = vld [vmem:[%s7548_s6 + $0x10] sm:$0xff] }
 0x765   :  { %5189 = vmatprep.subr.bf16.mxu0 %v5188_v12  ;;  %5221 = vmatprep.subr.bf16.mxu1 %v5220_v60  ;;  %v6956_v50 = vpack.c.bf16 %v2059_v47, %v2056_v30  ;;  %v2096_v57 = vld [vmem:[%s7548_s6 + $0x150] sm:$0xff]  ;;  %v2099_v12 = vld [vmem:[%s7548_s6 + $0x168] sm:$0xff]  ;;  %v5947_v47 = vld [vmem:[%s7546_s4] ss:$0 sm:$0xff] }
 0x768   :  { %5191 = vmatpush1.bf16.msra.mxu0 %v5190_v1  ;;  %5223 = vmatpush3.bf16.msra.mxu1 %v5220_v60  ;;  %v6976_v60 = vpack.c.bf16 %v2099_v12, %v2096_v57  ;;  %v6985_v1 = vpack.c.bf16 %v2065_v44, %v2062_v39 }
 0x769   :  { %5256 = vmatprep.subr.bf16.mxu1 %v5949_v48 }
 0x76b   :  { %1877 = vmatmul.mubr.f32.vlgmr.msra.gmra.mrb[16].mxu0 %v6393_v62  ;;  %4343 = vmatmul.mubr.f32.vlgmr.msra.gmra.mrb[24].mxu1 %v6437_v54  ;;  %v2055_v62 = vld [vmem:[%s7548_s6 + $0x8] sm:$0xff] }
 0x76c   :  { %4345 = vmatprep.mubr.f32.mxu1 %v6481_v41  ;;  %1882 = vmatprep.mubr.f32.mxu0 %v5948_v3 }
 0x76d   :  { %5258 = vmatpush3.bf16.msra.mxu1 %v6956_v50 }
 0x76e   :  { %5259 = vmatprep.subr.bf16.mxu1 %v5949_v48 }
 0x76f   :  { %1883 = vmatmul.mubr.f32.gmra.mrb[18].mxu0 %v6437_v54  ;;  %4346 = vmatmul.mubr.f32.gmra.mrb[26].mxu1 %v6525_v32  ;;  %v2058_v54 = vld [vmem:[%s7548_s6 + $0x20] sm:$0xff] }
 0x770   :  { %4348 = vmatprep.mubr.f32.mxu1 %v6569_v25  ;;  %1888 = vmatprep.mubr.f32.mxu0 %v5948_v3 }
 0x771   :  { %5261 = vmatpush3.bf16.msra.mxu1 %v6985_v1 }
 0x772   :  { %5262 = vmatprep.subr.bf16.mxu1 %v5949_v48 }
 0x773   :  { %1889 = vmatmul.mubr.f32.gmra.mrb[20].mxu0 %v6481_v41  ;;  %4349 = vmatmul.mubr.f32.gmra.mrb[28].mxu1 %v6613_v17  ;;  %v6832_v41 = vpack.c.bf16 %v2058_v54, %v2055_v62  ;;  %v2068_v62 = vld [vmem:[%s7548_s6 + $0x70] sm:$0xff]  ;;  %v2071_v54 = vld [vmem:[%s7548_s6 + $0x88] sm:$0xff] }
 0x774   :  { %4351 = vmatprep.mubr.f32.mxu1 %v6685_v35  ;;  %1894 = vmatprep.mubr.f32.mxu0 %v5948_v3 }
 0x775   :  { %5225 = vmatprep.subr.bf16.mxu0 %v6832_v41 }
 0x777   :  { %1895 = vmatmul.mubr.f32.gmra.mrb[22].mxu0 %v6525_v32  ;;  %v2054_v32 = vld [vmem:[%s7548_s6] sm:$0xff] }
 0x778   :  { %1900 = vmatprep.mubr.f32.mxu0 %v5948_v3 }
 0x77b   :  { %1901 = vmatmul.mubr.f32.gmra.mrb[24].mxu0 %v6569_v25  ;;  %v2057_v25 = vld [vmem:[%s7548_s6 + $0x18] sm:$0xff] }
 0x77c   :  { %1906 = vmatprep.mubr.f32.mxu0 %v5948_v3 }
 0x77f   :  { %1907 = vmatmul.mubr.f32.gmra.mrb[26].mxu0 %v6613_v17  ;;  %v6840_v17 = vpack.c.bf16 %v2057_v25, %v2054_v32  ;;  %v2074_v32 = vld [vmem:[%s7548_s6 + $0xa0] sm:$0xff]  ;;  %v7000_v25 = vpack.c.bf16 %v2071_v54, %v2068_v62 }
 0x780   :  { %1912 = vmatprep.mubr.f32.mxu0 %v5948_v3  ;;  %v7006_v6 = vpack.c.bf16 %v2077_v4, %v2074_v32 }
 0x781   :  { %5227 = vmatpush1.bf16.msra.mxu0 %v6840_v17  ;;  %5264 = vmatpush3.bf16.msra.mxu1 %v7000_v25 }
 0x782   :  { %5229 = vmatprep.subr.bf16.mxu0 %v6850_v9  ;;  %5265 = vmatprep.subr.bf16.mxu1 %v5949_v48 }
 0x783   :  { %1913 = vmatmul.mubr.f32.gmra.mrb[28].mxu0 %v6685_v35 }
 0x784   :  { %1918 = vmatprep.mubr.f32.mxu0 %v5948_v3 }
 0x785   :  { %5231 = vmatpush1.bf16.msra.mxu0 %v6858_v16  ;;  %5267 = vmatpush3.bf16.msra.mxu1 %v7006_v6 }
 0x786   :  { %5233 = vmatprep.subr.bf16.mxu0 %v6868_v31  ;;  %5268 = vmatprep.subr.bf16.mxu1 %v5949_v48 }
 0x789   :  { %5235 = vmatpush1.bf16.msra.mxu0 %v6876_v42  ;;  %5270 = vmatpush3.bf16.msra.mxu1 %v7016_v22 }
 0x78a   :  { %5237 = vmatprep.subr.bf16.mxu0 %v6886_v53  ;;  %5271 = vmatprep.subr.bf16.mxu1 %v5949_v48 }
 0x78d   :  { %5239 = vmatpush1.bf16.msra.mxu0 %v6894_v63  ;;  %5273 = vmatpush3.bf16.msra.mxu1 %v7026_v40 }
 0x78e   :  { %5241 = vmatprep.subr.bf16.mxu0 %v6904_v10  ;;  %5274 = vmatprep.subr.bf16.mxu1 %v5949_v48 }
 0x791   :  { %5243 = vmatpush1.bf16.msra.mxu0 %v6912_v21  ;;  %5276 = vmatpush3.bf16.msra.mxu1 %v7036_v56 }
 0x792   :  { %5245 = vmatprep.subr.bf16.mxu0 %v6922_v34  ;;  %5277 = vmatprep.subr.bf16.mxu1 %v5949_v48 }
 0x795   :  { %5247 = vmatpush1.bf16.msra.mxu0 %v6930_v20  ;;  %5279 = vmatpush3.bf16.msra.mxu1 %v7046_v8 }
 0x796   :  { %5249 = vmatprep.subr.bf16.mxu0 %v6942_v59  ;;  %5312 = vmatprep.subr.bf16.mxu1 %v5949_v48 }
 0x799   :  { %5251 = vmatpush1.bf16.msra.mxu0 %v6954_v38 }
 0x79a   :  { %5253 = vmatprep.subr.bf16.mxu0 %v6968_v43 }
 0x79d   :  { %5255 = vmatpush1.bf16.msra.mxu0 %v6976_v60 }
 0x79e   :  { %5281 = vmatprep.subr.bf16.mxu0 %v6832_v41 }
 0x81e   :  { %v1641_v14 = vpop.f32.mrb[14].mxu0  ;;  %v1712_v19 = vpop.f32.mrb[22].mxu1 }
 0x81f   :  { %v5734_v26 = vadd.f32 %v1641_v14, %v6372_v58  ;;  %v1643_v29 = vpop.f32.mrb[15].mxu0  ;;  %v4309_v55 = vpop.f32.mrb[23].mxu1  ;;  %v1716_v46 = vadd.f32 %v5947_v47, %v1712_v19 }
 0x820   :  { %v5735_v24 = vadd.f32 %v1643_v29, %v6384_v11 }
 0x821   :  { %v3653_v18 = vmul.f32 -1.442695, %v5734_v26 }
 0x822   :  { %v3654_v27 = vmul.f32 -1.442695, %v5735_v24 }
 0x823   :  { %5857 = vpow2.f32 %v3653_v18 }
 0x824   :  { %5859 = vpow2.f32 %v3654_v27 }
 0x82d   :  { %v5858_v7 = vpop.eup %5857 }
 0x82e   :  { %v1721_v28 = vadd.f32 1.0, %v5858_v7  ;;  %v5860_v30 = vpop.eup %5859 }
 0x82f   :  { %v1728_v12 = vadd.f32 1.0, %v5860_v30 }
 0x830   :  { %5861 = vrcp.f32 %v1721_v28 }
 0x83a   :  { %v5862_v49 = vpop.eup %5861 }
 0x83b   :  { %v1731_v57 = vmul.f32 %v5862_v49, %v1716_v46 }
 0x83d   :  { %v1732_v58 = vadd.f32 %v1731_v57, %v6376_v0 }
 0x83e   :  { %v7057_v39 = vpop.f32.mrb[24].mxu1 }
 0x83f   :  { %5863 = vtanh.f32 %v1732_v58  ;;  %v7059_v11 = vpop.f32.mrb[25].mxu1 }
 0x840   :  { %5865 = vrcp.f32 %v1728_v12 }
 0x842   :  { %v7061_v44 = vpop.f32.mrb[26].mxu1 }
 0x843   :  { %v7063_v62 = vpop.f32.mrb[27].mxu1 }
 0x846   :  { %v7065_v54 = vpop.f32.mrb[28].mxu1 }
 0x847   :  { %v7067_v32 = vpop.f32.mrb[29].mxu1 }
 0x849   :  { %v5864_v4 = vpop.eup %5863 }
 0x84a   :  { %v1734_v13 = vsub.f32 %v6685_v35, %v5864_v4  ;;  %v5866_v15 = vpop.eup %5865  ;;  %v1795_v35 = vld [vmem:[%s7549_s7] sm:$0x7] }
 0x84b   :  { %v7119_v51 = vrot.slane %v1795_v35, %v62_v52  ;;  %v7124_v55 = vrot.slane %v1795_v35, %v66_v5  ;;  %v7130_v52 = vld [vmem:[%s7550_s8] ss:$0 sm:$0xff]  ;;  %v7134_v28 = vrot.slane %v1795_v35, %v70_v37 }
 0x84c   :  { %v1735_v0 = vmul.f32 %v5866_v15, %v1734_v13 }
 0x84d   :  { %v1992_v46 = vadd.f32 %v7059_v11, %v7134_v28 }
 0x84e   :  { %v1736_v23 = vadd.f32 %v5864_v4, %v1735_v0 }
 0x850   :  { %1919 = vmatmul.mubr.f32.gmra.mrb[30].mxu0 %v1736_v23  ;;  %4352 = vmatmul.mubr.f32.gmra.mrb[30].mxu1 %v1736_v23 }
 0x851   :  { %2170 = vmatprep.mubr.f32.mxu0 %v5948_v3  ;;  %4386 = vmatprep.mubr.msk.f32.mxu1 %vm5950_vm1, %v5948_v3 }
 0x854   :  { %2171 = vmatmul.mubr.f32.vlgmr.msra.gmra.mrb[16].mxu0 %v5948_v3  ;;  %4387 = vmatmul.mubr.f32.vlgmr.msra.gmra.mrb[32].mxu1 %v5948_v3 }
 0x855   :  { %5283 = vmatpush1.bf16.msra.mxu0 %v6840_v17  ;;  %5314 = vmatpush3.bf16.msra.mxu1 %v6956_v50 }
 0x856   :  { %5285 = vmatprep.subr.bf16.mxu0 %v6850_v9  ;;  %5315 = vmatprep.subr.bf16.mxu1 %v5949_v48 }
 0x857   :  { %2341 = vmatprep.mubr.f32.mxu0 %v5948_v3  ;;  %4421 = vmatprep.mubr.msk.f32.mxu1 %vm5950_vm1, %v5948_v3 }
 0x859   :  { %5287 = vmatpush1.bf16.msra.mxu0 %v6858_v16  ;;  %5317 = vmatpush3.bf16.msra.mxu1 %v6985_v1 }
 0x85a   :  { %5289 = vmatprep.subr.bf16.mxu0 %v6868_v31  ;;  %5318 = vmatprep.subr.bf16.mxu1 %v5949_v48 }
 0x85d   :  { %5291 = vmatpush1.bf16.msra.mxu0 %v6876_v42  ;;  %5320 = vmatpush3.bf16.msra.mxu1 %v7000_v25 }
 0x85e   :  { %5293 = vmatprep.subr.bf16.mxu0 %v6886_v53  ;;  %5321 = vmatprep.subr.bf16.mxu1 %v5949_v48 }
 0x861   :  { %5295 = vmatpush1.bf16.msra.mxu0 %v6894_v63  ;;  %5323 = vmatpush3.bf16.msra.mxu1 %v7006_v6 }
 0x862   :  { %5297 = vmatprep.subr.bf16.mxu0 %v6904_v10  ;;  %5324 = vmatprep.subr.bf16.mxu1 %v5949_v48 }
 0x865   :  { %5299 = vmatpush1.bf16.msra.mxu0 %v6912_v21  ;;  %5326 = vmatpush3.bf16.msra.mxu1 %v7016_v22 }
 0x866   :  { %5301 = vmatprep.subr.bf16.mxu0 %v6922_v34  ;;  %5327 = vmatprep.subr.bf16.mxu1 %v5949_v48 }
 0x869   :  { %5303 = vmatpush1.bf16.msra.mxu0 %v6930_v20  ;;  %5329 = vmatpush3.bf16.msra.mxu1 %v7026_v40 }
 0x86a   :  { %5305 = vmatprep.subr.bf16.mxu0 %v6942_v59  ;;  %5330 = vmatprep.subr.bf16.mxu1 %v5949_v48 }
 0x86d   :  { %5307 = vmatpush1.bf16.msra.mxu0 %v6954_v38  ;;  %5332 = vmatpush3.bf16.msra.mxu1 %v7036_v56 }
 0x86e   :  { %5309 = vmatprep.subr.bf16.mxu0 %v6968_v43  ;;  %5333 = vmatprep.subr.bf16.mxu1 %v5949_v48 }
 0x871   :  { %5311 = vmatpush1.bf16.msra.mxu0 %v6976_v60  ;;  %5335 = vmatpush3.bf16.msra.mxu1 %v7046_v8 }
 0x872   :  { %5337 = vmatprep.subr.bf16.mxu0 %v6832_v41  ;;  %5368 = vmatprep.subr.bf16.mxu1 %v5949_v48 }
 0x923   :  { %v7113_v33 = vpop.f32.mrb[30].mxu1 }
 0x924   :  { %v7115_v45 = vpop.f32.mrb[31].mxu1 }
 0x927   :  { %v2172_v61 = vpop.f32.mrb[16].mxu0  ;;  %v2243_v2 = vpop.f32.mrb[32].mxu1 }
 0x928   :  { %v5736_v14 = vadd.f32 %v2172_v61, %v7119_v51  ;;  %v2174_v19 = vpop.f32.mrb[17].mxu0  ;;  %v4388_v26 = vpop.f32.mrb[33].mxu1  ;;  %v2253_v30 = vadd.f32 %v7130_v52, %v2243_v2 }
 0x929   :  { %v5737_v18 = vadd.f32 %v2174_v19, %v7124_v55 }
 0x92a   :  { %v3656_v29 = vmul.f32 -1.442695, %v5736_v14 }
 0x92b   :  { %v3657_v24 = vmul.f32 -1.442695, %v5737_v18 }
 0x92c   :  { %5867 = vpow2.f32 %v3656_v29 }
 0x92d   :  { %5869 = vpow2.f32 %v3657_v24 }
 0x936   :  { %v5868_v27 = vpop.eup %5867 }
 0x937   :  { %v2258_v7 = vadd.f32 1.0, %v5868_v27  ;;  %v5870_v5 = vpop.eup %5869  ;;  %v1997_v27 = vadd.f32 %v7057_v39, %v7134_v28 }
 0x938   :  { %v2265_v57 = vadd.f32 1.0, %v5870_v5 }
 0x939   :  { %5871 = vrcp.f32 %v2258_v7 }
 0x943   :  { %v5872_v47 = vpop.eup %5871 }
 0x944   :  { %v2268_v49 = vmul.f32 %v5872_v47, %v2253_v30 }
 0x946   :  { %v2269_v58 = vadd.f32 %v2268_v49, %v1992_v46 }
 0x948   :  { %5873 = vtanh.f32 %v2269_v58 }
 0x949   :  { %5875 = vrcp.f32 %v2265_v57 }
 0x952   :  { %v5874_v12 = vpop.eup %5873 }
 0x953   :  { %v2271_v4 = vsub.f32 0.0, %v5874_v12  ;;  %v5876_v13 = vpop.eup %5875 }
 0x955   :  { %v2272_v15 = vmul.f32 %v5876_v13, %v2271_v4 }
 0x957   :  { %v7139_v0 = vadd.f32 %v5874_v12, %v2272_v15 }
 0x959   :  { %2342 = vmatmul.mubr.f32.vlgmr.msra.gmra.mrb[18].mxu0 %v7139_v0  ;;  %4422 = vmatmul.mubr.f32.vlgmr.msra.gmra.mrb[34].mxu1 %v7139_v0 }
 0x95a   :  { %5339 = vmatpush1.bf16.msra.mxu0 %v6840_v17  ;;  %5370 = vmatpush3.bf16.msra.mxu1 %v6956_v50 }
 0x95b   :  { %5341 = vmatprep.subr.bf16.mxu0 %v6850_v9  ;;  %5371 = vmatprep.subr.bf16.mxu1 %v5949_v48 }
 0x95c   :  { %2506 = vmatprep.mubr.f32.mxu0 %v5948_v3  ;;  %4456 = vmatprep.mubr.msk.f32.mxu1 %vm5950_vm1, %v5948_v3 }
 0x95e   :  { %5343 = vmatpush1.bf16.msra.mxu0 %v6858_v16  ;;  %5373 = vmatpush3.bf16.msra.mxu1 %v6985_v1 }
 0x95f   :  { %5345 = vmatprep.subr.bf16.mxu0 %v6868_v31  ;;  %5374 = vmatprep.subr.bf16.mxu1 %v5949_v48 }
 0x962   :  { %5347 = vmatpush1.bf16.msra.mxu0 %v6876_v42  ;;  %5376 = vmatpush3.bf16.msra.mxu1 %v7000_v25 }
 0x963   :  { %5349 = vmatprep.subr.bf16.mxu0 %v6886_v53  ;;  %5377 = vmatprep.subr.bf16.mxu1 %v5949_v48 }
 0x966   :  { %5351 = vmatpush1.bf16.msra.mxu0 %v6894_v63  ;;  %5379 = vmatpush3.bf16.msra.mxu1 %v7006_v6 }
 0x967   :  { %5353 = vmatprep.subr.bf16.mxu0 %v6904_v10  ;;  %5380 = vmatprep.subr.bf16.mxu1 %v5949_v48 }
 0x96a   :  { %5355 = vmatpush1.bf16.msra.mxu0 %v6912_v21  ;;  %5382 = vmatpush3.bf16.msra.mxu1 %v7016_v22 }
 0x96b   :  { %5357 = vmatprep.subr.bf16.mxu0 %v6922_v34  ;;  %5383 = vmatprep.subr.bf16.mxu1 %v5949_v48 }
 0x96e   :  { %5359 = vmatpush1.bf16.msra.mxu0 %v6930_v20  ;;  %5385 = vmatpush3.bf16.msra.mxu1 %v7026_v40 }
 0x96f   :  { %5361 = vmatprep.subr.bf16.mxu0 %v6942_v59  ;;  %5386 = vmatprep.subr.bf16.mxu1 %v5949_v48 }
 0x972   :  { %5363 = vmatpush1.bf16.msra.mxu0 %v6954_v38  ;;  %5388 = vmatpush3.bf16.msra.mxu1 %v7036_v56 }
 0x973   :  { %5365 = vmatprep.subr.bf16.mxu0 %v6968_v43  ;;  %5389 = vmatprep.subr.bf16.mxu1 %v5949_v48 }
 0x976   :  { %5367 = vmatpush1.bf16.msra.mxu0 %v6976_v60  ;;  %5391 = vmatpush3.bf16.msra.mxu1 %v7046_v8 }
 0x977   :  { %5393 = vmatprep.subr.bf16.mxu0 %v6832_v41  ;;  %5424 = vmatprep.subr.bf16.mxu1 %v5949_v48 }
 0xa2c   :  { %v2343_v36 = vpop.f32.mrb[18].mxu0  ;;  %v2414_v37 = vpop.f32.mrb[34].mxu1 }
 0xa2d   :  { %v5738_v11 = vadd.f32 %v2343_v36, %v7119_v51  ;;  %v2345_v23 = vpop.f32.mrb[19].mxu0  ;;  %v4423_v35 = vpop.f32.mrb[35].mxu1  ;;  %v2418_v18 = vadd.f32 %v7130_v52, %v2414_v37 }
 0xa2e   :  { %v5739_v2 = vadd.f32 %v2345_v23, %v7124_v55 }
 0xa2f   :  { %v3658_v61 = vmul.f32 -1.442695, %v5738_v11 }
 0xa30   :  { %v3659_v14 = vmul.f32 -1.442695, %v5739_v2 }
 0xa31   :  { %5877 = vpow2.f32 %v3658_v61 }
 0xa32   :  { %5879 = vpow2.f32 %v3659_v14  ;;  %v2002_v14 = vadd.f32 %v7063_v62, %v7134_v28 }
 0xa3b   :  { %v5878_v19 = vpop.eup %5877 }
 0xa3c   :  { %v2423_v26 = vadd.f32 1.0, %v5878_v19  ;;  %v5880_v29 = vpop.eup %5879 }
 0xa3d   :  { %v2430_v5 = vadd.f32 1.0, %v5880_v29 }
 0xa3e   :  { %5881 = vrcp.f32 %v2423_v26 }
 0xa48   :  { %v5882_v24 = vpop.eup %5881 }
 0xa49   :  { %v2433_v7 = vmul.f32 %v5882_v24, %v2418_v18 }
 0xa4b   :  { %v2434_v30 = vadd.f32 %v2433_v7, %v1997_v27 }
 0xa4d   :  { %5883 = vtanh.f32 %v2434_v30 }
 0xa4e   :  { %5885 = vrcp.f32 %v2430_v5 }
 0xa57   :  { %v5884_v47 = vpop.eup %5883 }
 0xa58   :  { %v2436_v46 = vsub.f32 %v7139_v0, %v5884_v47  ;;  %v5886_v49 = vpop.eup %5885 }
 0xa5a   :  { %v2437_v57 = vmul.f32 %v5886_v49, %v2436_v46 }
 0xa5c   :  { %v7184_v58 = vadd.f32 %v5884_v47, %v2437_v57 }
 0xa5e   :  { %2507 = vmatmul.mubr.f32.vlgmr.msra.gmra.mrb[20].mxu0 %v7184_v58  ;;  %4457 = vmatmul.mubr.f32.vlgmr.msra.gmra.mrb[36].mxu1 %v7184_v58 }
 0xa5f   :  { %5395 = vmatpush1.bf16.msra.mxu0 %v6840_v17  ;;  %5426 = vmatpush3.bf16.msra.mxu1 %v6956_v50 }
 0xa60   :  { %5397 = vmatprep.subr.bf16.mxu0 %v6850_v9  ;;  %5427 = vmatprep.subr.bf16.mxu1 %v5949_v48 }
 0xa61   :  { %2671 = vmatprep.mubr.f32.mxu0 %v5948_v3  ;;  %4491 = vmatprep.mubr.msk.f32.mxu1 %vm5950_vm1, %v5948_v3 }
 0xa63   :  { %5399 = vmatpush1.bf16.msra.mxu0 %v6858_v16  ;;  %5429 = vmatpush3.bf16.msra.mxu1 %v6985_v1 }
 0xa64   :  { %5401 = vmatprep.subr.bf16.mxu0 %v6868_v31  ;;  %5430 = vmatprep.subr.bf16.mxu1 %v5949_v48 }
 0xa67   :  { %5403 = vmatpush1.bf16.msra.mxu0 %v6876_v42  ;;  %5432 = vmatpush3.bf16.msra.mxu1 %v7000_v25 }
 0xa68   :  { %5405 = vmatprep.subr.bf16.mxu0 %v6886_v53  ;;  %5433 = vmatprep.subr.bf16.mxu1 %v5949_v48 }
 0xa6b   :  { %5407 = vmatpush1.bf16.msra.mxu0 %v6894_v63  ;;  %5435 = vmatpush3.bf16.msra.mxu1 %v7006_v6 }
 0xa6c   :  { %5409 = vmatprep.subr.bf16.mxu0 %v6904_v10  ;;  %5436 = vmatprep.subr.bf16.mxu1 %v5949_v48 }
 0xa6f   :  { %5411 = vmatpush1.bf16.msra.mxu0 %v6912_v21  ;;  %5438 = vmatpush3.bf16.msra.mxu1 %v7016_v22 }
 0xa70   :  { %5413 = vmatprep.subr.bf16.mxu0 %v6922_v34  ;;  %5439 = vmatprep.subr.bf16.mxu1 %v5949_v48 }
 0xa73   :  { %5415 = vmatpush1.bf16.msra.mxu0 %v6930_v20  ;;  %5441 = vmatpush3.bf16.msra.mxu1 %v7026_v40 }
 0xa74   :  { %5417 = vmatprep.subr.bf16.mxu0 %v6942_v59  ;;  %5442 = vmatprep.subr.bf16.mxu1 %v5949_v48 }
 0xa77   :  { %5419 = vmatpush1.bf16.msra.mxu0 %v6954_v38  ;;  %5444 = vmatpush3.bf16.msra.mxu1 %v7036_v56 }
 0xa78   :  { %5421 = vmatprep.subr.bf16.mxu0 %v6968_v43  ;;  %5445 = vmatprep.subr.bf16.mxu1 %v5949_v48 }
 0xa7b   :  { %5423 = vmatpush1.bf16.msra.mxu0 %v6976_v60  ;;  %5447 = vmatpush3.bf16.msra.mxu1 %v7046_v8 }
 0xa7c   :  { %5449 = vmatprep.subr.bf16.mxu0 %v6832_v41  ;;  %5480 = vmatprep.subr.bf16.mxu1 %v5949_v48 }
 0xb31   :  { %v2508_v39 = vpop.f32.mrb[20].mxu0  ;;  %v2579_v12 = vpop.f32.mrb[36].mxu1 }
 0xb32   :  { %v5740_v4 = vadd.f32 %v2508_v39, %v7119_v51  ;;  %v2510_v13 = vpop.f32.mrb[21].mxu0  ;;  %v4458_v15 = vpop.f32.mrb[37].mxu1  ;;  %v2583_v61 = vadd.f32 %v7130_v52, %v2579_v12 }
 0xb33   :  { %v5741_v36 = vadd.f32 %v2510_v13, %v7124_v55 }
 0xb34   :  { %v3660_v0 = vmul.f32 -1.442695, %v5740_v4 }
 0xb35   :  { %v3661_v37 = vmul.f32 -1.442695, %v5741_v36  ;;  %v2007_v36 = vadd.f32 %v7061_v44, %v7134_v28 }
 0xb36   :  { %5887 = vpow2.f32 %v3660_v0 }
 0xb37   :  { %5889 = vpow2.f32 %v3661_v37 }
 0xb40   :  { %v5888_v11 = vpop.eup %5887 }
 0xb41   :  { %v2588_v23 = vadd.f32 1.0, %v5888_v11  ;;  %v5890_v35 = vpop.eup %5889 }
 0xb42   :  { %v2595_v29 = vadd.f32 1.0, %v5890_v35 }
 0xb43   :  { %5891 = vrcp.f32 %v2588_v23 }
 0xb4d   :  { %v5892_v2 = vpop.eup %5891 }
 0xb4e   :  { %v2598_v19 = vmul.f32 %v5892_v2, %v2583_v61 }
 0xb50   :  { %v2599_v26 = vadd.f32 %v2598_v19, %v2002_v14 }
 0xb52   :  { %5893 = vtanh.f32 %v2599_v26 }
 0xb53   :  { %5895 = vrcp.f32 %v2595_v29 }
 0xb5c   :  { %v5894_v18 = vpop.eup %5893 }
 0xb5d   :  { %v2601_v24 = vsub.f32 %v7184_v58, %v5894_v18  ;;  %v5896_v27 = vpop.eup %5895 }
 0xb5f   :  { %v2602_v7 = vmul.f32 %v5896_v27, %v2601_v24 }
 0xb61   :  { %v7229_v30 = vadd.f32 %v5894_v18, %v2602_v7 }
 0xb63   :  { %2672 = vmatmul.mubr.f32.vlgmr.msra.gmra.mrb[22].mxu0 %v7229_v30  ;;  %4492 = vmatmul.mubr.f32.vlgmr.msra.gmra.mrb[38].mxu1 %v7229_v30 }
 0xb64   :  { %5451 = vmatpush1.bf16.msra.mxu0 %v6840_v17  ;;  %5482 = vmatpush3.bf16.msra.mxu1 %v6956_v50 }
 0xb65   :  { %5453 = vmatprep.subr.bf16.mxu0 %v6850_v9  ;;  %5483 = vmatprep.subr.bf16.mxu1 %v5949_v48 }
 0xb66   :  { %2836 = vmatprep.mubr.f32.mxu0 %v5948_v3  ;;  %4526 = vmatprep.mubr.msk.f32.mxu1 %vm5950_vm1, %v5948_v3 }
 0xb68   :  { %5455 = vmatpush1.bf16.msra.mxu0 %v6858_v16  ;;  %5485 = vmatpush3.bf16.msra.mxu1 %v6985_v1 }
 0xb69   :  { %5457 = vmatprep.subr.bf16.mxu0 %v6868_v31  ;;  %5486 = vmatprep.subr.bf16.mxu1 %v5949_v48 }
 0xb6c   :  { %5459 = vmatpush1.bf16.msra.mxu0 %v6876_v42  ;;  %5488 = vmatpush3.bf16.msra.mxu1 %v7000_v25 }
 0xb6d   :  { %5461 = vmatprep.subr.bf16.mxu0 %v6886_v53  ;;  %5489 = vmatprep.subr.bf16.mxu1 %v5949_v48 }
 0xb70   :  { %5463 = vmatpush1.bf16.msra.mxu0 %v6894_v63  ;;  %5491 = vmatpush3.bf16.msra.mxu1 %v7006_v6 }
 0xb71   :  { %5465 = vmatprep.subr.bf16.mxu0 %v6904_v10  ;;  %5492 = vmatprep.subr.bf16.mxu1 %v5949_v48 }
 0xb74   :  { %5467 = vmatpush1.bf16.msra.mxu0 %v6912_v21  ;;  %5494 = vmatpush3.bf16.msra.mxu1 %v7016_v22 }
 0xb75   :  { %5469 = vmatprep.subr.bf16.mxu0 %v6922_v34  ;;  %5495 = vmatprep.subr.bf16.mxu1 %v5949_v48 }
 0xb78   :  { %5471 = vmatpush1.bf16.msra.mxu0 %v6930_v20  ;;  %5497 = vmatpush3.bf16.msra.mxu1 %v7026_v40 }
 0xb79   :  { %5473 = vmatprep.subr.bf16.mxu0 %v6942_v59  ;;  %5498 = vmatprep.subr.bf16.mxu1 %v5949_v48 }
 0xb7c   :  { %5475 = vmatpush1.bf16.msra.mxu0 %v6954_v38  ;;  %5500 = vmatpush3.bf16.msra.mxu1 %v7036_v56 }
 0xb7d   :  { %5477 = vmatprep.subr.bf16.mxu0 %v6968_v43  ;;  %5501 = vmatprep.subr.bf16.mxu1 %v5949_v48 }
 0xb80   :  { %5479 = vmatpush1.bf16.msra.mxu0 %v6976_v60  ;;  %5503 = vmatpush3.bf16.msra.mxu1 %v7046_v8 }
 0xb81   :  { %5505 = vmatprep.subr.bf16.mxu0 %v6832_v41  ;;  %5536 = vmatprep.subr.bf16.mxu1 %v5949_v48 }
 0xc36   :  { %v2673_v62 = vpop.f32.mrb[22].mxu0  ;;  %v2744_v5 = vpop.f32.mrb[38].mxu1 }
 0xc37   :  { %v5742_v47 = vadd.f32 %v2673_v62, %v7119_v51  ;;  %v2675_v46 = vpop.f32.mrb[23].mxu0  ;;  %v4493_v49 = vpop.f32.mrb[39].mxu1  ;;  %v2748_v15 = vadd.f32 %v7130_v52, %v2744_v5 }
 0xc38   :  { %v5743_v58 = vadd.f32 %v2675_v46, %v7124_v55 }
 0xc39   :  { %v3662_v57 = vmul.f32 -1.442695, %v5742_v47 }
 0xc3a   :  { %v3663_v39 = vmul.f32 -1.442695, %v5743_v58 }
 0xc3b   :  { %5897 = vpow2.f32 %v3662_v57  ;;  %v2012_v57 = vadd.f32 %v7067_v32, %v7134_v28 }
 0xc3c   :  { %5899 = vpow2.f32 %v3663_v39 }
 0xc45   :  { %v5898_v12 = vpop.eup %5897 }
 0xc46   :  { %v2753_v4 = vadd.f32 1.0, %v5898_v12  ;;  %v5900_v13 = vpop.eup %5899 }
 0xc47   :  { %v2760_v23 = vadd.f32 1.0, %v5900_v13 }
 0xc48   :  { %5901 = vrcp.f32 %v2753_v4 }
 0xc52   :  { %v5902_v0 = vpop.eup %5901 }
 0xc53   :  { %v2763_v37 = vmul.f32 %v5902_v0, %v2748_v15 }
 0xc55   :  { %v2764_v11 = vadd.f32 %v2763_v37, %v2007_v36 }
 0xc57   :  { %5903 = vtanh.f32 %v2764_v11 }
 0xc58   :  { %5905 = vrcp.f32 %v2760_v23 }
 0xc61   :  { %v5904_v35 = vpop.eup %5903 }
 0xc62   :  { %v2766_v61 = vsub.f32 %v7229_v30, %v5904_v35  ;;  %v5906_v2 = vpop.eup %5905 }
 0xc64   :  { %v2767_v14 = vmul.f32 %v5906_v2, %v2766_v61 }
 0xc66   :  { %v7274_v19 = vadd.f32 %v5904_v35, %v2767_v14 }
 0xc68   :  { %2837 = vmatmul.mubr.f32.vlgmr.msra.gmra.mrb[24].mxu0 %v7274_v19  ;;  %4527 = vmatmul.mubr.f32.vlgmr.msra.gmra.mrb[40].mxu1 %v7274_v19 }
 0xc69   :  { %5507 = vmatpush1.bf16.msra.mxu0 %v6840_v17  ;;  %5538 = vmatpush3.bf16.msra.mxu1 %v6956_v50 }
 0xc6a   :  { %5509 = vmatprep.subr.bf16.mxu0 %v6850_v9  ;;  %5539 = vmatprep.subr.bf16.mxu1 %v5949_v48 }
 0xc6b   :  { %3001 = vmatprep.mubr.f32.mxu0 %v5948_v3  ;;  %4561 = vmatprep.mubr.msk.f32.mxu1 %vm5950_vm1, %v5948_v3 }
 0xc6d   :  { %5511 = vmatpush1.bf16.msra.mxu0 %v6858_v16  ;;  %5541 = vmatpush3.bf16.msra.mxu1 %v6985_v1 }
 0xc6e   :  { %5513 = vmatprep.subr.bf16.mxu0 %v6868_v31  ;;  %5542 = vmatprep.subr.bf16.mxu1 %v5949_v48 }
 0xc71   :  { %5515 = vmatpush1.bf16.msra.mxu0 %v6876_v42  ;;  %5544 = vmatpush3.bf16.msra.mxu1 %v7000_v25 }
 0xc72   :  { %5517 = vmatprep.subr.bf16.mxu0 %v6886_v53  ;;  %5545 = vmatprep.subr.bf16.mxu1 %v5949_v48 }
 0xc75   :  { %5519 = vmatpush1.bf16.msra.mxu0 %v6894_v63  ;;  %5547 = vmatpush3.bf16.msra.mxu1 %v7006_v6 }
 0xc76   :  { %5521 = vmatprep.subr.bf16.mxu0 %v6904_v10  ;;  %5548 = vmatprep.subr.bf16.mxu1 %v5949_v48 }
 0xc79   :  { %5523 = vmatpush1.bf16.msra.mxu0 %v6912_v21  ;;  %5550 = vmatpush3.bf16.msra.mxu1 %v7016_v22 }
 0xc7a   :  { %5525 = vmatprep.subr.bf16.mxu0 %v6922_v34  ;;  %5551 = vmatprep.subr.bf16.mxu1 %v5949_v48 }
 0xc7d   :  { %5527 = vmatpush1.bf16.msra.mxu0 %v6930_v20  ;;  %5553 = vmatpush3.bf16.msra.mxu1 %v7026_v40 }
 0xc7e   :  { %5529 = vmatprep.subr.bf16.mxu0 %v6942_v59  ;;  %5554 = vmatprep.subr.bf16.mxu1 %v5949_v48 }
 0xc81   :  { %5531 = vmatpush1.bf16.msra.mxu0 %v6954_v38  ;;  %5556 = vmatpush3.bf16.msra.mxu1 %v7036_v56 }
 0xc82   :  { %5533 = vmatprep.subr.bf16.mxu0 %v6968_v43  ;;  %5557 = vmatprep.subr.bf16.mxu1 %v5949_v48 }
 0xc85   :  { %5535 = vmatpush1.bf16.msra.mxu0 %v6976_v60  ;;  %5559 = vmatpush3.bf16.msra.mxu1 %v7046_v8 }
 0xc86   :  { %5561 = vmatprep.subr.bf16.mxu0 %v6832_v41  ;;  %5592 = vmatprep.subr.bf16.mxu1 %v5949_v48 }
 0xd3b   :  { %v2838_v44 = vpop.f32.mrb[24].mxu0  ;;  %v2909_v26 = vpop.f32.mrb[40].mxu1 }
 0xd3c   :  { %v5744_v29 = vadd.f32 %v2838_v44, %v7119_v51  ;;  %v2840_v18 = vpop.f32.mrb[25].mxu0  ;;  %v4528_v24 = vpop.f32.mrb[41].mxu1  ;;  %v2913_v46 = vadd.f32 %v7130_v52, %v2909_v26 }
 0xd3d   :  { %v5745_v7 = vadd.f32 %v2840_v18, %v7124_v55  ;;  %v2017_v18 = vadd.f32 %v7065_v54, %v7134_v28  ;;  %v3431_v54 = vld [vmem:[%s7551_s9 + $0x8] sm:$0xff] }
 0xd3e   :  { %v3664_v27 = vmul.f32 -1.442695, %v5744_v29 }
 0xd3f   :  { %v3665_v30 = vmul.f32 -1.442695, %v5745_v7 }
 0xd40   :  { %5907 = vpow2.f32 %v3664_v27 }
 0xd41   :  { %5909 = vpow2.f32 %v3665_v30 }
 0xd4a   :  { %v5908_v62 = vpop.eup %5907 }
 0xd4b   :  { %v2918_v5 = vadd.f32 1.0, %v5908_v62  ;;  %v5910_v47 = vpop.eup %5909 }
 0xd4c   :  { %v2925_v12 = vadd.f32 1.0, %v5910_v47 }
 0xd4d   :  { %5911 = vrcp.f32 %v2918_v5 }
 0xd57   :  { %v5912_v49 = vpop.eup %5911 }
 0xd58   :  { %v2928_v58 = vmul.f32 %v5912_v49, %v2913_v46  ;;  %v3432_v49 = vld [vmem:[%s7551_s9 + $0x10] sm:$0xff] }
 0xd5a   :  { %v2929_v39 = vadd.f32 %v2928_v58, %v2012_v57  ;;  %v3434_v58 = vld [vmem:[%s7551_s9 + $0x20] sm:$0xff] }
 0xd5c   :  { %5913 = vtanh.f32 %v2929_v39  ;;  %v3435_v39 = vld [vmem:[%s7551_s9 + $0x28] sm:$0xff] }
 0xd5d   :  { %5915 = vrcp.f32 %v2925_v12  ;;  %v5679_v12 = vpack.c.bf16 %v3435_v39, %v3434_v58 }
 0xd66   :  { %v5914_v4 = vpop.eup %5913 }
 0xd67   :  { %v2931_v13 = vsub.f32 %v7274_v19, %v5914_v4  ;;  %v5916_v15 = vpop.eup %5915 }
 0xd69   :  { %v2932_v0 = vmul.f32 %v5916_v15, %v2931_v13  ;;  %v3437_v13 = vld [vmem:[%s7551_s9 + $0x38] sm:$0xff] }
 0xd6b   :  { %v7319_v36 = vadd.f32 %v5914_v4, %v2932_v0  ;;  %v3436_v4 = vld [vmem:[%s7551_s9 + $0x30] sm:$0xff]  ;;  %v3438_v0 = vld [vmem:[%s7551_s9 + $0x40] sm:$0xff] }
 0xd6c   :  { %v5682_v15 = vpack.c.bf16 %v3437_v13, %v3436_v4 }
 0xd6d   :  { %3002 = vmatmul.mubr.f32.vlgmr.msra.gmra.mrb[26].mxu0 %v7319_v36  ;;  %4562 = vmatmul.mubr.f32.vlgmr.msra.gmra.mrb[42].mxu1 %v7319_v36 }
 0xd6e   :  { %5563 = vmatpush1.bf16.msra.mxu0 %v6840_v17  ;;  %5594 = vmatpush3.bf16.msra.mxu1 %v6956_v50 }
 0xd6f   :  { %5565 = vmatprep.subr.bf16.mxu0 %v6850_v9  ;;  %5595 = vmatprep.subr.bf16.mxu1 %v5949_v48 }
 0xd70   :  { %3166 = vmatprep.mubr.f32.mxu0 %v5948_v3  ;;  %4596 = vmatprep.mubr.msk.f32.mxu1 %vm5950_vm1, %v5948_v3 }
 0xd72   :  { %5567 = vmatpush1.bf16.msra.mxu0 %v6858_v16  ;;  %5597 = vmatpush3.bf16.msra.mxu1 %v6985_v1 }
 0xd73   :  { %5569 = vmatprep.subr.bf16.mxu0 %v6868_v31  ;;  %5598 = vmatprep.subr.bf16.mxu1 %v5949_v48 }
 0xd76   :  { %5571 = vmatpush1.bf16.msra.mxu0 %v6876_v42  ;;  %5600 = vmatpush3.bf16.msra.mxu1 %v7000_v25 }
 0xd77   :  { %5573 = vmatprep.subr.bf16.mxu0 %v6886_v53  ;;  %5601 = vmatprep.subr.bf16.mxu1 %v5949_v48 }
 0xd7a   :  { %5575 = vmatpush1.bf16.msra.mxu0 %v6894_v63  ;;  %5603 = vmatpush3.bf16.msra.mxu1 %v7006_v6 }
 0xd7b   :  { %5577 = vmatprep.subr.bf16.mxu0 %v6904_v10  ;;  %5604 = vmatprep.subr.bf16.mxu1 %v5949_v48 }
 0xd7e   :  { %5579 = vmatpush1.bf16.msra.mxu0 %v6912_v21  ;;  %5606 = vmatpush3.bf16.msra.mxu1 %v7016_v22 }
 0xd7f   :  { %5581 = vmatprep.subr.bf16.mxu0 %v6922_v34  ;;  %5607 = vmatprep.subr.bf16.mxu1 %v5949_v48 }
 0xd82   :  { %5583 = vmatpush1.bf16.msra.mxu0 %v6930_v20  ;;  %5609 = vmatpush3.bf16.msra.mxu1 %v7026_v40 }
 0xd83   :  { %5585 = vmatprep.subr.bf16.mxu0 %v6942_v59  ;;  %5610 = vmatprep.subr.bf16.mxu1 %v5949_v48 }
 0xd86   :  { %5587 = vmatpush1.bf16.msra.mxu0 %v6954_v38  ;;  %5612 = vmatpush3.bf16.msra.mxu1 %v7036_v56 }
 0xd87   :  { %5589 = vmatprep.subr.bf16.mxu0 %v6968_v43  ;;  %5613 = vmatprep.subr.bf16.mxu1 %v5949_v48 }
 0xd8a   :  { %5591 = vmatpush1.bf16.msra.mxu0 %v6976_v60  ;;  %5615 = vmatpush3.bf16.msra.mxu1 %v7046_v8 }
 0xd8b   :  { %5617 = vmatprep.subr.bf16.mxu0 %v6832_v41  ;;  %5648 = vmatprep.subr.bf16.mxu1 %v5949_v48 }
 0xe40   :  { %v3003_v32 = vpop.f32.mrb[26].mxu0  ;;  %v3074_v37 = vpop.f32.mrb[42].mxu1 }
 0xe41   :  { %v5746_v11 = vadd.f32 %v3003_v32, %v7119_v51  ;;  %v3005_v23 = vpop.f32.mrb[27].mxu0  ;;  %v4563_v35 = vpop.f32.mrb[43].mxu1  ;;  %v3078_v41 = vadd.f32 %v7130_v52, %v3074_v37  ;;  %v3440_v37 = vld [vmem:[%s7551_s9 + $0x50] sm:$0xff] }
 0xe42   :  { %v5747_v2 = vadd.f32 %v3005_v23, %v7124_v55  ;;  %v3442_v35 = vld [vmem:[%s7551_s9 + $0x60] sm:$0xff] }
 0xe43   :  { %v3666_v61 = vmul.f32 -1.442695, %v5746_v11  ;;  %v3441_v11 = vld [vmem:[%s7551_s9 + $0x58] sm:$0xff] }
 0xe44   :  { %v3667_v14 = vmul.f32 -1.442695, %v5747_v2  ;;  %v5688_v23 = vpack.c.bf16 %v3441_v11, %v3440_v37 }
 0xe45   :  { %5917 = vpow2.f32 %v3666_v61  ;;  %v3443_v61 = vld [vmem:[%s7551_s9 + $0x68] sm:$0xff] }
 0xe46   :  { %5919 = vpow2.f32 %v3667_v14  ;;  %v5691_v2 = vpack.c.bf16 %v3443_v61, %v3442_v35  ;;  %v3444_v14 = vld [vmem:[%s7551_s9 + $0x70] sm:$0xff] }
 0xe4f   :  { %v5918_v19 = vpop.eup %5917 }
 0xe50   :  { %v3083_v44 = vadd.f32 1.0, %v5918_v19  ;;  %v5920_v26 = vpop.eup %5919  ;;  %v3445_v19 = vld [vmem:[%s7551_s9 + $0x78] sm:$0xff] }
 0xe51   :  { %v3090_v7 = vadd.f32 1.0, %v5920_v26  ;;  %v3524_v26 = vld [vmem:[%s7552_s11] sm:$0xff] }
 0xe52   :  { %5921 = vrcp.f32 %v3083_v44  ;;  %v5694_v44 = vpack.c.bf16 %v3445_v19, %v3444_v14 }
 0xe5c   :  { %v5922_v29 = vpop.eup %5921 }
 0xe5d   :  { %v3093_v24 = vmul.f32 %v5922_v29, %v3078_v41  ;;  %v3525_v41 = vld [vmem:[%s7552_s11 + $0x8] sm:$0xff]  ;;  %v3526_v29 = vld [vmem:[%s7552_s11 + $0x10] sm:$0xff] }
 0xe5f   :  { %v3094_v27 = vadd.f32 %v3093_v24, %v2017_v18  ;;  %v5697_v18 = vpack.c.bf16 %v3525_v41, %v3524_v26  ;;  %v3527_v24 = vld [vmem:[%s7552_s11 + $0x18] sm:$0xff] }
 0xe61   :  { %5923 = vtanh.f32 %v3094_v27  ;;  %v5700_v27 = vpack.c.bf16 %v3527_v24, %v3526_v29 }
 0xe62   :  { %5925 = vrcp.f32 %v3090_v7  ;;  %v3528_v7 = vld [vmem:[%s7552_s11 + $0x20] sm:$0xff] }
 0xe6b   :  { %v5924_v30 = vpop.eup %5923 }
 0xe6c   :  { %v3096_v62 = vsub.f32 %v7319_v36, %v5924_v30  ;;  %v5926_v5 = vpop.eup %5925  ;;  %v3439_v36 = vld [vmem:[%s7551_s9 + $0x48] sm:$0xff] }
 0xe6d   :  { %v5685_v32 = vpack.c.bf16 %v3439_v36, %v3438_v0  ;;  %v3673_v0 = vld [vmem:[%s7554_s12] ss:$0 sm:$0xff] }
 0xe6e   :  { %v3097_v47 = vmul.f32 %v5926_v5, %v3096_v62  ;;  %v3530_v5 = vld [vmem:[%s7552_s11 + $0x30] sm:$0xff] }
 0xe70   :  { %v7364_v46 = vadd.f32 %v5924_v30, %v3097_v47  ;;  %v3529_v30 = vld [vmem:[%s7552_s11 + $0x28] sm:$0xff]  ;;  %v3531_v47 = vld [vmem:[%s7552_s11 + $0x38] sm:$0xff] }
 0xe71   :  { %v5703_v62 = vpack.c.bf16 %v3529_v30, %v3528_v7 }
 0xe72   :  { %3167 = vmatmul.mubr.f32.vlgmr.msra.gmra.mrb[28].mxu0 %v7364_v46  ;;  %4597 = vmatmul.mubr.f32.vlgmr.msra.gmra.mrb[44].mxu1 %v7364_v46 }
 0xe73   :  { %5619 = vmatpush1.bf16.msra.mxu0 %v6840_v17  ;;  %5650 = vmatpush3.bf16.msra.mxu1 %v6956_v50  ;;  %v2022_v50 = vadd.f32 %v7115_v45, %v7134_v28 }
 0xe74   :  { %5621 = vmatprep.subr.bf16.mxu0 %v6850_v9  ;;  %5651 = vmatprep.subr.bf16.mxu1 %v5949_v48 }
 0xe75   :  { %3331 = vmatprep.mubr.f32.mxu0 %v5948_v3  ;;  %4631 = vmatprep.mubr.msk.f32.mxu1 %vm5950_vm1, %v5948_v3 }
 0xe77   :  { %5623 = vmatpush1.bf16.msra.mxu0 %v6858_v16  ;;  %5653 = vmatpush3.bf16.msra.mxu1 %v6985_v1 }
 0xe78   :  { %5625 = vmatprep.subr.bf16.mxu0 %v6868_v31  ;;  %5654 = vmatprep.subr.bf16.mxu1 %v5949_v48 }
 0xe7b   :  { %5627 = vmatpush1.bf16.msra.mxu0 %v6876_v42  ;;  %5656 = vmatpush3.bf16.msra.mxu1 %v7000_v25 }
 0xe7c   :  { %5629 = vmatprep.subr.bf16.mxu0 %v6886_v53  ;;  %5657 = vmatprep.subr.bf16.mxu1 %v5949_v48 }
 0xe7f   :  { %5631 = vmatpush1.bf16.msra.mxu0 %v6894_v63  ;;  %5659 = vmatpush3.bf16.msra.mxu1 %v7006_v6 }
 0xe80   :  { %5633 = vmatprep.subr.bf16.mxu0 %v6904_v10  ;;  %5660 = vmatprep.subr.bf16.mxu1 %v5949_v48 }
 0xe83   :  { %5635 = vmatpush1.bf16.msra.mxu0 %v6912_v21  ;;  %5662 = vmatpush3.bf16.msra.mxu1 %v7016_v22 }
 0xe84   :  { %5637 = vmatprep.subr.bf16.mxu0 %v6922_v34  ;;  %5663 = vmatprep.subr.bf16.mxu1 %v5949_v48 }
 0xe87   :  { %5639 = vmatpush1.bf16.msra.mxu0 %v6930_v20  ;;  %5665 = vmatpush3.bf16.msra.mxu1 %v7026_v40 }
 0xe88   :  { %5641 = vmatprep.subr.bf16.mxu0 %v6942_v59  ;;  %5666 = vmatprep.subr.bf16.mxu1 %v5949_v48 }
 0xe8b   :  { %5643 = vmatpush1.bf16.msra.mxu0 %v6954_v38  ;;  %5668 = vmatpush3.bf16.msra.mxu1 %v7036_v56 }
 0xe8c   :  { %5645 = vmatprep.subr.bf16.mxu0 %v6968_v43  ;;  %5669 = vmatprep.subr.bf16.mxu1 %v5949_v48 }
 0xe8f   :  { %5647 = vmatpush1.bf16.msra.mxu0 %v6976_v60  ;;  %5671 = vmatpush3.bf16.msra.mxu1 %v7046_v8  ;;  %v3430_v8 = vld [vmem:[%s7551_s9] sm:$0xff] }
 0xe90   :  { %5672 = vmatprep.subr.bf16.mxu0 %v5949_v48  ;;  %5696 = vmatprep.subr.bf16.mxu1 %v5949_v48  ;;  %v5673_v45 = vpack.c.bf16 %v3431_v54, %v3430_v8 }
 0xf45   :  { %v3168_v17 = vpop.f32.mrb[28].mxu0  ;;  %v3239_v9 = vpop.f32.mrb[44].mxu1 }
 0xf46   :  { %v5748_v16 = vadd.f32 %v3168_v17, %v7119_v51  ;;  %v3170_v31 = vpop.f32.mrb[29].mxu0  ;;  %v4598_v42 = vpop.f32.mrb[45].mxu1  ;;  %v3243_v59 = vadd.f32 %v7130_v52, %v3239_v9  ;;  %v3532_v17 = vld [vmem:[%s7552_s11 + $0x40] sm:$0xff]  ;;  %v3533_v9 = vld [vmem:[%s7552_s11 + $0x48] sm:$0xff] }
 0xf47   :  { %v5749_v63 = vadd.f32 %v3170_v31, %v7124_v55  ;;  %v3534_v31 = vld [vmem:[%s7552_s11 + $0x50] sm:$0xff]  ;;  %v3535_v42 = vld [vmem:[%s7552_s11 + $0x58] sm:$0xff] }
 0xf48   :  { %v3668_v53 = vmul.f32 -1.442695, %v5748_v16  ;;  %v5709_v16 = vpack.c.bf16 %v3533_v9, %v3532_v17 }
 0xf49   :  { %v3669_v10 = vmul.f32 -1.442695, %v5749_v63  ;;  %v3536_v63 = vld [vmem:[%s7552_s11 + $0x60] sm:$0xff] }
 0xf4a   :  { %5927 = vpow2.f32 %v3668_v53  ;;  %v5712_v53 = vpack.c.bf16 %v3535_v42, %v3534_v31 }
 0xf4b   :  { %5929 = vpow2.f32 %v3669_v10  ;;  %v3537_v10 = vld [vmem:[%s7552_s11 + $0x68] sm:$0xff] }
 0xf54   :  { %v5928_v21 = vpop.eup %5927 }
 0xf55   :  { %v3248_v34 = vadd.f32 1.0, %v5928_v21  ;;  %v5930_v20 = vpop.eup %5929  ;;  %v5715_v21 = vpack.c.bf16 %v3537_v10, %v3536_v63 }
 0xf56   :  { %v3255_v1 = vadd.f32 1.0, %v5930_v20 }
 0xf57   :  { %5931 = vrcp.f32 %v3248_v34 }
 0xf61   :  { %v5932_v38 = vpop.eup %5931 }
 0xf62   :  { %v3258_v43 = vmul.f32 %v5932_v38, %v3243_v59 }
 0xf64   :  { %v3259_v60 = vadd.f32 %v3258_v43, %v2022_v50 }
 0xf66   :  { %5933 = vtanh.f32 %v3259_v60 }
 0xf67   :  { %5935 = vrcp.f32 %v3255_v1 }
 0xf70   :  { %v5934_v25 = vpop.eup %5933 }
 0xf71   :  { %v3261_v6 = vsub.f32 %v7364_v46, %v5934_v25  ;;  %v5936_v22 = vpop.eup %5935  ;;  %v5706_v46 = vpack.c.bf16 %v3531_v47, %v3530_v5 }
 0xf73   :  { %v3262_v40 = vmul.f32 %v5936_v22, %v3261_v6 }
 0xf75   :  { %v7409_v56 = vadd.f32 %v5934_v25, %v3262_v40 }
 0xf77   :  { %3332 = vmatmul.mubr.f32.vlgmr.msra.gmra.mrb[30].mxu0 %v7409_v56  ;;  %4632 = vmatmul.mubr.f32.vlgmr.msra.gmra.mrb[46].mxu1 %v7409_v56 }
 0xf78   :  { %4666 = vmatprep.mubr.msk.f32.mxu0 %vm5950_vm1, %v5948_v3  ;;  %4701 = vmatprep.mubr.msk.f32.mxu1 %vm5950_vm1, %v5948_v3  ;;  %v3433_v3 = vld [vmem:[%s7551_s9 + $0x18] sm:$0xff] }
 0xf79   :  { %5674 = vmatpush3.bf16.msra.mxu0 %v5673_v45  ;;  %v5676_v57 = vpack.c.bf16 %v3433_v3, %v3432_v49  ;;  %5698 = vmatpush3.bf16.msra.mxu1 %v5697_v18 }
 0xf7a   :  { %5675 = vmatprep.subr.bf16.mxu0 %v5949_v48  ;;  %5699 = vmatprep.subr.bf16.mxu1 %v5949_v48 }
 0xf7d   :  { %5677 = vmatpush3.bf16.msra.mxu0 %v5676_v57  ;;  %5701 = vmatpush3.bf16.msra.mxu1 %v5700_v27 }
 0xf7e   :  { %5678 = vmatprep.subr.bf16.mxu0 %v5949_v48  ;;  %5702 = vmatprep.subr.bf16.mxu1 %v5949_v48 }
 0xf81   :  { %5680 = vmatpush3.bf16.msra.mxu0 %v5679_v12  ;;  %5704 = vmatpush3.bf16.msra.mxu1 %v5703_v62  ;;  %v3672_v12 = vld [vmem:[%s7553_s10] ss:$0 sm:$0xff] }
 0xf82   :  { %5681 = vmatprep.subr.bf16.mxu0 %v5949_v48  ;;  %5705 = vmatprep.subr.bf16.mxu1 %v5949_v48 }
 0xf85   :  { %5683 = vmatpush3.bf16.msra.mxu0 %v5682_v15  ;;  %5707 = vmatpush3.bf16.msra.mxu1 %v5706_v46 }
 0xf86   :  { %5684 = vmatprep.subr.bf16.mxu0 %v5949_v48  ;;  %5708 = vmatprep.subr.bf16.mxu1 %v5949_v48 }
 0xf89   :  { %5686 = vmatpush3.bf16.msra.mxu0 %v5685_v32  ;;  %5710 = vmatpush3.bf16.msra.mxu1 %v5709_v16 }
 0xf8a   :  { %5687 = vmatprep.subr.bf16.mxu0 %v5949_v48  ;;  %5711 = vmatprep.subr.bf16.mxu1 %v5949_v48 }
 0xf8d   :  { %5689 = vmatpush3.bf16.msra.mxu0 %v5688_v23  ;;  %5713 = vmatpush3.bf16.msra.mxu1 %v5712_v53 }
 0xf8e   :  { %5690 = vmatprep.subr.bf16.mxu0 %v5949_v48  ;;  %5714 = vmatprep.subr.bf16.mxu1 %v5949_v48 }
 0xf91   :  { %5692 = vmatpush3.bf16.msra.mxu0 %v5691_v2  ;;  %5716 = vmatpush3.bf16.msra.mxu1 %v5715_v21 }
 0xf92   :  { %5693 = vmatprep.subr.bf16.mxu0 %v5949_v48  ;;  %5717 = vmatprep.subr.bf16.mxu1 %v5949_v48  ;;  %v2027_v48 = vadd.f32 %v7113_v33, %v7134_v28  ;;  %v3539_v33 = vld [vmem:[%s7552_s11 + $0x78] sm:$0xff] }
 0xf95   :  { %5695 = vmatpush3.bf16.msra.mxu0 %v5694_v44 }
0x104a   :  { %v3333_v34 = vpop.f32.mrb[30].mxu0  ;;  %v3404_v20 = vpop.f32.mrb[46].mxu1 }
0x104b   :  { %v5750_v59 = vadd.f32 %v3333_v34, %v7119_v51  ;;  %v3335_v38 = vpop.f32.mrb[31].mxu0  ;;  %v4633_v50 = vpop.f32.mrb[47].mxu1  ;;  %v3408_v40 = vadd.f32 %v7130_v52, %v3404_v20  ;;  %v3538_v52 = vld [vmem:[%s7552_s11 + $0x70] sm:$0xff] }
0x104c   :  { %v5751_v60 = vadd.f32 %v3335_v38, %v7124_v55  ;;  %v5718_v28 = vpack.c.bf16 %v3539_v33, %v3538_v52 }
0x104d   :  { %v3670_v43 = vmul.f32 -1.442695, %v5750_v59 }
0x104e   :  { %v3671_v1 = vmul.f32 -1.442695, %v5751_v60  ;;  %5719 = vmatpush3.bf16.msra.mxu1 %v5718_v28 }
0x104f   :  { %5937 = vpow2.f32 %v3670_v43 }
0x1050   :  { %5939 = vpow2.f32 %v3671_v1 }
0x1059   :  { %v5938_v25 = vpop.eup %5937 }
0x105a   :  { %v3413_v6 = vadd.f32 1.0, %v5938_v25  ;;  %v5940_v22 = vpop.eup %5939 }
0x105b   :  { %v3420_v45 = vadd.f32 1.0, %v5940_v22 }
0x105c   :  { %5941 = vrcp.f32 %v3413_v6 }
0x1066   :  { %v5942_v8 = vpop.eup %5941 }
0x1067   :  { %v3423_v54 = vmul.f32 %v5942_v8, %v3408_v40 }
0x1069   :  { %v3424_v51 = vadd.f32 %v3423_v54, %v2027_v48 }
0x106b   :  { %5943 = vtanh.f32 %v3424_v51 }
0x106c   :  { %5945 = vrcp.f32 %v3420_v45 }
0x1075   :  { %v5944_v49 = vpop.eup %5943 }
0x1076   :  { %v3426_v55 = vsub.f32 %v7409_v56, %v5944_v49  ;;  %v5946_v3 = vpop.eup %5945 }
0x1078   :  { %v3427_v57 = vmul.f32 %v5946_v3, %v3426_v55 }
0x107a   :  { %v3428_v58 = vadd.f32 %v5944_v49, %v3427_v57 }
0x107c   :  { %v3429_v39 = vmax.f32 %v3428_v58, 0.0 }
0x107e   :  { %4667 = vmatmul.mubr.f32.vlgmr.msra.gmra.mrb[32].mxu0 %v3429_v39 }
0x1151   :  { %v3519_v56 = vpop.f32.mrb[32].mxu0 }
0x1152   :  { %v3520_v4 = vadd.f32 %v3672_v12, %v3519_v56  ;;  %v4668_v13 = vpop.f32.mrb[33].mxu0 }
0x1154   :  { %v3523_v15 = vmax.f32 %v3520_v4, 0.0 }
0x1156   :  { %4702 = vmatmul.mubr.f32.vlgmr.msra.gmra.mrb[48].mxu1 %v3523_v15 }
0x1229   :  { %v3613_v36 = vpop.f32.mrb[48].mxu1 }
0x122a   :  { %v3614_v32 = vadd.f32 %v3673_v0, %v3613_v36  ;;  %v4703_v37 = vpop.f32.mrb[49].mxu1 }
0x122c   :  { %3617 = vst [vmem:[%s7555_s13] sm:$0xff] %v3614_v32 }

</bundles_post_ra>
